<compile_context>
chip_gen: v5e
topology: v5e:2x2
jax: 0.10.0
libtpu: 0.0.40
codegen_flags: <defaults>
</compile_context>

<pallas_src>
import functools

import jax
import jax.numpy as jnp
from jax import lax
from jax.experimental import pallas as pl
from jax.experimental.pallas import tpu as pltpu


# ----------------------------------------------------------------------------
# Pallas kernel: one (depth, batch) step of a SAME 3x3x3 conv, NCDHW layout.
# ----------------------------------------------------------------------------
def _conv3d_3x3x3_kernel(xm1_ref, x0_ref, xp1_ref, w_ref, b_ref, o_ref, zpad_ref,
                         *, tile_h):
    """
    xm1/x0/xp1_ref: (Cin, Ho, Wo)  depth planes d-1, d, d+1 (index clamped at the ends)
    w_ref:          (3, Cout, 9*Cin)  per-depth-tap weights, (kh, kw, ci) folded into K
    b_ref:          (Cout, 1) float32
    o_ref:          (Cout, Ho, Wo)  output slice at depth d = program_id(0)
    zpad_ref:       (3, Cin, Ho+2, Wo+2) VMEM scratch; zero border == fused padding
    """
    d = pl.program_id(0)
    nd = pl.num_programs(0)
    cout, ho, wo = o_ref.shape
    cin = x0_ref.shape[0]

    # Fused SAME padding: zero the scratch, write each depth tap into the interior;
    # the 1-wide border stays zero (re-zeroed every step -> megacore safe).
    zpad_ref[...] = jnp.zeros(zpad_ref.shape, zpad_ref.dtype)
    planes = (xm1_ref, x0_ref, xp1_ref)
    for kd in range(3):
        zpad_ref[kd, :, 1:1 + ho, 1:1 + wo] = planes[kd][...].astype(zpad_ref.dtype)

    # Process H in tiles so the f32 accumulator stays register/VMEM friendly.
    for r0 in range(0, ho, tile_h):
        acc = jnp.zeros((cout, tile_h * wo), jnp.float32) + b_ref[...]
        for kd in range(3):
            zp = zpad_ref[kd]                                   # (Cin, Ho+2, Wo+2)
            # im2col: fold the 9 (kh, kw) taps into the contraction dimension.
            parts = []
            for kh in range(3):
                for kw in range(3):
                    blk = zp[:, r0 + kh:r0 + kh + tile_h, kw:kw + wo]
                    parts.append(blk.reshape(cin, tile_h * wo))
            slab = jnp.concatenate(parts, axis=0)               # (9*Cin, tile_h*Wo)
            contrib = jnp.dot(w_ref[kd], slab,
                              preferred_element_type=jnp.float32)
            if kd == 0:                                         # depth tap d-1
                contrib = jnp.where(d > 0, contrib, 0.0)
            elif kd == 2:                                       # depth tap d+1
                contrib = jnp.where(d < nd - 1, contrib, 0.0)
            acc = acc + contrib
        o_ref[:, r0:r0 + tile_h, :] = acc.reshape(cout, tile_h, wo).astype(o_ref.dtype)


def conv3d_3x3x3_pallas(x, weight, bias, *, compute_dtype=None):
    """x: (B, Cin, D, H, W) NCDHW; weight: (Cout, Cin, 3, 3, 3) OIDHW; bias: (Cout,).
    Returns (B, Cout, D, H, W): SAME conv, stride 1, padding 1, with bias."""
    B, Cin, Do, Ho, Wo = x.shape
    Cout = weight.shape[0]
    cdt = x.dtype if compute_dtype is None else compute_dtype
    K9 = 9 * Cin

    # (Cout, Cin, kd, kh, kw) -> (kd, Cout, kh, kw, Cin) -> (3, Cout, 9*Cin)
    w3 = jnp.transpose(weight, (2, 0, 3, 4, 1)).reshape(3, Cout, K9).astype(cdt)
    b2 = bias.reshape(Cout, 1).astype(jnp.float32)
    xc = x.astype(cdt)

    # H tile: largest divisor of Ho keeping the f32 accumulator (Cout x tile_h*Wo) small.
    tile_h = 1
    for cand in range(Ho, 0, -1):
        if Ho % cand == 0 and cand * Wo <= 4096:
            tile_h = cand
            break

    ebytes = jnp.dtype(cdt).itemsize
    plane = Cin * Ho * Wo * ebytes
    need = (2 * (3 * plane + Cout * Ho * Wo * x.dtype.itemsize + 3 * Cout * K9 * ebytes)
            + 3 * Cin * (Ho + 2) * (Wo + 2) * ebytes)
    vmem_limit = int(min(max(2 * need, 32 * 1024 * 1024), 64 * 1024 * 1024))

    x_block = (None, Cin, None, Ho, Wo)          # 3-deep depth window, one plane each
    in_specs = [
        pl.BlockSpec(x_block, lambda d, b: (b, 0, jnp.maximum(d - 1, 0), 0, 0)),
        pl.BlockSpec(x_block, lambda d, b: (b, 0, d, 0, 0)),
        pl.BlockSpec(x_block, lambda d, b: (b, 0, jnp.minimum(d + 1, Do - 1), 0, 0)),
        # weights/bias: constant block index -> DMA'd once, never re-fetched
        pl.BlockSpec((3, Cout, K9), lambda d, b: (0, 0, 0)),
        pl.BlockSpec((Cout, 1), lambda d, b: (0, 0)),
    ]

    return pl.pallas_call(
        functools.partial(_conv3d_3x3x3_kernel, tile_h=tile_h),
        out_shape=jax.ShapeDtypeStruct((B, Cout, Do, Ho, Wo), x.dtype),
        grid_spec=pltpu.PrefetchScalarGridSpec(
            num_scalar_prefetch=0,
            grid=(Do, B),        # large (depth) axis first -> useful megacore split
            in_specs=in_specs,
            out_specs=pl.BlockSpec((None, Cout, None, Ho, Wo),
                                   lambda d, b: (b, 0, d, 0, 0)),
            scratch_shapes=[pltpu.VMEM((3, Cin, Ho + 2, Wo + 2), cdt)],
        ),
        compiler_params=pltpu.CompilerParams(
            dimension_semantics=("parallel", "parallel"),
            vmem_limit_bytes=vmem_limit),
    )(xc, xc, xc, w3, b2)


# ----------------------------------------------------------------------------
# Trilinear upsample, align_corners=True, as per-axis interpolation matmuls (glue).
# ----------------------------------------------------------------------------
def _interp_matrix(in_size, out_size, dtype=jnp.float32):
    """M (out, in) s.t. M @ v == 1-D linear interpolation with align_corners=True."""
    if in_size == 1 or out_size == 1:
        return jnp.zeros((out_size, in_size), dtype).at[:, 0].set(1.0)
    coord = jnp.arange(out_size, dtype=jnp.float32) * (in_size - 1) / (out_size - 1)
    i0 = jnp.clip(jnp.floor(coord).astype(jnp.int32), 0, in_size - 1)
    i1 = jnp.clip(i0 + 1, 0, in_size - 1)
    w = coord - jnp.floor(coord)
    rows = jnp.arange(out_size)
    M = jnp.zeros((out_size, in_size), jnp.float32)
    M = M.at[rows, i0].add(1.0 - w)
    M = M.at[rows, i1].add(w)
    return M.astype(dtype)


def trilinear_upsample(x, scale_factor):
    """x: (B, C, D, H, W) -> upsampled NCDHW, mode='trilinear', align_corners=True.
    Three sequential per-axis contractions; stays in NCDHW (no transposes)."""
    _, _, D, H, W = x.shape
    sd, sh, sw = scale_factor
    Mw = _interp_matrix(W, W * sw, x.dtype)
    Mh = _interp_matrix(H, H * sh, x.dtype)
    Md = _interp_matrix(D, D * sd, x.dtype)
    hi = lax.Precision.HIGHEST
    y = jnp.einsum('bcdhw,pw->bcdhp', x, Mw, precision=hi)   # W axis (lanes)
    y = jnp.einsum('bcdhp,qh->bcdqp', y, Mh, precision=hi)   # H axis
    y = jnp.einsum('bcdqp,rd->bcrqp', y, Md, precision=hi)   # D axis
    return y


# ----------------------------------------------------------------------------
# Up_Block equivalent
# ----------------------------------------------------------------------------
class UpBlockPallas:
    """Upsample(trilinear, x2, align_corners=True) + Conv3d(C -> C//2, k=3, p=1)."""

    def __init__(self, init_feat, scale_factor=(2, 2, 2), key=None,
                 compute_dtype=jnp.float32):
        key = jax.random.PRNGKey(0) if key is None else key
        cin, cout = init_feat, init_feat // 2
        kw_, kb_ = jax.random.split(key)
        fan_in = cin * 27
        bound = 1.0 / (fan_in ** 0.5)
        # PyTorch Conv3d default init U(-1/sqrt(fan_in), +1/sqrt(fan_in)), OIDHW layout
        self.weight = jax.random.uniform(kw_, (cout, cin, 3, 3, 3), jnp.float32,
                                         -bound, bound)
        self.bias = jax.random.uniform(kb_, (cout,), jnp.float32, -bound, bound)
        self.scale_factor = scale_factor
        self.compute_dtype = compute_dtype   # set jnp.bfloat16 for ~2x MXU throughput

    def __call__(self, x):
        # x: (B, C, D, H, W) NCDHW -> (B, C//2, 2D, 2H, 2W) NCDHW
        up = trilinear_upsample(x, self.scale_factor)
        return conv3d_3x3x3_pallas(up, self.weight, self.bias,
                                   compute_dtype=self.compute_dtype)


if __name__ == "__main__":
    key = jax.random.PRNGKey(0)
    kx, kp = jax.random.split(key)

    B, C, D, H, W = 2, 4, 4, 4, 4
    x = jax.random.normal(kx, (B, C, D, H, W), jnp.float32)

    block = UpBlockPallas(init_feat=C, scale_factor=(2, 2, 2), key=kp)
    out = jax.block_until_ready(block(x))
    assert out.shape == (B, C // 2, 2 * D, 2 * H, 2 * W), out.shape

    # Numerical cross-check of the Pallas conv against the XLA reference
    # on the same upsampled input (isolates the conv kernel itself).
    up = trilinear_upsample(x, (2, 2, 2))
    ref = lax.conv_general_dilated(
        up, block.weight, window_strides=(1, 1, 1),
        padding=((1, 1), (1, 1), (1, 1)),
        dimension_numbers=('NCDHW', 'OIDHW', 'NCDHW'),
        precision=lax.Precision.HIGHEST,
    ) + block.bias[None, :, None, None, None]
    max_err = float(jnp.max(jnp.abs(out - ref)))
    assert max_err < 2e-3, f"max abs error {max_err}"

    print("KERNEL_OK")
</pallas_src>

<mosaic_0001>
module attributes {stable_mosaic.version = 11 : i64} {
  func.func @_conv3d_3x3x3_kernel(%arg0: i32, %arg1: i32, %arg2: memref<1x4x1x8x8xf32, #tpu.memory_space<vmem>>, %arg3: memref<1x4x1x8x8xf32, #tpu.memory_space<vmem>>, %arg4: memref<1x4x1x8x8xf32, #tpu.memory_space<vmem>>, %arg5: memref<3x2x36xf32, #tpu.memory_space<vmem>>, %arg6: memref<2x1xf32, #tpu.memory_space<vmem>>, %arg7: memref<1x2x1x8x8xf32, #tpu.memory_space<vmem>>, %arg8: memref<3x4x10x10xf32, #tpu.memory_space<vmem>>) attributes {dimension_semantics = [#tpu.dimension_semantics<parallel>, #tpu.dimension_semantics<parallel>], iteration_bounds = array<i64: 8, 2>, scalar_prefetch = 0 : i64, scratch_operands = 1 : i64, tpu.core_type = #tpu.core_type<tc>, window_params = [{transform_indices = @transform_0, window_bounds = array<i64: 1, 4, 1, 8, 8>}, {transform_indices = @transform_1, window_bounds = array<i64: 1, 4, 1, 8, 8>}, {transform_indices = @transform_2, window_bounds = array<i64: 1, 4, 1, 8, 8>}, {pipeline_mode = #tpu.pipeline_mode<synchronous>, transform_indices = @transform_3, window_bounds = array<i64: 3, 2, 36>}, {pipeline_mode = #tpu.pipeline_mode<synchronous>, transform_indices = @transform_4, window_bounds = array<i64: 2, 1>}, {transform_indices = @transform_5, window_bounds = array<i64: 1, 2, 1, 8, 8>}]} {
    %cst = arith.constant 0.000000e+00 : f32
    %0 = vector.broadcast %cst : f32 to vector<3x4x10x10xf32>
    %c0 = arith.constant 0 : index
    %c0_0 = arith.constant 0 : index
    %c0_1 = arith.constant 0 : index
    %c0_2 = arith.constant 0 : index
    %1 = vector.load %arg8[%c0, %c0_0, %c0_1, %c0_2] : memref<3x4x10x10xf32, #tpu.memory_space<vmem>>, vector<3x4x10x10xf32>
    tpu.vector_store %arg8[%c0, %c0_0, %c0_1, %c0_2], %0 {strides = array<i32>} : memref<3x4x10x10xf32, #tpu.memory_space<vmem>>, vector<3x4x10x10xf32>,
    %c0_3 = arith.constant 0 : index
    %c0_4 = arith.constant 0 : index
    %c0_5 = arith.constant 0 : index
    %c0_6 = arith.constant 0 : index
    %c0_7 = arith.constant 0 : index
    %2 = vector.load %arg2[%c0_3, %c0_4, %c0_5, %c0_6, %c0_7] : memref<1x4x1x8x8xf32, #tpu.memory_space<vmem>>, vector<1x4x1x8x8xf32>
    %3 = vector.shape_cast %2 : vector<1x4x1x8x8xf32> to vector<4x8x8xf32>
    %c0_8 = arith.constant 0 : index
    %c0_9 = arith.constant 0 : index
    %c1 = arith.constant 1 : index
    %c1_10 = arith.constant 1 : index
    %4 = vector.load %arg8[%c0_8, %c0_9, %c1, %c1_10] : memref<3x4x10x10xf32, #tpu.memory_space<vmem>>, vector<1x4x8x8xf32>
    %5 = vector.shape_cast %4 : vector<1x4x8x8xf32> to vector<4x8x8xf32>
    %6 = vector.shape_cast %3 : vector<4x8x8xf32> to vector<1x4x8x8xf32>
    tpu.vector_store %arg8[%c0_8, %c0_9, %c1, %c1_10], %6 {strides = array<i32>} : memref<3x4x10x10xf32, #tpu.memory_space<vmem>>, vector<1x4x8x8xf32>,
    %c0_11 = arith.constant 0 : index
    %c0_12 = arith.constant 0 : index
    %c0_13 = arith.constant 0 : index
    %c0_14 = arith.constant 0 : index
    %c0_15 = arith.constant 0 : index
    %7 = vector.load %arg3[%c0_11, %c0_12, %c0_13, %c0_14, %c0_15] : memref<1x4x1x8x8xf32, #tpu.memory_space<vmem>>, vector<1x4x1x8x8xf32>
    %8 = vector.shape_cast %7 : vector<1x4x1x8x8xf32> to vector<4x8x8xf32>
    %c1_16 = arith.constant 1 : index
    %c0_17 = arith.constant 0 : index
    %c1_18 = arith.constant 1 : index
    %c1_19 = arith.constant 1 : index
    %9 = vector.load %arg8[%c1_16, %c0_17, %c1_18, %c1_19] : memref<3x4x10x10xf32, #tpu.memory_space<vmem>>, vector<1x4x8x8xf32>
    %10 = vector.shape_cast %9 : vector<1x4x8x8xf32> to vector<4x8x8xf32>
    %11 = vector.shape_cast %8 : vector<4x8x8xf32> to vector<1x4x8x8xf32>
    tpu.vector_store %arg8[%c1_16, %c0_17, %c1_18, %c1_19], %11 {strides = array<i32>} : memref<3x4x10x10xf32, #tpu.memory_space<vmem>>, vector<1x4x8x8xf32>,
    %c0_20 = arith.constant 0 : index
    %c0_21 = arith.constant 0 : index
    %c0_22 = arith.constant 0 : index
    %c0_23 = arith.constant 0 : index
    %c0_24 = arith.constant 0 : index
    %12 = vector.load %arg4[%c0_20, %c0_21, %c0_22, %c0_23, %c0_24] : memref<1x4x1x8x8xf32, #tpu.memory_space<vmem>>, vector<1x4x1x8x8xf32>
    %13 = vector.shape_cast %12 : vector<1x4x1x8x8xf32> to vector<4x8x8xf32>
    %c2 = arith.constant 2 : index
    %c0_25 = arith.constant 0 : index
    %c1_26 = arith.constant 1 : index
    %c1_27 = arith.constant 1 : index
    %14 = vector.load %arg8[%c2, %c0_25, %c1_26, %c1_27] : memref<3x4x10x10xf32, #tpu.memory_space<vmem>>, vector<1x4x8x8xf32>
    %15 = vector.shape_cast %14 : vector<1x4x8x8xf32> to vector<4x8x8xf32>
    %16 = vector.shape_cast %13 : vector<4x8x8xf32> to vector<1x4x8x8xf32>
    tpu.vector_store %arg8[%c2, %c0_25, %c1_26, %c1_27], %16 {strides = array<i32>} : memref<3x4x10x10xf32, #tpu.memory_space<vmem>>, vector<1x4x8x8xf32>,
    %cst_28 = arith.constant 0.000000e+00 : f32
    %17 = vector.broadcast %cst_28 : f32 to vector<2x64xf32>
    %c0_29 = arith.constant 0 : index
    %c0_30 = arith.constant 0 : index
    %18 = vector.load %arg6[%c0_29, %c0_30] : memref<2x1xf32, #tpu.memory_space<vmem>>, vector<2x1xf32>
    %19 = vector.broadcast %18 : vector<2x1xf32> to vector<2x64xf32>
    %20 = arith.addf %17, %19 : vector<2x64xf32>
    %c0_31 = arith.constant 0 : index
    %c0_32 = arith.constant 0 : index
    %c0_33 = arith.constant 0 : index
    %c0_34 = arith.constant 0 : index
    %21 = vector.load %arg8[%c0_31, %c0_32, %c0_33, %c0_34] : memref<3x4x10x10xf32, #tpu.memory_space<vmem>>, vector<1x4x10x10xf32>
    %22 = vector.shape_cast %21 : vector<1x4x10x10xf32> to vector<4x10x10xf32>
    %23 = vector.extract_strided_slice %22 {offsets = [0, 0, 0], sizes = [4, 8, 8], strides = [1, 1, 1]} : vector<4x10x10xf32> to vector<4x8x8xf32>
    %24 = vector.shape_cast %23 : vector<4x8x8xf32> to vector<4x64xf32>
    %25 = vector.extract_strided_slice %22 {offsets = [0, 0, 1], sizes = [4, 8, 8], strides = [1, 1, 1]} : vector<4x10x10xf32> to vector<4x8x8xf32>
    %26 = vector.shape_cast %25 : vector<4x8x8xf32> to vector<4x64xf32>
    %27 = vector.extract_strided_slice %22 {offsets = [0, 0, 2], sizes = [4, 8, 8], strides = [1, 1, 1]} : vector<4x10x10xf32> to vector<4x8x8xf32>
    %28 = vector.shape_cast %27 : vector<4x8x8xf32> to vector<4x64xf32>
    %29 = vector.extract_strided_slice %22 {offsets = [0, 1, 0], sizes = [4, 8, 8], strides = [1, 1, 1]} : vector<4x10x10xf32> to vector<4x8x8xf32>
    %30 = vector.shape_cast %29 : vector<4x8x8xf32> to vector<4x64xf32>
    %31 = vector.extract_strided_slice %22 {offsets = [0, 1, 1], sizes = [4, 8, 8], strides = [1, 1, 1]} : vector<4x10x10xf32> to vector<4x8x8xf32>
    %32 = vector.shape_cast %31 : vector<4x8x8xf32> to vector<4x64xf32>
    %33 = vector.extract_strided_slice %22 {offsets = [0, 1, 2], sizes = [4, 8, 8], strides = [1, 1, 1]} : vector<4x10x10xf32> to vector<4x8x8xf32>
    %34 = vector.shape_cast %33 : vector<4x8x8xf32> to vector<4x64xf32>
    %35 = vector.extract_strided_slice %22 {offsets = [0, 2, 0], sizes = [4, 8, 8], strides = [1, 1, 1]} : vector<4x10x10xf32> to vector<4x8x8xf32>
    %36 = vector.shape_cast %35 : vector<4x8x8xf32> to vector<4x64xf32>
    %37 = vector.extract_strided_slice %22 {offsets = [0, 2, 1], sizes = [4, 8, 8], strides = [1, 1, 1]} : vector<4x10x10xf32> to vector<4x8x8xf32>
    %38 = vector.shape_cast %37 : vector<4x8x8xf32> to vector<4x64xf32>
    %39 = vector.extract_strided_slice %22 {offsets = [0, 2, 2], sizes = [4, 8, 8], strides = [1, 1, 1]} : vector<4x10x10xf32> to vector<4x8x8xf32>
    %40 = vector.shape_cast %39 : vector<4x8x8xf32> to vector<4x64xf32>
    %41 = tpu.concatenate %24, %26, %28, %30, %32, %34, %36, %38, %40 in 0 : vector<4x64xf32>, vector<4x64xf32>, vector<4x64xf32>, vector<4x64xf32>, vector<4x64xf32>, vector<4x64xf32>, vector<4x64xf32>, vector<4x64xf32>, vector<4x64xf32> -> vector<36x64xf32>
    %c0_35 = arith.constant 0 : index
    %c0_36 = arith.constant 0 : index
    %c0_37 = arith.constant 0 : index
    %42 = vector.load %arg5[%c0_35, %c0_36, %c0_37] : memref<3x2x36xf32, #tpu.memory_space<vmem>>, vector<1x2x36xf32>
    %43 = vector.shape_cast %42 : vector<1x2x36xf32> to vector<2x36xf32>
    %cst_38 = arith.constant dense<0.000000e+00> : vector<2x64xf32>
    %44 = tpu.matmul %43, %41, %cst_38 {dimension_numbers = #tpu.dot_dimension_numbers<[1], [0], [0], [1], [0, 0, 1, 1], [], []>} : vector<2x36xf32>, vector<36x64xf32>, vector<2x64xf32> -> vector<2x64xf32>
    %c0_i32 = arith.constant 0 : i32
    %45 = arith.cmpi sgt, %arg0, %c0_i32 : i32
    %cst_39 = arith.constant 0.000000e+00 : f32
    %46 = vector.broadcast %cst_39 : f32 to vector<2x64xf32>
    %47 = arith.select %45, %44, %46 : vector<2x64xf32>
    %48 = arith.addf %20, %47 : vector<2x64xf32>
    %c1_40 = arith.constant 1 : index
    %c0_41 = arith.constant 0 : index
    %c0_42 = arith.constant 0 : index
    %c0_43 = arith.constant 0 : index
    %49 = vector.load %arg8[%c1_40, %c0_41, %c0_42, %c0_43] : memref<3x4x10x10xf32, #tpu.memory_space<vmem>>, vector<1x4x10x10xf32>
    %50 = vector.shape_cast %49 : vector<1x4x10x10xf32> to vector<4x10x10xf32>
    %51 = vector.extract_strided_slice %50 {offsets = [0, 0, 0], sizes = [4, 8, 8], strides = [1, 1, 1]} : vector<4x10x10xf32> to vector<4x8x8xf32>
    %52 = vector.shape_cast %51 : vector<4x8x8xf32> to vector<4x64xf32>
    %53 = vector.extract_strided_slice %50 {offsets = [0, 0, 1], sizes = [4, 8, 8], strides = [1, 1, 1]} : vector<4x10x10xf32> to vector<4x8x8xf32>
    %54 = vector.shape_cast %53 : vector<4x8x8xf32> to vector<4x64xf32>
    %55 = vector.extract_strided_slice %50 {offsets = [0, 0, 2], sizes = [4, 8, 8], strides = [1, 1, 1]} : vector<4x10x10xf32> to vector<4x8x8xf32>
    %56 = vector.shape_cast %55 : vector<4x8x8xf32> to vector<4x64xf32>
    %57 = vector.extract_strided_slice %50 {offsets = [0, 1, 0], sizes = [4, 8, 8], strides = [1, 1, 1]} : vector<4x10x10xf32> to vector<4x8x8xf32>
    %58 = vector.shape_cast %57 : vector<4x8x8xf32> to vector<4x64xf32>
    %59 = vector.extract_strided_slice %50 {offsets = [0, 1, 1], sizes = [4, 8, 8], strides = [1, 1, 1]} : vector<4x10x10xf32> to vector<4x8x8xf32>
    %60 = vector.shape_cast %59 : vector<4x8x8xf32> to vector<4x64xf32>
    %61 = vector.extract_strided_slice %50 {offsets = [0, 1, 2], sizes = [4, 8, 8], strides = [1, 1, 1]} : vector<4x10x10xf32> to vector<4x8x8xf32>
    %62 = vector.shape_cast %61 : vector<4x8x8xf32> to vector<4x64xf32>
    %63 = vector.extract_strided_slice %50 {offsets = [0, 2, 0], sizes = [4, 8, 8], strides = [1, 1, 1]} : vector<4x10x10xf32> to vector<4x8x8xf32>
    %64 = vector.shape_cast %63 : vector<4x8x8xf32> to vector<4x64xf32>
    %65 = vector.extract_strided_slice %50 {offsets = [0, 2, 1], sizes = [4, 8, 8], strides = [1, 1, 1]} : vector<4x10x10xf32> to vector<4x8x8xf32>
    %66 = vector.shape_cast %65 : vector<4x8x8xf32> to vector<4x64xf32>
    %67 = vector.extract_strided_slice %50 {offsets = [0, 2, 2], sizes = [4, 8, 8], strides = [1, 1, 1]} : vector<4x10x10xf32> to vector<4x8x8xf32>
    %68 = vector.shape_cast %67 : vector<4x8x8xf32> to vector<4x64xf32>
    %69 = tpu.concatenate %52, %54, %56, %58, %60, %62, %64, %66, %68 in 0 : vector<4x64xf32>, vector<4x64xf32>, vector<4x64xf32>, vector<4x64xf32>, vector<4x64xf32>, vector<4x64xf32>, vector<4x64xf32>, vector<4x64xf32>, vector<4x64xf32> -> vector<36x64xf32>
    %c1_44 = arith.constant 1 : index
    %c0_45 = arith.constant 0 : index
    %c0_46 = arith.constant 0 : index
    %70 = vector.load %arg5[%c1_44, %c0_45, %c0_46] : memref<3x2x36xf32, #tpu.memory_space<vmem>>, vector<1x2x36xf32>
    %71 = vector.shape_cast %70 : vector<1x2x36xf32> to vector<2x36xf32>
    %cst_47 = arith.constant dense<0.000000e+00> : vector<2x64xf32>
    %72 = tpu.matmul %71, %69, %cst_47 {dimension_numbers = #tpu.dot_dimension_numbers<[1], [0], [0], [1], [0, 0, 1, 1], [], []>} : vector<2x36xf32>, vector<36x64xf32>, vector<2x64xf32> -> vector<2x64xf32>
    %73 = arith.addf %48, %72 : vector<2x64xf32>
    %c2_48 = arith.constant 2 : index
    %c0_49 = arith.constant 0 : index
    %c0_50 = arith.constant 0 : index
    %c0_51 = arith.constant 0 : index
    %74 = vector.load %arg8[%c2_48, %c0_49, %c0_50, %c0_51] : memref<3x4x10x10xf32, #tpu.memory_space<vmem>>, vector<1x4x10x10xf32>
    %75 = vector.shape_cast %74 : vector<1x4x10x10xf32> to vector<4x10x10xf32>
    %76 = vector.extract_strided_slice %75 {offsets = [0, 0, 0], sizes = [4, 8, 8], strides = [1, 1, 1]} : vector<4x10x10xf32> to vector<4x8x8xf32>
    %77 = vector.shape_cast %76 : vector<4x8x8xf32> to vector<4x64xf32>
    %78 = vector.extract_strided_slice %75 {offsets = [0, 0, 1], sizes = [4, 8, 8], strides = [1, 1, 1]} : vector<4x10x10xf32> to vector<4x8x8xf32>
    %79 = vector.shape_cast %78 : vector<4x8x8xf32> to vector<4x64xf32>
    %80 = vector.extract_strided_slice %75 {offsets = [0, 0, 2], sizes = [4, 8, 8], strides = [1, 1, 1]} : vector<4x10x10xf32> to vector<4x8x8xf32>
    %81 = vector.shape_cast %80 : vector<4x8x8xf32> to vector<4x64xf32>
    %82 = vector.extract_strided_slice %75 {offsets = [0, 1, 0], sizes = [4, 8, 8], strides = [1, 1, 1]} : vector<4x10x10xf32> to vector<4x8x8xf32>
    %83 = vector.shape_cast %82 : vector<4x8x8xf32> to vector<4x64xf32>
    %84 = vector.extract_strided_slice %75 {offsets = [0, 1, 1], sizes = [4, 8, 8], strides = [1, 1, 1]} : vector<4x10x10xf32> to vector<4x8x8xf32>
    %85 = vector.shape_cast %84 : vector<4x8x8xf32> to vector<4x64xf32>
    %86 = vector.extract_strided_slice %75 {offsets = [0, 1, 2], sizes = [4, 8, 8], strides = [1, 1, 1]} : vector<4x10x10xf32> to vector<4x8x8xf32>
    %87 = vector.shape_cast %86 : vector<4x8x8xf32> to vector<4x64xf32>
    %88 = vector.extract_strided_slice %75 {offsets = [0, 2, 0], sizes = [4, 8, 8], strides = [1, 1, 1]} : vector<4x10x10xf32> to vector<4x8x8xf32>
    %89 = vector.shape_cast %88 : vector<4x8x8xf32> to vector<4x64xf32>
    %90 = vector.extract_strided_slice %75 {offsets = [0, 2, 1], sizes = [4, 8, 8], strides = [1, 1, 1]} : vector<4x10x10xf32> to vector<4x8x8xf32>
    %91 = vector.shape_cast %90 : vector<4x8x8xf32> to vector<4x64xf32>
    %92 = vector.extract_strided_slice %75 {offsets = [0, 2, 2], sizes = [4, 8, 8], strides = [1, 1, 1]} : vector<4x10x10xf32> to vector<4x8x8xf32>
    %93 = vector.shape_cast %92 : vector<4x8x8xf32> to vector<4x64xf32>
    %94 = tpu.concatenate %77, %79, %81, %83, %85, %87, %89, %91, %93 in 0 : vector<4x64xf32>, vector<4x64xf32>, vector<4x64xf32>, vector<4x64xf32>, vector<4x64xf32>, vector<4x64xf32>, vector<4x64xf32>, vector<4x64xf32>, vector<4x64xf32> -> vector<36x64xf32>
    %c2_52 = arith.constant 2 : index
    %c0_53 = arith.constant 0 : index
    %c0_54 = arith.constant 0 : index
    %95 = vector.load %arg5[%c2_52, %c0_53, %c0_54] : memref<3x2x36xf32, #tpu.memory_space<vmem>>, vector<1x2x36xf32>
    %96 = vector.shape_cast %95 : vector<1x2x36xf32> to vector<2x36xf32>
    %cst_55 = arith.constant dense<0.000000e+00> : vector<2x64xf32>
    %97 = tpu.matmul %96, %94, %cst_55 {dimension_numbers = #tpu.dot_dimension_numbers<[1], [0], [0], [1], [0, 0, 1, 1], [], []>} : vector<2x36xf32>, vector<36x64xf32>, vector<2x64xf32> -> vector<2x64xf32>
    %c7_i32 = arith.constant 7 : i32
    %98 = arith.cmpi slt, %arg0, %c7_i32 : i32
    %cst_56 = arith.constant 0.000000e+00 : f32
    %99 = vector.broadcast %cst_56 : f32 to vector<2x64xf32>
    %100 = arith.select %98, %97, %99 : vector<2x64xf32>
    %101 = arith.addf %73, %100 : vector<2x64xf32>
    %102 = vector.shape_cast %101 : vector<2x64xf32> to vector<2x8x8xf32>
    %c0_57 = arith.constant 0 : index
    %c0_58 = arith.constant 0 : index
    %c0_59 = arith.constant 0 : index
    %c0_60 = arith.constant 0 : index
    %c0_61 = arith.constant 0 : index
    %103 = vector.load %arg7[%c0_57, %c0_58, %c0_59, %c0_60, %c0_61] : memref<1x2x1x8x8xf32, #tpu.memory_space<vmem>>, vector<1x2x1x8x8xf32>
    %104 = vector.shape_cast %103 : vector<1x2x1x8x8xf32> to vector<2x8x8xf32>
    %105 = vector.shape_cast %102 : vector<2x8x8xf32> to vector<1x2x1x8x8xf32>
    tpu.vector_store %arg7[%c0_57, %c0_58, %c0_59, %c0_60, %c0_61], %105 {strides = array<i32>} : memref<1x2x1x8x8xf32, #tpu.memory_space<vmem>>, vector<1x2x1x8x8xf32>,
    return
  }
  func.func @transform_0(%arg0: i32, %arg1: i32) -> (i32, i32, i32, i32, i32) {
    %c1_i32 = arith.constant 1 : i32
    %0 = arith.subi %arg0, %c1_i32 : i32
    %c0_i32 = arith.constant 0 : i32
    %1 = arith.maxsi %0, %c0_i32 : i32
    %c0_i32_0 = arith.constant 0 : i32
    %c0_i32_1 = arith.constant 0 : i32
    %c0_i32_2 = arith.constant 0 : i32
    %c0_i32_3 = arith.constant 0 : i32
    return %arg1, %c0_i32_0, %1, %c0_i32_1, %c0_i32_2 : i32, i32, i32, i32, i32
  }
  func.func @transform_1(%arg0: i32, %arg1: i32) -> (i32, i32, i32, i32, i32) {
    %c0_i32 = arith.constant 0 : i32
    %c0_i32_0 = arith.constant 0 : i32
    %c0_i32_1 = arith.constant 0 : i32
    %c0_i32_2 = arith.constant 0 : i32
    return %arg1, %c0_i32, %arg0, %c0_i32_0, %c0_i32_1 : i32, i32, i32, i32, i32
  }
  func.func @transform_2(%arg0: i32, %arg1: i32) -> (i32, i32, i32, i32, i32) {
    %c1_i32 = arith.constant 1 : i32
    %0 = arith.addi %arg0, %c1_i32 : i32
    %c7_i32 = arith.constant 7 : i32
    %1 = arith.minsi %0, %c7_i32 : i32
    %c0_i32 = arith.constant 0 : i32
    %c0_i32_0 = arith.constant 0 : i32
    %c0_i32_1 = arith.constant 0 : i32
    %c0_i32_2 = arith.constant 0 : i32
    return %arg1, %c0_i32, %1, %c0_i32_0, %c0_i32_1 : i32, i32, i32, i32, i32
  }
  func.func @transform_3(%arg0: i32, %arg1: i32) -> (i32, i32, i32) {
    %c0_i32 = arith.constant 0 : i32
    %c0_i32_0 = arith.constant 0 : i32
    %c0_i32_1 = arith.constant 0 : i32
    %c0_i32_2 = arith.constant 0 : i32
    return %c0_i32, %c0_i32_0, %c0_i32_1 : i32, i32, i32
  }
  func.func @transform_4(%arg0: i32, %arg1: i32) -> (i32, i32) {
    %c0_i32 = arith.constant 0 : i32
    %c0_i32_0 = arith.constant 0 : i32
    %c0_i32_1 = arith.constant 0 : i32
    return %c0_i32, %c0_i32_0 : i32, i32
  }
  func.func @transform_5(%arg0: i32, %arg1: i32) -> (i32, i32, i32, i32, i32) {
    %c0_i32 = arith.constant 0 : i32
    %c0_i32_0 = arith.constant 0 : i32
    %c0_i32_1 = arith.constant 0 : i32
    %c0_i32_2 = arith.constant 0 : i32
    return %arg1, %c0_i32, %arg0, %c0_i32_0, %c0_i32_1 : i32, i32, i32, i32, i32
  }
}

</mosaic_0001>

<bundles_post_ra>
// kernel: tpu_custom_call.1
= control target key start
LH: loop header
LB: loop body
LE: loop exit
PB: predicated region body
PF: predicated region fallthrough
CT: control target
= control target key end

     0   :  { %s7286_s0 = inlined_call_operand.hbm [shape: f32[2,4,8,8,8], index: 0, kind: input, shape index: {}]   ;;  %s7287_s1 = inlined_call_operand.hbm [shape: f32[2,4,8,8,8], index: 1, kind: input, shape index: {}]   ;;  %s7288_s2 = inlined_call_operand.hbm [shape: f32[2,4,8,8,8], index: 2, kind: input, shape index: {}]   ;;  %s7289_s3 = inlined_call_operand.hbm [shape: f32[3,2,36], index: 3, kind: input, shape index: {}]   ;;  %s7290_s4 = inlined_call_operand.vmem [shape: f32[2,1], index: 4, kind: input, shape index: {}]   ;;  %s7291_s5 = inlined_call_operand.hbm [shape: f32[2,2,8,8,8], index: 5, kind: output, shape index: {}]  }
   0x1   :  { %7323 = sst [smem:[#allocation40_spill]] %s7286_s0 }
   0x2   :  { %7324 = sst [smem:[#allocation41_spill]] %s7287_s1 }
   0x3   :  { %7325 = sst [smem:[#allocation42_spill]] %s7288_s2 }
   0x4   :  { %7326 = sst [smem:[#allocation43_spill]] %s7289_s3 }
   0x5   :  { %7327 = sst [smem:[#allocation44_spill]] %s7290_s4 }
   0x6   :  { %7328 = sst [smem:[#allocation45_spill]] %s7291_s5 }
   0x7   :  { %10 = vsyncpa [#allocation4], 0 }
   0x8   :  { %12 = vsyncpa [#allocation4 + $0x1], 0 }
   0x9   :  { %13 = vsyncpa [#allocation7], 0 }
   0xa   :  { %15 = vsyncpa [#allocation7 + $0x1], 0 }
   0xb   :  { %16 = vsyncpa [#allocation10], 0 }
   0xc   :  { %17 = vsyncpa [#allocation5], 0 }
   0xd   :  { %19 = vsyncpa [#allocation5 + $0x1], 0  ;;  %s4717_s18 = smov 0   ;;  %s4719_s19 = smov 0  }
   0xe   :  { %s4721_s20 = smov 0   ;;  %s4723_s21 = smov 0  }
   0xf   :  { %s4725_s22 = smov 0   ;;  %s4727_s23 = smov 0  }
  0x10   :  { %s4729_s24 = smov 0   ;;  %s4731_s25 = smov 0  }
  0x11   :  { %s4733_s26 = smov 0   ;;  %s4735_s27 = smov 0  }
  0x12   :  { %s4737_s28 = smov 0   ;;  %s4739_s29 = smov 0  }
  0x13   :  { %s4741_s30 = smov 0   ;;  %s4743_s6 = smov 0  }
  0x14 LB: > { %7329 = sst [smem:[#allocation17_spill]] %s4604_s18  ;;  %s3698_s7 = sadd.s32 4294967294, %s4656_s6   ;;  %s4656_s6 = sphi %s4743_s6, %s25_s6   ;;  %s4652_s30 = sphi %s4741_s30, %s7424_s30   ;;  %s4648_s29 = sphi %s4739_s29, %s7423_s29   ;;  %s4644_s28 = sphi %s4737_s28, %s7422_s28   ;;  %s4640_s27 = sphi %s4735_s27, %s7421_s27   ;;  %s4636_s26 = sphi %s4733_s26, %s7420_s26   ;;  %s4632_s25 = sphi %s4731_s25, %s7431_s25   ;;  %s4628_s24 = sphi %s4729_s24, %s7430_s24   ;;  %s4624_s23 = sphi %s4727_s23, %s7418_s23   ;;  %s4620_s22 = sphi %s4725_s22, %s7429_s22   ;;  %s4616_s21 = sphi %s4723_s21, %s7428_s21   ;;  %s4612_s20 = sphi %s4721_s20, %s7427_s20   ;;  %s4608_s19 = sphi %s4719_s19, %s7426_s19   ;;  %s4604_s18 = sphi %s4717_s18, %s7425_s18  }
  0x15   : > { %7330 = sst [smem:[#allocation18_spill]] %s4616_s21  ;;  %s34_s8 = sadd.s32 1, %s4648_s29 }
  0x16   : > { %7331 = sst [smem:[#allocation19_spill]] %s4624_s23  ;;  %p35_p0 = scmp.ge.s32.totalorder %s34_s8, 2 }
  0x17   : > { %7332 = sst [smem:[#allocation20_spill]] %s4636_s26  ;;  %s4790_s9 = sadd.s32 1, %s4652_s30 }
  0x18   : > { %7333 = sst [smem:[#allocation21_spill]] %s4640_s27  ;;  %p60_p1 = scmp.eq.s32.totalorder %s4656_s6, 0 }
  0x19   : > { %7334 = sst [smem:[#allocation22_spill]] %s4644_s28  ;;  %s80_s10 = sadd.s32 1, %s4624_s23 }
  0x1a   : > { %7335 = sst [smem:[#allocation23_spill]] %s4648_s29  ;;  %s7433_s8 = smov (%p35_p0, %s34_s8), 0 }
  0x1b   : > { %7336 = sst [smem:[#allocation24_spill]] %s4652_s30  ;;  %s4800_s12 = ssub.s32 %s4648_s29, %s7433_s8 }
  0x1c   : > { %7337 = sst [smem:[#allocation25_spill]] %s7433_s8  ;;  %p87_p2 = scmp.ne.s32.totalorder %s4624_s23, %s4620_s22 }
  0x1d   : > { %s38_s11 = scalar_select %p35_p0, %s4790_s9, %s4652_s30 }
  0x1e   : > { %p93_p4 = scmp.ne.s32.totalorder %s4620_s22, %s4616_s21  ;;  %p4811_p5 = por %p87_p2, %p60_p1 }
  0x1f   : > { %p39_p3 = scmp.ge.s32.totalorder %s38_s11, 8  ;;  %p201_p6 = scmp.eq.s32.totalorder %s3698_s7, 15 }
  0x20   : > { %p7306_p8 = scmp.lt.s32.totalorder %s4656_s6, 16  ;;  %s4829_s17 = sshll.u32 %s4648_s29, 5 }
  0x21   : > { %s7435_s11 = smov (%p39_p3, %s38_s11), 0  ;;  %p4820_p7 = por %p201_p6, %p93_p4 }
  0x22   : > { %7339 = sst [smem:[#allocation26_spill]] %s7435_s11  ;;  %s76_s15 = ssub.s32 %s4652_s30, %s7435_s11 }
  0x23   : > { %s7340_s14 = scalar_select %p4820_p7, 1, 0 }
  0x24   : > { %s77_s16 = sor.u32 %s76_s15, %s4800_s12  ;;  %s264_s7 = sand.u32 1, %s4656_s6  }
  0x25   : > { %7341 = sst [smem:[#allocation27_spill]] %s7340_s14  ;;  %p78_p9 = scmp.eq.s32.totalorder %s77_s16, 0 }
  0x26   : > { %s266_s5 = sand.u32 1, %s4624_s23   ;;  %s272_s28 = sadd.s32 %s4652_s30, %s4829_s17 }
  0x27   : > { %s4832_s8 = scalar_select %p78_p9, %s4624_s23, %s80_s10  }
  0x28   : > { %s3708_s27 = sshll.u32 %s266_s5, 5  ;;  %s3710_s4 = sshll.u32 %s272_s28, 3 }
  0x29   : > { %7342 = sst [smem:[#allocation28_spill]] %s4832_s8  ;;  %s268_s2 = scalar_lea.vmem [#allocation6], %s3708_s27 }
  0x2a   : > { %s277_s14 = sshll.u32 %s268_s2, 4  ;;  %s7343_s1 = sld [smem:[#allocation41_spill]]  ;;  %s278_s14 = int_to_ptr.vmem [resolvable:$true] %s277_s14 }
  0x2b   : > { %p3751_p10 = pnand %p7306_p8, %p4811_p5  ;;  %s4845_s5 = scalar_lea.sflag [#allocation7], %s264_s7 }
  0x2c   : > { %s7296_s27 = smov 1024   ;;  %s7298_s28 = smov 128  }
  0x2d   : > { %s7300_s2 = smov 8   ;;  %s4852_s0 = sadd.s32 4294967295, %s4656_s6  }
  0x2e   : > { %p3701_p11 = scmp.ge.s32.totalorder %s4656_s6, 1  ;;  %p66_p12 = scmp.eq.s32.totalorder %s4852_s0, 0 }
  0x2f   : > { %p195_p13 = scmp.eq.s32.totalorder %s4852_s0, 15  ;;  %p208_p0 = scmp.lt.s32.totalorder %s4656_s6, 17 }
  0x30   : > { %s274_s15 = scalar_lea.hbm %s7343_s1, %s3710_s4  ;;  %p4863_p3 = por %p93_p4, %p66_p12 }
  0x31   : > { %s275_s10 = sshll.u32 %s274_s15, 4  ;;  %p4870_p5 = por %p195_p13, %p87_p2  ;;  %s276_s10 = int_to_ptr.hbm [resolvable:$true] %s275_s10 }
  0x32   : > { %3753 = dma.hbm_to_vmem [thread:$0]  (!%p3751_p10), %s276_s10, 512, %s278_s14, %s4845_s5, %s7296_s27, %s7298_s28, %s7300_s2  }
  0x33   : > { %s7345_s18 = scalar_select %p4870_p5, 1, 0 }
  0x34   : > { %p4874_p6 = pnand %p3701_p11, %p208_p0  ;;  %s7348_s3 = sld [smem:[#allocation43_spill]] }
  0x35   : > { %7346 = sst [smem:[#allocation29_spill]] %s7345_s18  ;;  %s4661_s15 = smov [#allocation9]  }
  0x36   : > { %p3743_p4 = pneg %p4874_p6  ;;  %s221_s10 = sshll.u32 %s4661_s15, 4  ;;  %s222_s10 = int_to_ptr.vmem [resolvable:$true] %s221_s10 }
  0x37   : > { %s4662_s27 = smov 32   ;;  %s4663_s28 = smov 2  }
  0x38   : > { %p3744_p2 = pnand %p3743_p4, %p66_p12  ;;  %s3699_s14 = sadd.s32 4294967295, %s4652_s30 }
  0x39   : > { %p42_p9 = scmp.gt.s32.totalorder %s3699_s14, 0  ;;  %s3700_s16 = sadd.s32 4294967295, %s7435_s11 }
  0x3a   : > { %s219_s7 = sshll.u32 %s7348_s3, 4  ;;  %p45_p10 = scmp.gt.s32.totalorder %s3700_s16, 0  ;;  %s220_s7 = int_to_ptr.hbm [resolvable:$true] %s219_s7 }
  0x3b   : > { %3746 = dma.hbm_to_vmem [thread:$0]  (!%p3744_p2), %s220_s7, 96, %s222_s10, [#allocation10], %s4662_s27, %s4662_s27, %s4663_s28  }
  0x3c   : > { %s52_s2 = sadd.s32 1, %s4636_s26  ;;  %s7437_s14 = smov (!%p42_p9, %s3699_s14), 0 }
  0x3d   : > { %s7439_s16 = smov (!%p45_p10, %s3700_s16), 0  ;;  %p59_p11 = scmp.ne.s32.totalorder %s4636_s26, %s4632_s25 }
  0x3e   : > { %p65_p13 = scmp.ne.s32.totalorder %s4632_s25, %s4628_s24  ;;  %s48_s15 = ssub.s32 %s7437_s14, %s7439_s16 }
  0x3f   : > { %s238_s1 = sand.u32 1, %s4636_s26   ;;  %s49_s3 = sor.u32 %s48_s15, %s4800_s12 }
  0x40   : > { %p61_p0 = por %p60_p1, %p59_p11  ;;  %p50_p4 = scmp.eq.s32.totalorder %s49_s3, 0 }
  0x41   : > { %p4898_p2 = por %p66_p12, %p65_p13  ;;  %s3704_s28 = sshll.u32 %s238_s1, 5 }
  0x42   : > { %s4903_s7 = scalar_select %p50_p4, %s4636_s26, %s52_s2  }
  0x43   : > { %s249_s24 = sadd.s32 %s4829_s17, %s7437_s14  ;;  %s242_s16 = scalar_lea.vmem [#allocation3], %s3704_s28 }
  0x44   : > { %7350 = sst [smem:[#allocation30_spill]] %s4903_s7  ;;  %s3707_s10 = sshll.u32 %s249_s24, 3 }
  0x45   : > { %s7351_s15 = sld [smem:[#allocation17_spill]]  ;;  %s254_s30 = sshll.u32 %s242_s16, 4  ;;  %s255_s30 = int_to_ptr.vmem [resolvable:$true] %s254_s30 }
  0x46   : > { %s7352_s8 = sld [smem:[#allocation40_spill]]  ;;  %p3748_p9 = pnand %p7306_p8, %p61_p0 }
  0x47   : > { %s239_s2 = scalar_lea.sflag [#allocation4], %s238_s1  ;;  %s7353_s14 = smov 8  }
  0x48   : > { %s7354_s24 = smov 128   ;;  %s7355_s28 = smov 1024  }
  0x49   : > { %p104_p10 = scmp.lt.s32.totalorder %s4790_s9, 7  ;;  %s106_s16 = sadd.s32 1, %s7435_s11 }
  0x4a   : > { %p107_p11 = scmp.lt.s32.totalorder %s106_s16, 7  ;;  %s114_s29 = sadd.s32 1, %s4612_s20 }
  0x4b   : > { %s7441_s9 = smov (!%p104_p10, %s4790_s9), 7  ;;  %p121_p13 = scmp.ne.s32.totalorder %s4612_s20, %s4608_s19 }
  0x4c   : > { %s251_s23 = scalar_lea.hbm %s7352_s8, %s3707_s10  ;;  %s7443_s16 = smov (!%p107_p11, %s106_s16), 7 }
  0x4d   : > { %s252_s21 = sshll.u32 %s251_s23, 4  ;;  %p127_p4 = scmp.ne.s32.totalorder %s4608_s19, %s7351_s15  ;;  %s253_s21 = int_to_ptr.hbm [resolvable:$true] %s252_s21 }
  0x4e   : > { %3750 = dma.hbm_to_vmem [thread:$0]  (!%p3748_p9), %s253_s21, 512, %s255_s30, %s239_s2, %s7355_s28, %s7354_s24, %s7353_s14  }
  0x4f   : > { %s110_s23 = ssub.s32 %s7441_s9, %s7443_s16  ;;  %s289_s8 = sand.u32 1, %s4612_s20  }
  0x50   : > { %s111_s10 = sor.u32 %s110_s23, %s4800_s12  ;;  %p4926_p0 = por %p121_p13, %p60_p1 }
  0x51   : > { %p112_p9 = scmp.eq.s32.totalorder %s111_s10, 0  ;;  %p4932_p8 = por %p127_p4, %p66_p12 }
  0x52   : > { %s3711_s30 = sshll.u32 %s289_s8, 5  ;;  %s298_s3 = sadd.s32 %s4829_s17, %s7441_s9 }
  0x53   : > { %s4938_s15 = scalar_select %p112_p9, %s4612_s20, %s114_s29  }
  0x54   : > { %s3713_s2 = sshll.u32 %s298_s3, 3  ;;  %s7358_s12 = sld [smem:[#allocation42_spill]] }
  0x55   : > { %s291_s7 = scalar_lea.vmem [#allocation8], %s3711_s30  ;;  %p7359_p1 = scmp.lt.s32.totalorder %s4656_s6, 16 }
  0x56   : > { %s303_s26 = sshll.u32 %s291_s7, 4  ;;  %s304_s26 = int_to_ptr.vmem [resolvable:$true] %s303_s26 }
  0x57   : > { %p3754_p10 = pnand %p7359_p1, %p4926_p0 }
  0x58   : > { %315 = sbr.rel (%p4874_p6) target bundleno = 1606 (0x646), region = 40 }
  0x5a   : > { %s300_s23 = scalar_lea.hbm %s7358_s12, %s3713_s2 }
  0x5b   : > { %s301_s18 = sshll.u32 %s300_s23, 4  ;;  %s302_s18 = int_to_ptr.hbm [resolvable:$true] %s301_s18 }
  0x5c   : > { %3756 = dma.hbm_to_vmem [thread:$0]  (!%p3754_p10), %s302_s18, 512, %s304_s26, %s4845_s5, %s7355_s28, %s7354_s24, %s7353_s14  }
  0x5d   : > { %s317_s9 = sand.u32 1, %s4632_s25  }
  0x5e   : > { %s3715_s11 = sshll.u32 %s317_s9, 5  ;;  %s318_s17 = scalar_lea.sflag [#allocation4], %s317_s9 }
  0x5f   : > { %s4954_s29 = scalar_lea.vmem [#allocation3], %s3715_s11 }
  0x60   : > { %4583 = dma.done.wait (%p4898_p2), %s318_s17, 512  }
  0x61   : > { %4585 = vsyncadd (%p4898_p2), %s318_s17, 4294966784  ;;  %s327_s7 = sand.u32 1, %s4852_s0   ;;  %s4962_s26 = sand.u32 1, %s4620_s22  }
  0x62   : > { %s3716_s5 = sshll.u32 %s4962_s26, 5  ;;  %s328_s18 = scalar_lea.sflag [#allocation7], %s327_s7 }
  0x63   : > { %s4965_s13 = scalar_lea.vmem [#allocation6], %s3716_s5 }
  0x64   : > { %4587 = dma.done.wait (%p4863_p3), %s328_s18, 512  }
  0x65   : > { %4589 = vsyncadd (%p4863_p3), %s328_s18, 4294966784  ;;  %s339_s27 = sand.u32 1, %s4608_s19  }
  0x66   : > { %s3717_s14 = sshll.u32 %s339_s27, 5 }
  0x67   : > { %s4972_s24 = scalar_lea.vmem [#allocation8], %s3717_s14 }
  0x68   : > { %4591 = dma.done.wait (%p4932_p8), %s328_s18, 512  }
  0x69   : > { %4593 = vsyncadd (%p4932_p8), %s328_s18, 4294966784 }
  0x6a   : > { %4595 = dma.done.wait (%p66_p12), [#allocation10], 96  }
  0x6b   : > { %4597 = vsyncadd (%p66_p12), [#allocation10], 4294967200  ;;  %vm390_vm0 = vcmask 80896   ;;  %vm392_vm1 = vcmask 74752   ;;  %v4664_v0 = vmov 0.0   ;;  %v418_v1 = vld [vmem:[%s4954_s29 + $0x10] sm:$0xff] }
  0x6c   : > { %400 = vst.msk [vmem:[#allocation2 + $0x40] sm:$0xff] %vm390_vm0, %v4664_v0  ;;  %v416_v2 = vld [vmem:[%s4954_s29] sm:$0xff]  ;;  %s4665_s0 = smov 1   ;;  %v419_v4 = vld [vmem:[%s4954_s29 + $0x18] sm:$0xff]  ;;  %v417_v5 = vld [vmem:[%s4954_s29 + $0x8] sm:$0xff]  ;;  %vm436_vm2 = vcmask 72712  }
  0x6d   : > { %401 = vst.msk [vmem:[#allocation2 + $0x48] sm:$0x3] %vm392_vm1, %v4664_v0  ;;  %v441_v3 = vld [vmem:[%s4965_s13] sm:$0xff]  ;;  %428 = vrot.lane.b32.xlu1 %v418_v1, %s4665_s0  ;;  %424 = vrot.lane.b32.xlu0 %v416_v2, %s4665_s0  ;;  %v442_v6 = vld [vmem:[%s4965_s13 + $0x8] sm:$0xff]  ;;  %s7360_s8 = sld [smem:[#allocation44_spill]]  ;;  %v4666_v15 = vmov 0  }
  0x6e   : > { %391 = vst.msk [vmem:[#allocation2] sm:$0xff] %vm390_vm0, %v4664_v0  ;;  %449 = vrot.lane.b32.xlu2 %v441_v3, %s4665_s0  ;;  %v444_v7 = vld [vmem:[%s4965_s13 + $0x18] sm:$0xff]  ;;  %v443_v8 = vld [vmem:[%s4965_s13 + $0x10] sm:$0xff]  ;;  %v466_v9 = vld [vmem:[%s4972_s24] sm:$0xff]  ;;  %3906 = vset.pattern.permute.xlu0 %v4666_v15  ;;  %s4667_s10 = smov 127   ;;  %s4668_s1 = smov 126  }
  0x6f   : > { %393 = vst.msk [vmem:[#allocation2 + $0x8] sm:$0x3] %vm392_vm1, %v4664_v0  ;;  %v469_v10 = vld [vmem:[%s4972_s24 + $0x18] sm:$0xff]  ;;  %v468_v11 = vld [vmem:[%s4972_s24 + $0x10] sm:$0xff]  ;;  %v467_v12 = vld [vmem:[%s4972_s24 + $0x8] sm:$0xff]  ;;  %vm1133_vm3 = vcmask 1045504  }
  0x70   : > { %394 = vst.msk [vmem:[#allocation2 + $0x10] sm:$0xff] %vm390_vm0, %v4664_v0  ;;  %v4669_v24 = vmov 1983009808   ;;  %vm819_vm4 = vcmask 1046528   ;;  %vm507_vm5 = vcmask 1047556   ;;  %s4671_s21 = smov 16  }
  0x71   : > { %395 = vst.msk [vmem:[#allocation2 + $0x18] sm:$0x3] %vm392_vm1, %v4664_v0  ;;  %v512_v25 = vunpack.c.l.s4 %v4669_v24  ;;  %s4672_s30 = smov 32   ;;  %s4673_s3 = smov 56   ;;  %vm591_vm6 = vcmask 64512   ;;  %vm593_vm7 = vcmask 130048  }
  0x72   : > { %396 = vst.msk [vmem:[#allocation2 + $0x20] sm:$0xff] %vm390_vm0, %v4664_v0  ;;  %s4674_s2 = smov 48   ;;  %s4675_s16 = smov 8   ;;  %vm595_vm8 = vcmask 195584   ;;  %vm597_vm9 = vcmask 261120   ;;  %vm599_vm10 = vcmask 326656  }
  0x73   : > { %397 = vst.msk [vmem:[#allocation2 + $0x28] sm:$0x3] %vm392_vm1, %v4664_v0  ;;  %v491_v14 = vld [vmem:[%s7360_s8] sm:$0x3]  ;;  %v5052_v42 = vunpack.c.0.s8 %v512_v25  ;;  %s4676_s12 = smov 24   ;;  %s4677_s23 = smov 40  }
  0x74   : > { %398 = vst.msk [vmem:[#allocation2 + $0x30] sm:$0xff] %vm390_vm0, %v4664_v0  ;;  %vm601_vm11 = vcmask 392192   ;;  %vm603_vm12 = vcmask 457728   ;;  %vm1459_vm13 = vcmask 1043456   ;;  %vm1465_vm14 = vcmask 293888   ;;  %s7404_s9 = sld [smem:[#allocation22_spill]] }
  0x75   : > { %399 = vst.msk [vmem:[#allocation2 + $0x38] sm:$0x3] %vm392_vm1, %v4664_v0  ;;  %430 = vrot.lane.b32.xlu1 %v419_v4, %s4665_s0  ;;  %426 = vrot.lane.b32.xlu0 %v417_v5, %s4665_s0  ;;  %s4678_s29 = smov 120   ;;  %s4679_s7 = smov 72  }
  0x76   : > { %402 = vst.msk [vmem:[#allocation2 + $0x50] sm:$0xff] %vm390_vm0, %v4664_v0  ;;  %451 = vrot.lane.b32.xlu2 %v442_v6, %s4665_s0  ;;  %v4670_v6 = vmov 1934713408   ;;  %s4680_s5 = smov 104   ;;  %s4681_s18 = smov 80  }
  0x77   : > { %403 = vst.msk [vmem:[#allocation2 + $0x58] sm:$0x3] %vm392_vm1, %v4664_v0  ;;  %s7410_s13 = sld [smem:[#allocation21_spill]]  ;;  %s4682_s27 = smov 88  }
  0x78   : > { %404 = vst.msk [vmem:[#allocation2 + $0x60] sm:$0xff] %vm390_vm0, %v4664_v0  ;;  %s4683_s14 = smov 112   ;;  %s4684_s24 = smov 96  }
  0x79   : > { %405 = vst.msk [vmem:[#allocation2 + $0x68] sm:$0x3] %vm392_vm1, %v4664_v0  ;;  %s3719_s28 = sshll.u32 %s4962_s26, 4 }
  0x7a   : > { %406 = vst.msk [vmem:[#allocation2 + $0x70] sm:$0xff] %vm390_vm0, %v4664_v0  ;;  %p1492_p8 = scmp.gt.s32.totalorder %s7404_s9, 0  ;;  %p3465_p12 = scmp.lt.s32.totalorder %s7404_s9, 7 }
  0x7b   : > { %407 = vst.msk [vmem:[#allocation2 + $0x78] sm:$0x3] %vm392_vm1, %v4664_v0 }
  0x7c   : > { %408 = vst.msk [vmem:[#allocation2 + $0x80] sm:$0xff] %vm390_vm0, %v4664_v0  ;;  %s1493_s11 = scalar_select %p1492_p8, 1, 0 }
  0x7d   : > { %409 = vst.msk [vmem:[#allocation2 + $0x88] sm:$0x3] %vm392_vm1, %v4664_v0  ;;  %455 = vrot.lane.b32.xlu1 %v444_v7, %s4665_s0  ;;  %453 = vrot.lane.b32.xlu0 %v443_v8, %s4665_s0  ;;  %v536_v7 = vunpack.c.l.s4 %v4670_v6  ;;  %s3466_s17 = scalar_select %p3465_p12, 1, 0 }
  0x7e   : > { %410 = vst.msk [vmem:[#allocation2 + $0x90] sm:$0xff] %vm390_vm0, %v4664_v0  ;;  %474 = vrot.lane.b32.xlu2 %v466_v9, %s4665_s0 }
  0x7f   : > { %411 = vst.msk [vmem:[#allocation2 + $0x98] sm:$0x3] %vm392_vm1, %v4664_v0  ;;  %v5114_v25 = vunpack.c.0.s8 %v536_v7 }
  0x80   : > { %412 = vst.msk [vmem:[#allocation2 + $0xa0] sm:$0xff] %vm390_vm0, %v4664_v0 }
  0x81   : > { %413 = vst.msk [vmem:[#allocation2 + $0xa8] sm:$0x3] %vm392_vm1, %v4664_v0 }
  0x82   : > { %414 = vst.msk [vmem:[#allocation2 + $0xb0] sm:$0xff] %vm390_vm0, %v4664_v0 }
  0x83   : > { %415 = vst.msk [vmem:[#allocation2 + $0xb8] sm:$0x3] %vm392_vm1, %v4664_v0 }
  0x85   : > { %478 = vrot.lane.b32.xlu1 %v468_v11, %s4665_s0  ;;  %476 = vrot.lane.b32.xlu0 %v467_v12, %s4665_s0 }
  0x86   : > { %480 = vrot.lane.b32.xlu2 %v469_v10, %s4665_s0  ;;  %s3727_s0 = sshll.u32 %s7410_s13, 4 }
  0x87   : > { %s3546_s4 = sadd.s32 %s7404_s9, %s3727_s0 }
  0x88   : > { %s3728_s8 = sshll.u32 %s3546_s4, 3 }
  0x8d   : > { %494 = vperm.xlu0 %3906, %v491_v14  }
  0xc8   : > { %v450_v13 = vpop.permute.xlu2 %449 }
  0xc9   : > { %462 = vst.msk [vmem:[#allocation2 + $0x41] sm:$0xff] %vm436_vm2, %v450_v13 }
  0xd0   : > { %v452_v16 = vpop.permute.xlu2 %451  ;;  %v5035_v17 = vld [vmem:[#allocation2 + $0x40] sm:$0xff]  ;;  %v5045_v22 = vld [vmem:[#allocation2 + $0x48] sm:$0x3] }
  0xd1   : > { %463 = vst.msk [vmem:[#allocation2 + $0x51] sm:$0xff] %vm436_vm2, %v452_v16  ;;  %v1811_v26 = vrot.slane %v5035_v17, 1  ;;  %v1812_v31 = vrot.slane %v5045_v22, 1 }
  0xd3   : > { %v5061_v47 = vsel %vm819_vm4, %v1811_v26, %v1812_v31 }
  0xd8   : > { %v5037_v18 = vld [vmem:[#allocation2 + $0x50] sm:$0xff]  ;;  %v1501_v23 = vld [vmem:[#allocation2 + $0x58] sm:$0x3] }
  0xd9   : > { %v3927_v19 = vpack.i.bf16 %v5037_v18, %v5035_v17  ;;  %v1814_v32 = vrot.slane %v5037_v18, 1  ;;  %v1815_v33 = vrot.slane %v1501_v23, 1 }
  0xdb   : > { %3928 = vrot.lane.b32.xlu2 %v3927_v19, %s4667_s10  ;;  %v5064_v48 = vsel %vm819_vm4, %v1814_v32, %v1815_v33 }
  0xdc   : > { %v5088_v60 = vpack.i.bf16 %v5064_v48, %v5061_v47 }
  0xdf   : > { %v429_v20 = vpop.permute.xlu1 %428  ;;  %v425_v21 = vpop.permute.xlu0 %424 }
  0xe0   : > { %439 = vst.msk [vmem:[#allocation2 + $0x21] sm:$0xff] %vm436_vm2, %v429_v20 }
  0xe1   : > { %437 = vst.msk [vmem:[#allocation2 + $0x1] sm:$0xff] %vm436_vm2, %v425_v21 }
  0xe3   : > { %3938 = vrot.lane.b32.xlu2 %v3927_v19, %s4668_s1 }
  0xe7   : > { %v431_v27 = vpop.permute.xlu1 %430  ;;  %v427_v28 = vpop.permute.xlu0 %426  ;;  %v502_v29 = vld [vmem:[#allocation2 + $0x20] sm:$0xff]  ;;  %v503_v30 = vld [vmem:[#allocation2 + $0x28] sm:$0x3] }
  0xe8   : > { %440 = vst.msk [vmem:[#allocation2 + $0x31] sm:$0xff] %vm436_vm2, %v431_v27  ;;  %v827_v34 = vrot.slane %v503_v30, 1  ;;  %v1140_v35 = vrot.slane %v502_v29, 2  ;;  %v1141_v36 = vrot.slane %v503_v30, 2  ;;  %v498_v37 = vld [vmem:[#allocation2] sm:$0xff]  ;;  %v506_v38 = vrot.slane %v502_v29, 4 }
  0xe9   : > { %438 = vst.msk [vmem:[#allocation2 + $0x11] sm:$0xff] %vm436_vm2, %v427_v28  ;;  %v499_v39 = vld [vmem:[#allocation2 + $0x8] sm:$0x3]  ;;  %v1134_v40 = vrot.slane %v498_v37, 2  ;;  %v826_v41 = vrot.slane %v502_v29, 1  ;;  %v820_v45 = vrot.slane %v498_v37, 1 }
  0xea   : > { %v5055_v43 = vsel %vm1133_vm3, %v1140_v35, %v1141_v36  ;;  %v1135_v44 = vrot.slane %v499_v39, 2  ;;  %v508_v51 = vsel %vm507_vm5, %v506_v38, %v498_v37  ;;  %v821_v53 = vrot.slane %v499_v39, 1 }
  0xeb   : > { %1348 = vrot.lane.b32.xlu2 %v5055_v43, %s4668_s1  ;;  %v1150_v46 = vrot.slane %v5055_v43, 4  ;;  %v5067_v49 = vsel %vm819_vm4, %v826_v41, %v827_v34  ;;  %v509_v56 = vrot.slane %v498_v37, 4  ;;  %v5091_v63 = vperm.slane %v508_v51, %v5052_v42 }
  0xec   : > { %v5070_v50 = vsel %vm1133_vm3, %v1134_v40, %v1135_v44  ;;  %v836_v52 = vrot.slane %v5067_v49, 4  ;;  %v5080_v57 = vsel %vm819_vm4, %v820_v45, %v821_v53  ;;  %v1829_v38 = vrot.slane %v5061_v47, 4 }
  0xed   : > { %v5076_v54 = vsel %vm507_vm5, %v1150_v46, %v5070_v50  ;;  %v1152_v55 = vrot.slane %v5070_v50, 4  ;;  %v510_v11 = vsel %vm507_vm5, %v502_v29, %v509_v56  ;;  %v533_v15 = vrot.slane %v5091_v63, 4 }
  0xee   : > { %v5095_v1 = vsel %vm507_vm5, %v836_v52, %v5080_v57  ;;  %v518_v30 = vperm.slane %v510_v11, %v5052_v42  ;;  %v1841_v44 = vrot.slane %v5064_v48, 4  ;;  %v838_v56 = vrot.slane %v5080_v57, 4 }
  0xef   : > { %v5084_v58 = vsel %vm507_vm5, %v5055_v43, %v1152_v55  ;;  %v504_v59 = vld [vmem:[#allocation2 + $0x30] sm:$0xff]  ;;  %v456_v61 = vpop.permute.xlu1 %455  ;;  %v454_v62 = vpop.permute.xlu0 %453  ;;  %v505_v0 = vld [vmem:[#allocation2 + $0x38] sm:$0x3] }
  0xf0   : > { %v3912_v2 = vpack.i.bf16 %v504_v59, %v502_v29  ;;  %v500_v3 = vld [vmem:[#allocation2 + $0x10] sm:$0xff]  ;;  %465 = vst.msk [vmem:[#allocation2 + $0x71] sm:$0xff] %vm436_vm2, %v456_v61  ;;  %v519_v4 = vrot.slane %v504_v59, 4  ;;  %v829_v8 = vrot.slane %v504_v59, 1  ;;  %v830_v9 = vrot.slane %v505_v0, 1 }
  0xf1   : > { %v3907_v5 = vpack.i.bf16 %v500_v3, %v498_v37  ;;  %464 = vst.msk [vmem:[#allocation2 + $0x61] sm:$0xff] %vm436_vm2, %v454_v62  ;;  %v521_v12 = vrot.slane %v500_v3, 4  ;;  %v501_v13 = vld [vmem:[#allocation2 + $0x18] sm:$0x3]  ;;  %v823_v19 = vrot.slane %v500_v3, 1  ;;  %v1143_v23 = vrot.slane %v504_v59, 2 }
  0xf2   : > { %3913 = vrot.lane.b32.xlu1 %v3912_v2, %s4667_s10  ;;  %v520_v10 = vsel %vm507_vm5, %v519_v4, %v500_v3  ;;  %v5110_v16 = vsel %vm819_vm4, %v829_v8, %v830_v9  ;;  %v1144_v24 = vrot.slane %v505_v0, 2  ;;  %v824_v26 = vrot.slane %v501_v13, 1 }
  0xf3   : > { %3908 = vrot.lane.b32.xlu0 %v3907_v5, %s4667_s10  ;;  %3978 = vrot.lane.b32.xlu2 %v5088_v60, %s4667_s10  ;;  %v5106_v14 = vperm.slane %v520_v10, %v5052_v42  ;;  %v848_v20 = vrot.slane %v5110_v16, 4  ;;  %v522_v21 = vsel %vm507_vm5, %v504_v59, %v521_v12  ;;  %v1137_v29 = vrot.slane %v500_v3, 2 }
  0xf4   : > { %v530_v28 = vperm.slane %v522_v21, %v5052_v42  ;;  %v5121_v31 = vsel %vm819_vm4, %v823_v19, %v824_v26  ;;  %v1138_v32 = vrot.slane %v501_v13, 2  ;;  %v5124_v33 = vsel %vm1133_vm3, %v1143_v23, %v1144_v24 }
  0xf5   : > { %v534_v27 = vsel %vm507_vm5, %v5106_v14, %v533_v15  ;;  %v849_v34 = vsel %vm507_vm5, %v848_v20, %v5121_v31  ;;  %v545_v45 = vrot.slane %v518_v30, 4  ;;  %v1162_v46 = vrot.slane %v5124_v33, 4 }
  0xf6   : > { %v5129_v35 = vperm.slane %v534_v27, %v5114_v25  ;;  %v543_v39 = vrot.slane %v530_v28, 4  ;;  %v5138_v40 = vsel %vm1133_vm3, %v1137_v29, %v1138_v32  ;;  %v3952_v11 = vpack.i.bf16 %v5110_v16, %v5067_v49 }
  0xf7   : > { %v5133_v37 = vld [vmem:[#allocation2 + $0x70] sm:$0xff]  ;;  %v1164_v51 = vrot.slane %v5138_v40, 4  ;;  %v1505_v52 = vld [vmem:[#allocation2 + $0x78] sm:$0x3]  ;;  %v1163_v61 = vsel %vm507_vm5, %v1162_v46, %v5138_v40  ;;  %v546_v4 = vsel %vm507_vm5, %v530_v28, %v545_v45  ;;  %v850_v12 = vrot.slane %v5121_v31, 4 }
  0xf8   : > { %v5131_v36 = vld [vmem:[#allocation2 + $0x60] sm:$0xff]  ;;  %v1503_v41 = vld [vmem:[#allocation2 + $0x68] sm:$0x3]  ;;  %v2133_v53 = vrot.slane %v5133_v37, 2  ;;  %v544_v3 = vsel %vm507_vm5, %v543_v39, %v518_v30  ;;  %v1821_v6 = vrot.slane %v1505_v52, 1  ;;  %v2134_v10 = vrot.slane %v1505_v52, 2 }
  0xf9   : > { %v2130_v55 = vrot.slane %v5131_v36, 2  ;;  %v1817_v59 = vrot.slane %v5131_v36, 1  ;;  %v5154_v62 = vsel %vm507_vm5, %v5124_v33, %v1164_v51  ;;  %v1818_v0 = vrot.slane %v1503_v41, 1 }
  0xfa   : > { %3923 = vrot.lane.b32.xlu1 %v3912_v2, %s4668_s1  ;;  %v1820_v2 = vrot.slane %v5133_v37, 1  ;;  %v3932_v7 = vpack.i.bf16 %v5133_v37, %v5131_v36  ;;  %v2131_v9 = vrot.slane %v1503_v41, 2  ;;  %v5175_v15 = vperm.slane %v544_v3, %v5114_v25 }
  0xfb   : > { %3918 = vrot.lane.b32.xlu0 %v3907_v5, %s4668_s1  ;;  %568 = vrot.lane.b32.xlu2 %v5129_v35, %s4671_s21  ;;  %v843_v5 = vperm.slane %v5095_v1, %v5052_v42  ;;  %v5164_v8 = vsel %vm819_vm4, %v1817_v59, %v1818_v0  ;;  %v5178_v19 = vperm.slane %v546_v4, %v5114_v25 }
  0xfc   : > { %v5170_v13 = vsel %vm819_vm4, %v1820_v2, %v1821_v6  ;;  %v1830_v1 = vsel %vm507_vm5, %v5164_v8, %v1829_v38  ;;  %v5181_v20 = vsel %vm1133_vm3, %v2130_v55, %v2131_v9  ;;  %v5184_v21 = vsel %vm1133_vm3, %v2133_v53, %v2134_v10  ;;  %v475_v38 = vpop.permute.xlu2 %474 }
  0xfd   : > { %7361 = vst [vmem:[#allocation31_spill] sm:$0xff] %v5181_v20  ;;  %v1839_v23 = vrot.slane %v5170_v13, 4  ;;  %v1827_v24 = vrot.slane %v5164_v8, 4  ;;  %v1838_v26 = vperm.slane %v1830_v1, %v5052_v42  ;;  %v1842_v27 = vsel %vm507_vm5, %v5170_v13, %v1841_v44 }
  0xfe   : > { %7362 = vst [vmem:[#allocation32_spill] sm:$0xff] %v5184_v21  ;;  %v855_v28 = vperm.slane %v849_v34, %v5052_v42  ;;  %v862_v29 = vrot.slane %v843_v5, 4  ;;  %v839_v30 = vsel %vm507_vm5, %v5067_v49, %v838_v56  ;;  %v5200_v32 = vperm.slane %v5076_v54, %v5052_v42 }
  0xff   : > { %v847_v39 = vperm.slane %v839_v30, %v5052_v42  ;;  %v851_v41 = vsel %vm507_vm5, %v5110_v16, %v850_v12  ;;  %v1850_v44 = vperm.slane %v1842_v27, %v5052_v42  ;;  %v561_v45 = vrot.slane %v5178_v19, 4  ;;  %487 = vst.msk [vmem:[#allocation2 + $0x81] sm:$0xff] %vm436_vm2, %v475_v38 }
 0x100   : > { %v5209_v34 = vsel %vm507_vm5, %v855_v28, %v862_v29  ;;  %v859_v49 = vperm.slane %v851_v41, %v5052_v42  ;;  %v1865_v46 = vrot.slane %v1838_v26, 4  ;;  %v860_v54 = vrot.slane %v855_v28, 4 }
 0x101   : > { %v874_v51 = vrot.slane %v847_v39, 4  ;;  %v1828_v52 = vsel %vm507_vm5, %v1827_v24, %v5061_v47  ;;  %v1840_v16 = vsel %vm507_vm5, %v1839_v23, %v5064_v48  ;;  %v1161_v53 = vperm.slane %v5084_v58, %v5052_v42 }
 0x102   : > { %3953 = vrot.lane.b32.xlu1 %v3952_v11, %s4667_s10  ;;  %v872_v55 = vrot.slane %v859_v49, 4  ;;  %v5219_v56 = vsel %vm507_vm5, %v1850_v44, %v1865_v46  ;;  %v1834_v59 = vperm.slane %v1828_v52, %v5052_v42  ;;  %v1863_v2 = vrot.slane %v1850_v44, 4 }
 0x103   : > { %3933 = vrot.lane.b32.xlu0 %v3932_v7, %s4667_s10  ;;  %576 = vrot.lane.b32.xlu2 %v5175_v15, %s4672_s30  ;;  %v5223_v0 = vsel %vm507_vm5, %v859_v49, %v874_v51  ;;  %v1169_v3 = vperm.slane %v1163_v61, %v5052_v42  ;;  %v1846_v48 = vperm.slane %v1840_v16, %v5052_v42  ;;  %v562_v58 = vsel %vm507_vm5, 0.0, %v561_v45 }
 0x104   : > { %v5227_v47 = vsel %vm507_vm5, %v872_v55, %v847_v39  ;;  %v1853_v4 = vrot.slane %v1834_v59, 4  ;;  %v5233_v6 = vsel %vm507_vm5, %v1863_v2, %v1838_v26  ;;  %v5236_v9 = vsel %vm507_vm5, %v860_v54, %v843_v5 }
 0x105   : > { %v1176_v10 = vrot.slane %v5200_v32, 4  ;;  %v1188_v12 = vrot.slane %v1161_v53, 4  ;;  %v1173_v1 = vperm.slane %v5154_v62, %v5052_v42  ;;  %v1851_v23 = vrot.slane %v1846_v48, 4 }
 0x106   : > { %v5241_v61 = vsel %vm507_vm5, %v1846_v48, %v1853_v4  ;;  %v1518_v24 = vrot.slane %v5133_v37, 4  ;;  %v3972_v62 = vpack.i.bf16 %v5124_v33, %v5055_v43  ;;  %v1508_v30 = vrot.slane %v5035_v17, 4 }
 0x107   : > { %v5248_v5 = vsel %vm507_vm5, %v1169_v3, %v1176_v10  ;;  %v5253_v26 = vsel %vm507_vm5, %v1173_v1, %v1188_v12  ;;  %v1520_v38 = vrot.slane %v5037_v18, 4  ;;  %v3947_v39 = vpack.i.bf16 %v5121_v31, %v5080_v57 }
 0x108   : > { %v1519_v28 = vsel %vm507_vm5, %v1518_v24, %v5037_v18  ;;  %v1174_v41 = vrot.slane %v1169_v3, 4  ;;  %v1186_v44 = vrot.slane %v1173_v1, 4  ;;  %v5267_v45 = vsel %vm507_vm5, %v1851_v23, %v1834_v59 }
 0x109   : > { %v1525_v49 = vperm.slane %v1519_v28, %v5052_v42  ;;  %v1509_v43 = vsel %vm507_vm5, %v5131_v36, %v1508_v30  ;;  %v1521_v54 = vsel %vm507_vm5, %v5133_v37, %v1520_v38  ;;  %v2124_v37 = vrot.slane %v5035_v17, 2 }
 0x10a   : > { %3963 = vrot.lane.b32.xlu1 %v3952_v11, %s4668_s1  ;;  %v481_v11 = vpop.permute.xlu2 %480  ;;  %v1517_v18 = vperm.slane %v1509_v43, %v5052_v42  ;;  %v1529_v57 = vperm.slane %v1521_v54, %v5052_v42  ;;  %v5279_v31 = vsel %vm507_vm5, %v1186_v44, %v1161_v53  ;;  %v2125_v59 = vrot.slane %v5045_v22, 2 }
 0x10b   : > { %3943 = vrot.lane.b32.xlu0 %v3932_v7, %s4668_s1  ;;  %588 = vrot.lane.b32.xlu2 %v562_v58, %s4673_s3  ;;  %490 = vst.msk [vmem:[#allocation2 + $0xb1] sm:$0xff] %vm436_vm2, %v481_v11  ;;  %v1506_v7 = vrot.slane %v5131_v36, 4  ;;  %v1530_v55 = vrot.slane %v1525_v49, 4  ;;  %v5286_v36 = vsel %vm507_vm5, %v1174_v41, %v5200_v32  ;;  %v5298_v3 = vpack.i.bf16 %v5170_v13, %v5164_v8 }
 0x10c   : > { %v1544_v52 = vrot.slane %v1517_v18, 4  ;;  %v1542_v16 = vrot.slane %v1529_v57, 4  ;;  %v531_v32 = vrot.slane %v5106_v14, 4  ;;  %v3967_v8 = vpack.i.bf16 %v5138_v40, %v5070_v50 }
 0x10d   : > { %v1507_v27 = vsel %vm507_vm5, %v1506_v7, %v5035_v17  ;;  %v5308_v17 = vsel %vm1133_vm3, %v2124_v37, %v2125_v59 }
 0x10e   : > { %v1513_v29 = vperm.slane %v1507_v27, %v5052_v42  ;;  %v5291_v2 = vsel %vm507_vm5, %v1529_v57, %v1544_v52  ;;  %v5294_v53 = vsel %vm507_vm5, %v1542_v16, %v1517_v18  ;;  %7363 = vst [vmem:[#allocation33_spill] sm:$0xff] %v5308_v17  ;;  %v532_v22 = vsel %vm507_vm5, %v531_v32, %v5091_v63 }
 0x10f   : > { %v5315_v13 = vperm.slane %v532_v22, %v5114_v25  ;;  %v557_v63 = vrot.slane %v5129_v35, 4 }
 0x110   : > { %v1532_v46 = vrot.slane %v1513_v29, 4  ;;  %v5304_v48 = vsel %vm507_vm5, %v1530_v55, %v1513_v29 }
 0x111   : > { %v555_v14 = vrot.slane %v5315_v13, 4  ;;  %v558_v58 = vsel %vm507_vm5, 0.0, %v557_v63 }
 0x112   : > { %3973 = vrot.lane.b32.xlu1 %v3972_v62, %s4667_s10  ;;  %v5282_v51 = vsel %vm507_vm5, %v1525_v49, %v1532_v46 }
 0x113   : > { %3948 = vrot.lane.b32.xlu0 %v3947_v39, %s4667_s10  ;;  %v556_v4 = vsel %vm507_vm5, 0.0, %v555_v14 }
 0x11a   : > { %1346 = vrot.lane.b32.xlu1 %v5138_v40, %s4668_s1  ;;  %v479_v40 = vpop.permute.xlu1 %478 }
 0x11b   : > { %3958 = vrot.lane.b32.xlu0 %v3947_v39, %s4668_s1  ;;  %489 = vst.msk [vmem:[#allocation2 + $0xa1] sm:$0xff] %vm436_vm2, %v479_v40 }
 0x122   : > { %584 = vrot.lane.b32.xlu1 %v5178_v19, %s4674_s2  ;;  %v477_v19 = vpop.permute.xlu0 %476 }
 0x123   : > { %3968 = vrot.lane.b32.xlu0 %v3967_v8, %s4667_s10  ;;  %488 = vst.msk [vmem:[#allocation2 + $0x91] sm:$0xff] %vm436_vm2, %v477_v19 }
 0x12a   : > { %564 = vrot.lane.b32.xlu1 %v556_v4, %s4675_s16  ;;  %v5337_v10 = vpop.permute.xlu0 %494 }
 0x12b   : > { %1344 = vrot.lane.b32.xlu0 %v5070_v50, %s4668_s1  ;;  %v559_v50 = vrot.slane %v5175_v15, 4  ;;  %7364 = vst [vmem:[#allocation34_spill] sm:$0xff] %v5337_v10 }
 0x12d   : > { %v560_v35 = vsel %vm507_vm5, 0.0, %v559_v50 }
 0x132   : > { %572 = vrot.lane.b32.xlu1 %v558_v58, %s4676_s12 }
 0x133   : > { %1350 = vrot.lane.b32.xlu0 %v5124_v33, %s4668_s1 }
 0x135   : > { %v5348_v49 = vpop.permute.xlu2 %3928 }
 0x136   : > { %v3931_v37 = vunpack.i.h.bf16 %v5348_v49 }
 0x13b   : > { %3983 = vrot.lane.b32.xlu0 %v5298_v3, %s4667_s10 }
 0x143   : > { %580 = vrot.lane.b32.xlu0 %v560_v35, %s4677_s23  ;;  %v3930_v35 = vunpack.i.l.bf16 %v5348_v49  ;;  %v3939_v49 = vpop.permute.xlu2 %3938 }
 0x164   : > { %v3914_v12 = vpop.permute.xlu1 %3913 }
 0x165   : > { %v3916_v11 = vunpack.i.h.bf16 %v3914_v12  ;;  %v3915_v1 = vunpack.i.l.bf16 %v3914_v12  ;;  %v3909_v23 = vpop.permute.xlu0 %3908 }
 0x166   : > { %v3911_v33 = vunpack.i.h.bf16 %v3909_v23  ;;  %v3910_v7 = vunpack.i.l.bf16 %v3909_v23 }
 0x167   : > { %v633_v24 = vrot.slane %v3916_v11, 4  ;;  %v621_v27 = vrot.slane %v3915_v1, 4 }
 0x168   : > { %v635_v28 = vrot.slane %v3911_v33, 4  ;;  %v623_v62 = vrot.slane %v3910_v7, 4 }
 0x169   : > { %v634_v29 = vsel %vm507_vm5, %v633_v24, %v3911_v33  ;;  %v622_v15 = vsel %vm507_vm5, %v621_v27, %v3910_v7 }
 0x16a   : > { %v636_v30 = vsel %vm507_vm5, %v3916_v11, %v635_v28  ;;  %v624_v38 = vsel %vm507_vm5, %v3915_v1, %v623_v62  ;;  %v5344_v39 = vperm.slane %v622_v15, %v5052_v42  ;;  %v5351_v46 = vperm.slane %v634_v29, %v5052_v42 }
 0x16b   : > { %v644_v41 = vperm.slane %v636_v30, %v5052_v42  ;;  %v632_v44 = vperm.slane %v624_v38, %v5052_v42  ;;  %v5390_v29 = vperm.slane %v5209_v34, %v5114_v25  ;;  %v1627_v15 = vrot.slane %v3931_v37, 4 }
 0x16c   : > { %v3924_v43 = vpop.permute.xlu1 %3923  ;;  %v647_v54 = vrot.slane %v5344_v39, 4  ;;  %v1615_v30 = vrot.slane %v3930_v35, 4 }
 0x16d   : > { %v3926_v18 = vunpack.i.h.bf16 %v3924_v43  ;;  %v3925_v57 = vunpack.i.l.bf16 %v3924_v43  ;;  %v3919_v52 = vpop.permute.xlu0 %3918  ;;  %v657_v16 = vrot.slane %v644_v41, 4  ;;  %v659_v55 = vrot.slane %v632_v44, 4 }
 0x16e   : > { %v3921_v59 = vunpack.i.h.bf16 %v3919_v52  ;;  %v3920_v32 = vunpack.i.l.bf16 %v3919_v52  ;;  %v648_v22 = vsel %vm507_vm5, %v5351_v46, %v647_v54  ;;  %v3941_v52 = vunpack.i.h.bf16 %v3939_v49 }
 0x16f   : > { %v736_v8 = vrot.slane %v3926_v18, 4  ;;  %v724_v14 = vrot.slane %v3925_v57, 4  ;;  %v5358_v4 = vperm.slane %v648_v22, %v5114_v25  ;;  %v658_v63 = vsel %vm507_vm5, %v657_v16, %v632_v44 }
 0x170   : > { %v738_v40 = vrot.slane %v3921_v59, 4  ;;  %v726_v58 = vrot.slane %v3920_v32, 4  ;;  %v5362_v19 = vperm.slane %v658_v63, %v5114_v25  ;;  %v660_v50 = vsel %vm507_vm5, %v644_v41, %v659_v55 }
 0x171   : > { %v737_v12 = vsel %vm507_vm5, %v736_v8, %v3921_v59  ;;  %v725_v11 = vsel %vm507_vm5, %v724_v14, %v3920_v32  ;;  %682 = vrot.lane.b32.xlu0 %v5358_v4, %s4671_s21  ;;  %v5371_v1 = vperm.slane %v660_v50, %v5114_v25  ;;  %v5394_v44 = vperm.slane %v5227_v47, %v5114_v25 }
 0x172   : > { %v739_v23 = vsel %vm507_vm5, %v3926_v18, %v738_v40  ;;  %v727_v33 = vsel %vm507_vm5, %v3925_v57, %v726_v58  ;;  %v5376_v7 = vperm.slane %v725_v11, %v5052_v42  ;;  %690 = vrot.lane.b32.xlu2 %v5362_v19, %s4672_s30  ;;  %v5385_v28 = vperm.slane %v737_v12, %v5052_v42 }
 0x173   : > { %v747_v24 = vperm.slane %v739_v23, %v5052_v42  ;;  %v735_v27 = vperm.slane %v727_v33, %v5052_v42  ;;  %698 = vrot.lane.b32.xlu1 %v5371_v1, %s4674_s2  ;;  %v3940_v16 = vunpack.i.l.bf16 %v3939_v49  ;;  %v5415_v12 = vperm.slane %v5223_v0, %v5114_v25 }
 0x174   : > { %v750_v62 = vrot.slane %v5376_v7, 4 }
 0x175   : > { %v3934_v38 = vpop.permute.xlu0 %3933  ;;  %v760_v41 = vrot.slane %v747_v24, 4  ;;  %v762_v57 = vrot.slane %v735_v27, 4 }
 0x176   : > { %v3936_v43 = vunpack.i.h.bf16 %v3934_v38  ;;  %v3935_v54 = vunpack.i.l.bf16 %v3934_v38  ;;  %v751_v18 = vsel %vm507_vm5, %v5385_v28, %v750_v62  ;;  %v1730_v62 = vrot.slane %v3941_v52, 4 }
 0x177   : > { %v5399_v34 = vperm.slane %v751_v18, %v5114_v25  ;;  %v761_v55 = vsel %vm507_vm5, %v760_v41, %v735_v27  ;;  %v763_v50 = vsel %vm507_vm5, %v747_v24, %v762_v57  ;;  %v1718_v24 = vrot.slane %v3940_v16, 4 }
 0x178   : > { %v1625_v59 = vrot.slane %v3936_v43, 4  ;;  %v1628_v32 = vsel %vm507_vm5, %v3936_v43, %v1627_v15  ;;  %v1613_v22 = vrot.slane %v3935_v54, 4  ;;  %v1616_v47 = vsel %vm507_vm5, %v3935_v54, %v1615_v30 }
 0x179   : > { %v1636_v8 = vperm.slane %v1628_v32, %v5052_v42  ;;  %v1624_v14 = vperm.slane %v1616_v47, %v5052_v42  ;;  %v3987_v63 = vpack.i.bf16 %v5390_v29, %v5399_v34  ;;  %v5409_v40 = vperm.slane %v761_v55, %v5114_v25 }
 0x17a   : > { %v1614_v58 = vsel %vm507_vm5, %v1613_v22, %v3930_v35  ;;  %v5424_v33 = vperm.slane %v763_v50, %v5114_v25  ;;  %v1626_v35 = vsel %vm507_vm5, %v1625_v59, %v3931_v37  ;;  %v5438_v59 = vpop.permute.xlu1 %3953 }
 0x17b   : > { %v5418_v11 = vperm.slane %v1614_v58, %v5052_v42  ;;  %3988 = vrot.lane.b32.xlu0 %v3987_v63, %s4671_s21  ;;  %v3992_v23 = vpack.i.bf16 %v5394_v44, %v5409_v40  ;;  %v1651_v27 = vrot.slane %v1624_v14, 4  ;;  %v1649_v30 = vrot.slane %v1636_v8, 4 }
 0x17c   : > { %v3997_v0 = vpack.i.bf16 %v5415_v12, %v5424_v33  ;;  %v5434_v54 = vperm.slane %v1626_v35, %v5052_v42 }
 0x17d   : > { %3993 = vrot.lane.b32.xlu2 %v3992_v23, %s4672_s30  ;;  %v3944_v15 = vpop.permute.xlu0 %3943  ;;  %v1652_v49 = vsel %vm507_vm5, %v1636_v8, %v1651_v27  ;;  %v1639_v43 = vrot.slane %v5418_v11, 4  ;;  %v1650_v58 = vsel %vm507_vm5, %v1649_v30, %v1624_v14 }
 0x17e   : > { %v3946_v38 = vunpack.i.h.bf16 %v3944_v15  ;;  %v3945_v41 = vunpack.i.l.bf16 %v3944_v15  ;;  %3998 = vrot.lane.b32.xlu1 %v3997_v0, %s4674_s2  ;;  %v5443_v47 = vperm.slane %v1652_v49, %v5114_v25 }
 0x17f   : > { %v1640_v8 = vsel %vm507_vm5, %v5434_v54, %v1639_v43 }
 0x180   : > { %v1728_v37 = vrot.slane %v3946_v38, 4  ;;  %v1731_v18 = vsel %vm507_vm5, %v3946_v38, %v1730_v62  ;;  %v1716_v57 = vrot.slane %v3945_v41, 4  ;;  %v1719_v55 = vsel %vm507_vm5, %v3945_v41, %v1718_v24 }
 0x181   : > { %v1739_v32 = vperm.slane %v1731_v18, %v5052_v42  ;;  %v1727_v22 = vperm.slane %v1719_v55, %v5052_v42  ;;  %v5455_v35 = vperm.slane %v1640_v8, %v5114_v25  ;;  %v645_v24 = vrot.slane %v5351_v46, 4 }
 0x182   : > { %v1717_v63 = vsel %vm507_vm5, %v1716_v57, %v3940_v16  ;;  %v1729_v62 = vsel %vm507_vm5, %v1728_v37, %v3941_v52  ;;  %v5462_v16 = vperm.slane %v1650_v58, %v5114_v25  ;;  %v5478_v46 = vperm.slane %v5219_v56, %v5114_v25  ;;  %v5497_v57 = vpop.permute.xlu1 %3963 }
 0x183   : > { %v1752_v50 = vrot.slane %v1739_v32, 4  ;;  %v5450_v23 = vperm.slane %v1717_v63, %v5052_v42  ;;  %v1754_v27 = vrot.slane %v1727_v22, 4  ;;  %1690 = vrot.lane.b32.xlu0 %v5443_v47, %s4674_s2  ;;  %v5472_v38 = vperm.slane %v1729_v62, %v5052_v42 }
 0x184   : > { %v646_v43 = vsel %vm507_vm5, %v645_v24, %v5344_v39  ;;  %v5492_v18 = vperm.slane %v5241_v61, %v5114_v25  ;;  %v5502_v55 = vperm.slane %v5233_v6, %v5114_v25  ;;  %v3955_v61 = vunpack.i.l.bf16 %v5438_v59 }
 0x185   : > { %1674 = vrot.lane.b32.xlu2 %v5455_v35, %s4671_s21  ;;  %v5464_v14 = vpop.permute.xlu0 %3948  ;;  %v1755_v0 = vsel %vm507_vm5, %v1739_v32, %v1754_v27  ;;  %v1742_v30 = vrot.slane %v5450_v23, 4  ;;  %v1753_v52 = vsel %vm507_vm5, %v1752_v50, %v1727_v22  ;;  %v5507_v32 = vperm.slane %v646_v43, %v5114_v25 }
 0x186   : > { %v5468_v15 = vperm.slane %v1755_v0, %v5114_v25  ;;  %1682 = vrot.lane.b32.xlu1 %v5462_v16, %s4672_s30  ;;  %v5495_v56 = vperm.slane %v1753_v52, %v5114_v25  ;;  %v673_v63 = vrot.slane %v5362_v19, 4  ;;  %v3950_v58 = vunpack.i.l.bf16 %v5464_v14 }
 0x187   : > { %v1743_v49 = vsel %vm507_vm5, %v5472_v38, %v1742_v30  ;;  %v669_v6 = vrot.slane %v5507_v32, 4  ;;  %v886_v50 = vrot.slane %v5390_v29, 4  ;;  %v3956_v27 = vunpack.i.h.bf16 %v5438_v59 }
 0x188   : > { %v4012_v41 = vpack.i.bf16 %v5478_v46, %v5468_v15  ;;  %v5488_v37 = vperm.slane %v1743_v49, %v5114_v25  ;;  %v4007_v22 = vpack.i.bf16 %v5502_v55, %v5495_v56  ;;  %v939_v62 = vrot.slane %v3955_v61, 4 }
 0x189   : > { %v3965_v24 = vunpack.i.l.bf16 %v5497_v57  ;;  %v671_v0 = vrot.slane %v5358_v4, 4  ;;  %v748_v30 = vrot.slane %v5385_v28, 4  ;;  %v674_v52 = vsel %vm507_vm5, 0.0, %v673_v63 }
 0x18a   : > { %v4002_v39 = vpack.i.bf16 %v5492_v18, %v5488_v37  ;;  %v776_v19 = vrot.slane %v5409_v40, 4  ;;  %v941_v49 = vrot.slane %v3950_v58, 4  ;;  %v3951_v29 = vunpack.i.h.bf16 %v5464_v14  ;;  %v5529_v10 = vpop.permute.xlu1 %3973 }
 0x18b   : > { %4013 = vrot.lane.b32.xlu0 %v4012_v41, %s4674_s2  ;;  %v940_v41 = vsel %vm507_vm5, %v939_v62, %v3950_v58  ;;  %v888_v59 = vrot.slane %v5394_v44, 4  ;;  %v1042_v4 = vrot.slane %v3965_v24, 4  ;;  %v670_v28 = vsel %vm507_vm5, 0.0, %v669_v6 }
 0x18c   : > { %v672_v40 = vsel %vm507_vm5, 0.0, %v671_v0  ;;  %v5534_v63 = vperm.slane %v940_v41, %v5052_v42  ;;  %v777_v58 = vsel %vm507_vm5, 0.0, %v776_v19  ;;  %v774_v14 = vrot.slane %v5399_v34, 4 }
 0x18d   : > { %4003 = vrot.lane.b32.xlu2 %v4002_v39, %s4671_s21  ;;  %v3959_v8 = vpop.permute.xlu0 %3958  ;;  %v887_v39 = vsel %vm507_vm5, 0.0, %v886_v50  ;;  %v749_v44 = vsel %vm507_vm5, %v748_v30, %v5376_v7  ;;  %v3966_v50 = vunpack.i.h.bf16 %v5497_v57  ;;  %v942_v62 = vsel %vm507_vm5, %v3955_v61, %v941_v49 }
 0x18e   : > { %4008 = vrot.lane.b32.xlu1 %v4007_v22, %s4672_s30  ;;  %v3960_v43 = vunpack.i.l.bf16 %v3959_v8  ;;  %v951_v22 = vrot.slane %v3956_v27, 4  ;;  %v3975_v0 = vunpack.i.l.bf16 %v5529_v10  ;;  %v953_v41 = vrot.slane %v3951_v29, 4 }
 0x18f   : > { %v889_v19 = vsel %vm507_vm5, 0.0, %v888_v59  ;;  %v675_v34 = vrot.slane %v5371_v1, 4  ;;  %v3961_v7 = vunpack.i.h.bf16 %v3959_v8  ;;  %v5550_v57 = vperm.slane %v749_v44, %v5114_v25 }
 0x190   : > { %v1043_v6 = vsel %vm507_vm5, %v1042_v4, %v3960_v43  ;;  %v952_v17 = vsel %vm507_vm5, %v951_v22, %v3951_v29  ;;  %v4027_v30 = vpack.i.bf16 %v889_v19, %v777_v58  ;;  %v5553_v61 = vperm.slane %v942_v62, %v5052_v42 }
 0x191   : > { %v5556_v49 = vperm.slane %v1043_v6, %v5052_v42  ;;  %v965_v4 = vrot.slane %v5534_v63, 4  ;;  %v1054_v59 = vrot.slane %v3966_v50, 4  ;;  %v5564_v8 = vperm.slane %v5236_v9, %v5114_v25 }
 0x192   : > { %v1253_v29 = vrot.slane %v3975_v0, 4  ;;  %v954_v22 = vsel %vm507_vm5, %v3956_v27, %v953_v41  ;;  %v5568_v58 = vperm.slane %v952_v17, %v5052_v42  ;;  %v1056_v62 = vrot.slane %v3961_v7, 4  ;;  %v5581_v41 = vpop.permute.xlu2 %1348 }
 0x193   : > { %694 = vrot.lane.b32.xlu0 %v674_v52, %s4677_s23  ;;  %v1044_v52 = vrot.slane %v3960_v43, 4  ;;  %v775_v43 = vsel %vm507_vm5, 0.0, %v774_v14  ;;  %v676_v14 = vsel %vm507_vm5, 0.0, %v675_v34  ;;  %v1055_v44 = vsel %vm507_vm5, %v1054_v59, %v3961_v7 }
 0x194   : > { %v4022_v6 = vpack.i.bf16 %v887_v39, %v775_v43  ;;  %v1068_v9 = vrot.slane %v5556_v49, 4  ;;  %v966_v27 = vsel %vm507_vm5, %v5568_v58, %v965_v4  ;;  %v977_v17 = vrot.slane %v5553_v61, 4 }
 0x195   : > { %678 = vrot.lane.b32.xlu2 %v670_v28, %s4675_s16  ;;  %v3969_v28 = vpop.permute.xlu0 %3968  ;;  %v1045_v1 = vsel %vm507_vm5, %v3965_v24, %v1044_v52  ;;  %v772_v24 = vrot.slane %v5550_v57, 4  ;;  %v3976_v19 = vunpack.i.h.bf16 %v5529_v10  ;;  %v884_v7 = vrot.slane %v5564_v8, 4 }
 0x196   : > { %686 = vrot.lane.b32.xlu1 %v672_v40, %s4676_s12  ;;  %v3970_v40 = vunpack.i.l.bf16 %v3969_v28  ;;  %v5574_v52 = vperm.slane %v1045_v1, %v5052_v42  ;;  %v1061_v43 = vperm.slane %v1055_v44, %v5052_v42  ;;  %v962_v59 = vperm.slane %v954_v22, %v5052_v42 }
 0x197   : > { %v1057_v4 = vsel %vm507_vm5, %v3966_v50, %v1056_v62  ;;  %v3971_v1 = vunpack.i.h.bf16 %v3969_v28  ;;  %v773_v10 = vsel %vm507_vm5, 0.0, %v772_v24  ;;  %v1265_v22 = vrot.slane %v3976_v19, 4 }
 0x198   : > { %v1254_v39 = vsel %vm507_vm5, %v1253_v29, %v3970_v40  ;;  %v1255_v34 = vrot.slane %v3970_v40, 4  ;;  %v1080_v44 = vrot.slane %v5574_v52, 4  ;;  %v885_v28 = vsel %vm507_vm5, 0.0, %v884_v7 }
 0x199   : > { %v5596_v40 = vperm.slane %v1254_v39, %v5052_v42  ;;  %v1065_v62 = vperm.slane %v1057_v4, %v5052_v42  ;;  %v4017_v24 = vpack.i.bf16 %v885_v28, %v773_v10  ;;  %v1267_v39 = vrot.slane %v3971_v1, 4 }
 0x19a   : > { %v1256_v50 = vsel %vm507_vm5, %v3975_v0, %v1255_v34  ;;  %v963_v4 = vrot.slane %v5568_v58, 4  ;;  %v1066_v28 = vrot.slane %v1061_v43, 4  ;;  %v975_v20 = vrot.slane %v962_v59, 4 }
 0x19b   : > { %4028 = vrot.lane.b32.xlu0 %v4027_v30, %s4677_s23  ;;  %v1740_v30 = vrot.slane %v5472_v38, 4  ;;  %v1069_v38 = vsel %vm507_vm5, %v1061_v43, %v1068_v9  ;;  %v1266_v9 = vsel %vm507_vm5, %v1265_v22, %v3971_v1  ;;  %v5621_v34 = vperm.slane %v1256_v50, %v5052_v42 }
 0x19c   : > { %v5618_v0 = vperm.slane %v1069_v38, %v5114_v25  ;;  %v1279_v7 = vrot.slane %v5596_v40, 4  ;;  %v1272_v1 = vperm.slane %v1266_v9, %v5052_v42  ;;  %v5638_v38 = vpop.permute.xlu1 %1346 }
 0x19d   : > { %702 = vrot.lane.b32.xlu2 %v676_v14, %s4673_s3  ;;  %v5592_v14 = vperm.slane %v966_v27, %v5114_v25  ;;  %v5598_v29 = vpop.permute.xlu0 %1344  ;;  %v778_v27 = vrot.slane %v5424_v33, 4  ;;  %v1081_v33 = vsel %vm507_vm5, %v1065_v62, %v1080_v44  ;;  %v1268_v44 = vsel %vm507_vm5, %v3976_v19, %v1267_v39 }
 0x19e   : > { %4023 = vrot.lane.b32.xlu1 %v4022_v6, %s4676_s12  ;;  %v978_v6 = vsel %vm507_vm5, %v962_v59, %v977_v17  ;;  %v5611_v17 = vsel %vm507_vm5, %v1740_v30, %v5450_v23  ;;  %v5630_v23 = vperm.slane %v5248_v5, %v5114_v25  ;;  %v890_v30 = vrot.slane %v5415_v12, 4 }
 0x19f   : > { %v5615_v21 = vperm.slane %v978_v6, %v5114_v25  ;;  %v779_v10 = vsel %vm507_vm5, 0.0, %v778_v27  ;;  %v5636_v6 = vpop.permute.xlu2 %3978  ;;  %v1358_v22 = vrot.slane %v5598_v29, 4  ;;  %v5645_v50 = vperm.slane %v1081_v33, %v5114_v25 }
 0x1a0   : > { %v4037_v5 = vpack.i.bf16 %v5630_v23, %v5618_v0  ;;  %v1280_v12 = vsel %vm507_vm5, %v1272_v1, %v1279_v7  ;;  %v1291_v58 = vrot.slane %v5621_v34, 4  ;;  %v5653_v19 = vperm.slane %v5253_v26, %v5114_v25 }
 0x1a1   : > { %v1370_v27 = vrot.slane %v5638_v38, 4  ;;  %v1276_v9 = vperm.slane %v1268_v44, %v5052_v42  ;;  %v1359_v7 = vsel %vm507_vm5, %v5581_v41, %v1358_v22  ;;  %v5668_v26 = vsel %vm507_vm5, %v963_v4, %v5534_v63 }
 0x1a2   : > { %v4047_v43 = vpack.i.bf16 %v5653_v19, %v5645_v50  ;;  %v5681_v22 = vsel %vm507_vm5, %v1066_v28, %v5556_v49  ;;  %v1367_v63 = vperm.slane %v1359_v7, %v5052_v42  ;;  %v976_v4 = vsel %vm507_vm5, %v975_v20, %v5553_v61 }
 0x1a3   : > { %1000 = vrot.lane.b32.xlu0 %v5592_v14, %s4671_s21  ;;  %v1292_v44 = vsel %vm507_vm5, %v1276_v9, %v1291_v58  ;;  %v5697_v49 = vperm.slane %v5291_v2, %v5114_v25  ;;  %v5700_v20 = vperm.slane %v976_v4, %v5114_v25  ;;  %v1637_v7 = vrot.slane %v5434_v54, 4 }
 0x1a4   : > { %v5689_v58 = vperm.slane %v1292_v44, %v5114_v25  ;;  %v1394_v61 = vrot.slane %v1367_v63, 4 }
 0x1a5   : > { %4018 = vrot.lane.b32.xlu2 %v4017_v24, %s4675_s16  ;;  %v891_v24 = vsel %vm507_vm5, 0.0, %v890_v30  ;;  %v5657_v39 = vpop.permute.xlu0 %1350  ;;  %v5664_v30 = vperm.slane %v1280_v12, %v5114_v25  ;;  %v1638_v4 = vsel %vm507_vm5, %v1637_v7, %v5418_v11 }
 0x1a6   : > { %1016 = vrot.lane.b32.xlu1 %v5615_v21, %s4674_s2  ;;  %v4032_v33 = vpack.i.bf16 %v891_v24, %v779_v10  ;;  %v1371_v59 = vsel %vm507_vm5, %v5657_v39, %v1370_v27  ;;  %v5677_v10 = vperm.slane %v5282_v51, %v5114_v25  ;;  %v1078_v24 = vrot.slane %v1065_v62, 4 }
 0x1a7   : > { %v1379_v51 = vperm.slane %v1371_v59, %v5052_v42  ;;  %v5692_v27 = vpop.permute.xlu2 %568  ;;  %v5744_v11 = vperm.slane %v1638_v4, %v5114_v25 }
 0x1a8   : > { %v4052_v12 = vpack.i.bf16 %v5677_v10, %v5664_v30  ;;  %v1079_v62 = vsel %vm507_vm5, %v1078_v24, %v5574_v52  ;;  %v1289_v52 = vrot.slane %v1276_v9, 4  ;;  %v1663_v9 = vrot.slane %v5455_v35, 4  ;;  %v2487_v24 = vld [vmem:[#allocation2 + $0xa8] sm:$0x3] }
 0x1a9   : > { %v1395_v2 = vsel %vm507_vm5, %v1379_v51, %v1394_v61  ;;  %v1368_v61 = vrot.slane %v5657_v39, 4  ;;  %v1661_v4 = vrot.slane %v5744_v11, 4 }
 0x1aa   : > { %v5719_v44 = vperm.slane %v1395_v2, %v5114_v25  ;;  %v1664_v39 = vsel %vm507_vm5, 0.0, %v1663_v9  ;;  %v5756_v2 = vperm.slane %v5294_v53, %v5114_v25  ;;  %v1877_v9 = vrot.slane %v5492_v18, 4 }
 0x1ab   : > { %4038 = vrot.lane.b32.xlu0 %v4037_v5, %s4671_s21  ;;  %v1277_v5 = vrot.slane %v1272_v1, 4  ;;  %v4062_v1 = vpack.i.bf16 %v5697_v49, %v5689_v58 }
 0x1ad   : > { %4033 = vrot.lane.b32.xlu2 %v4032_v33, %s4673_s3  ;;  %v5708_v28 = vsel %vm507_vm5, %v1277_v5, %v5596_v40  ;;  %v1392_v33 = vrot.slane %v1379_v51, 4  ;;  %v5723_v40 = vperm.slane %v5279_v31, %v5114_v25  ;;  %v1290_v31 = vsel %vm507_vm5, %v1289_v52, %v5621_v34 }
 0x1ae   : > { %4048 = vrot.lane.b32.xlu1 %v4047_v43, %s4674_s2  ;;  %v5716_v43 = vperm.slane %v1079_v62, %v5114_v25  ;;  %v1356_v51 = vrot.slane %v5581_v41, 4  ;;  %v2483_v62 = vld [vmem:[#allocation2 + $0x88] sm:$0x3]  ;;  %v5751_v34 = vperm.slane %v1290_v31, %v5114_v25  ;;  %v2802_v41 = vrot.slane %v2487_v24, 1 }
 0x1af   : > { %v1393_v59 = vsel %vm507_vm5, %v1392_v33, %v1367_v63  ;;  %v5732_v5 = vpop.permute.xlu2 %576  ;;  %v2486_v63 = vld [vmem:[#allocation2 + $0xa0] sm:$0xff]  ;;  %v2796_v52 = vrot.slane %v2483_v62, 1 }
 0x1b0   : > { %v4042_v54 = vpack.i.bf16 %v5723_v40, %v5716_v43  ;;  %v1357_v35 = vsel %vm507_vm5, %v1356_v51, %v5598_v29  ;;  %v2801_v33 = vrot.slane %v2486_v63, 1  ;;  %v1766_v29 = vrot.slane %v5488_v37, 4 }
 0x1b1   : > { %v5766_v31 = vperm.slane %v1357_v35, %v5052_v42  ;;  %v4057_v53 = vpack.i.bf16 %v5756_v2, %v5751_v34  ;;  %v1662_v51 = vsel %vm507_vm5, 0.0, %v1661_v4 }
 0x1b3   : > { %4053 = vrot.lane.b32.xlu0 %v4052_v12, %s4671_s21  ;;  %v5735_v12 = vperm.slane %v1393_v59, %v5114_v25  ;;  %v1369_v59 = vsel %vm507_vm5, %v1368_v61, %v5638_v38  ;;  %v1767_v61 = vsel %vm507_vm5, 0.0, %v1766_v29  ;;  %v1382_v62 = vrot.slane %v5766_v31, 4 }
 0x1b4   : > { %v5777_v37 = vperm.slane %v1369_v59, %v5052_v42  ;;  %v5803_v59 = vpop.permute.xlu0 %3983  ;;  %v5811_v29 = vperm.slane %v5267_v45, %v5114_v25 }
 0x1b5   : > { %1008 = vrot.lane.b32.xlu2 %v5700_v20, %s4672_s30 }
 0x1b6   : > { %4063 = vrot.lane.b32.xlu1 %v4062_v1, %s4674_s2  ;;  %v2482_v1 = vld [vmem:[#allocation2 + $0x80] sm:$0xff]  ;;  %v1875_v45 = vrot.slane %v5811_v29, 4 }
 0x1b7   : > { %v2795_v7 = vrot.slane %v2482_v1, 1  ;;  %v5787_v18 = vpop.permute.xlu2 %588 }
 0x1b9   : > { %v5774_v38 = vsel %vm819_vm4, %v2795_v7, %v2796_v52  ;;  %v1667_v7 = vrot.slane %v5443_v47, 4  ;;  %v5801_v52 = vperm.slane %v5611_v17, %v5114_v25  ;;  %v991_v17 = vrot.slane %v5700_v20, 4 }
 0x1ba   : > { %v2813_v24 = vrot.slane %v5774_v38, 4  ;;  %v3980_v20 = vunpack.i.l.bf16 %v5636_v6 }
 0x1bb   : > { %1433 = vrot.lane.b32.xlu0 %v5719_v44, %s4674_s2  ;;  %v1668_v47 = vsel %vm507_vm5, 0.0, %v1667_v7  ;;  %v1876_v7 = vsel %vm507_vm5, 0.0, %v1875_v45 }
 0x1bd   : > { %4043 = vrot.lane.b32.xlu2 %v4042_v54, %s4672_s30  ;;  %v5763_v54 = vsel %vm819_vm4, %v2801_v33, %v2802_v41  ;;  %v1878_v33 = vsel %vm507_vm5, 0.0, %v1877_v9  ;;  %v7314_v9 = vunpack.i.l.bf16 %v5803_v59 }
 0x1be   : > { %1425 = vrot.lane.b32.xlu1 %v5735_v12, %s4672_s30  ;;  %v2811_v63 = vrot.slane %v5763_v54, 4  ;;  %v5793_v35 = vsel %vm507_vm5, %v5763_v54, %v2813_v24  ;;  %v4072_v41 = vpack.i.bf16 %v1878_v33, %v1767_v61 }
 0x1bf   : > { %7365 = vst [vmem:[#allocation35_spill] sm:$0xff] %v5793_v35  ;;  %v1930_v61 = vrot.slane %v7314_v9, 4  ;;  %v1768_v9 = vrot.slane %v5495_v56, 4 }
 0x1c0   : > { %v5785_v1 = vsel %vm507_vm5, %v2811_v63, %v5774_v38  ;;  %v1764_v63 = vrot.slane %v5801_v52, 4 }
 0x1c2   : > { %v1765_v33 = vsel %vm507_vm5, 0.0, %v1764_v63  ;;  %v1770_v63 = vrot.slane %v5468_v15, 4  ;;  %v1769_v15 = vsel %vm507_vm5, 0.0, %v1768_v9 }
 0x1c3   : > { %1678 = vrot.lane.b32.xlu0 %v1664_v39, %s4676_s12  ;;  %v1383_v39 = vsel %vm507_vm5, %v5777_v37, %v1382_v62  ;;  %v992_v62 = vsel %vm507_vm5, 0.0, %v991_v17  ;;  %v4067_v35 = vpack.i.bf16 %v1876_v7, %v1765_v33  ;;  %v1931_v17 = vsel %vm507_vm5, %v1930_v61, %v3980_v20 }
 0x1c4   : > { %v5807_v4 = vperm.slane %v1383_v39, %v5114_v25  ;;  %v7315_v39 = vunpack.i.h.bf16 %v5803_v59  ;;  %v1881_v61 = vrot.slane %v5478_v46, 4  ;;  %v5853_v33 = vperm.slane %v1931_v17, %v5052_v42 }
 0x1c5   : > { %4058 = vrot.lane.b32.xlu2 %v4057_v53, %s4672_s30  ;;  %v5813_v53 = vpop.permute.xlu1 %584  ;;  %v3981_v7 = vunpack.i.h.bf16 %v5636_v6  ;;  %v1558_v17 = vrot.slane %v5756_v2, 4 }
 0x1c6   : > { %1670 = vrot.lane.b32.xlu1 %v1662_v51, %s4675_s16  ;;  %v1665_v51 = vrot.slane %v5462_v16, 4  ;;  %v1882_v46 = vsel %vm507_vm5, 0.0, %v1881_v61  ;;  %v1956_v6 = vrot.slane %v5853_v33, 4 }
 0x1c8   : > { %v1666_v16 = vsel %vm507_vm5, 0.0, %v1665_v51  ;;  %v1942_v51 = vrot.slane %v7315_v39, 4 }
 0x1cb   : > { %4073 = vrot.lane.b32.xlu0 %v4072_v41, %s4676_s12  ;;  %v1094_v41 = vrot.slane %v5716_v43, 4 }
 0x1cc   : > { %v5821_v24 = vpop.permute.xlu2 %690 }
 0x1cd   : > { %1417 = vrot.lane.b32.xlu2 %v5807_v4, %s4671_s21  ;;  %v1095_v43 = vsel %vm507_vm5, 0.0, %v1094_v41 }
 0x1ce   : > { %1694 = vrot.lane.b32.xlu1 %v1668_v47, %s4673_s3  ;;  %v1202_v47 = vrot.slane %v5723_v40, 4  ;;  %v1879_v40 = vrot.slane %v5502_v55, 4 }
 0x1d0   : > { %v1203_v56 = vsel %vm507_vm5, 0.0, %v1202_v47  ;;  %v1880_v55 = vsel %vm507_vm5, 0.0, %v1879_v40  ;;  %v1943_v47 = vsel %vm507_vm5, %v1942_v51, %v3981_v7  ;;  %v1559_v51 = vsel %vm507_vm5, 0.0, %v1558_v17 }
 0x1d1   : > { %v4097_v41 = vpack.i.bf16 %v1203_v56, %v1095_v43  ;;  %v4077_v39 = vpack.i.bf16 %v1880_v55, %v1769_v15  ;;  %v5864_v43 = vpop.permute.xlu0 %580  ;;  %v1406_v55 = vrot.slane %v5807_v4, 4  ;;  %v1932_v17 = vrot.slane %v3980_v20, 4 }
 0x1d3   : > { %1012 = vrot.lane.b32.xlu0 %v992_v62, %s4677_s23  ;;  %v5842_v62 = vpop.permute.xlu1 %564 }
 0x1d5   : > { %1686 = vrot.lane.b32.xlu2 %v1666_v16, %s4677_s23  ;;  %v1305_v16 = vrot.slane %v5751_v34, 4 }
 0x1d6   : > { %4068 = vrot.lane.b32.xlu1 %v4067_v35, %s4675_s16  ;;  %v1771_v35 = vsel %vm507_vm5, 0.0, %v1770_v63  ;;  %v5870_v63 = vperm.slane %v1943_v47, %v5052_v42  ;;  %v1092_v47 = vrot.slane %v5618_v0, 4 }
 0x1d7   : > { %v5845_v45 = vpop.permute.xlu2 %3993  ;;  %v4082_v9 = vpack.i.bf16 %v1882_v46, %v1771_v35  ;;  %v1306_v34 = vsel %vm507_vm5, 0.0, %v1305_v16  ;;  %v5885_v35 = vperm.slane %v5668_v26, %v5114_v25  ;;  %v1200_v46 = vrot.slane %v5630_v23, 4 }
 0x1d8   : > { %v4117_v2 = vpack.i.bf16 %v1559_v51, %v1306_v34  ;;  %v1957_v61 = vsel %vm507_vm5, %v5870_v63, %v1956_v6  ;;  %v1407_v6 = vsel %vm507_vm5, 0.0, %v1406_v55  ;;  %v1093_v34 = vsel %vm507_vm5, 0.0, %v1092_v47 }
 0x1d9   : > { %v987_v26 = vrot.slane %v5885_v35, 4  ;;  %v7366_v51 = vunpack.i.l.bf16 %v5803_v59  ;;  %v1201_v0 = vsel %vm507_vm5, 0.0, %v1200_v46  ;;  %v1944_v55 = vrot.slane %v3981_v7, 4 }
 0x1da   : > { %v4092_v23 = vpack.i.bf16 %v1201_v0, %v1093_v34  ;;  %v1380_v47 = vrot.slane %v5777_v37, 4  ;;  %v5926_v37 = vperm.slane %v5681_v22, %v5114_v25 }
 0x1db   : > { %4098 = vrot.lane.b32.xlu0 %v4097_v41, %s4677_s23  ;;  %v5876_v56 = vpop.permute.xlu1 %572  ;;  %v989_v41 = vrot.slane %v5592_v14, 4  ;;  %v1933_v4 = vsel %vm507_vm5, %v7366_v51, %v1932_v17  ;;  %v1556_v17 = vrot.slane %v5677_v10, 4 }
 0x1dd   : > { %4078 = vrot.lane.b32.xlu2 %v4077_v39, %s4677_s23  ;;  %v1965_v39 = vperm.slane %v1957_v61, %v5114_v25  ;;  %v990_v16 = vsel %vm507_vm5, 0.0, %v989_v41  ;;  %v5909_v61 = vperm.slane %v1933_v4, %v5052_v42  ;;  %v1557_v4 = vsel %vm507_vm5, 0.0, %v1556_v17 }
 0x1de   : > { %4083 = vrot.lane.b32.xlu1 %v4082_v9, %s4673_s3 }
 0x1df   : > { %v5873_v40 = vpop.permute.xlu2 %1674  ;;  %v1980_v41 = vrot.slane %v1965_v39, 4  ;;  %v1968_v7 = vrot.slane %v5909_v61, 4 }
 0x1e1   : > { %v1981_v51 = vsel %vm507_vm5, 0.0, %v1980_v41 }
 0x1e3   : > { %4118 = vrot.lane.b32.xlu0 %v4117_v2, %s4677_s23  ;;  %v683_v15 = vpop.permute.xlu0 %682  ;;  %v988_v2 = vsel %vm507_vm5, 0.0, %v987_v26  ;;  %v7367_v26 = vunpack.i.h.bf16 %v5803_v59 }
 0x1e5   : > { %1991 = vrot.lane.b32.xlu2 %v1965_v39, %s4671_s21  ;;  %v5895_v9 = vpop.permute.xlu1 %698 }
 0x1e6   : > { %1004 = vrot.lane.b32.xlu1 %v990_v16, %s4676_s12  ;;  %v1303_v16 = vrot.slane %v5664_v30, 4  ;;  %v993_v30 = vrot.slane %v5615_v21, 4  ;;  %v1381_v21 = vsel %vm507_vm5, %v1380_v47, %v5766_v31 }
 0x1e7   : > { %v5892_v14 = vpop.permute.xlu2 %4003  ;;  %v5953_v41 = vperm.slane %v1381_v21, %v5114_v25 }
 0x1e8   : > { %v1304_v10 = vsel %vm507_vm5, 0.0, %v1303_v16  ;;  %v994_v0 = vsel %vm507_vm5, 0.0, %v993_v30 }
 0x1e9   : > { %v1404_v17 = vrot.slane %v5953_v41, 4 }
 0x1eb   : > { %1421 = vrot.lane.b32.xlu0 %v1407_v6, %s4676_s12  ;;  %v1945_v6 = vsel %vm507_vm5, %v7367_v26, %v1944_v55 }
 0x1ec   : > { %v5942_v22 = vperm.slane %v1945_v6, %v5052_v42 }
 0x1ed   : > { %v5906_v20 = vpop.permute.xlu0 %3988  ;;  %996 = vrot.lane.b32.xlu2 %v988_v2, %s4675_s16  ;;  %v4112_v2 = vpack.i.bf16 %v1557_v4, %v1304_v10  ;;  %v1954_v10 = vrot.slane %v5870_v63, 4  ;;  %v592_v63 = vsel %vm591_vm6, %v5315_v13, %v5842_v62 }
 0x1ee   : > { %4093 = vrot.lane.b32.xlu1 %v4092_v23, %s4676_s12 }
 0x1ef   : > { %v679_v46 = vpop.permute.xlu2 %678 }
 0x1f0   : > { %v705_v34 = vsel %vm591_vm6, %v5507_v32, %v679_v46  ;;  %v5921_v39 = vpop.permute.xlu1 %3998  ;;  %v5937_v32 = vperm.slane %v5286_v36, %v5114_v25  ;;  %v1969_v36 = vsel %vm507_vm5, %v5942_v22, %v1968_v7  ;;  %v1096_v7 = vrot.slane %v5645_v50, 4 }
 0x1f1   : > { %v5932_v59 = vsel %vm593_vm7, %v705_v34, %v683_v15  ;;  %v1090_v15 = vrot.slane %v5926_v37, 4  ;;  %v5962_v47 = vperm.slane %v1969_v36, %v5114_v25  ;;  %v1204_v34 = vrot.slane %v5653_v19, 4 }
 0x1f2   : > { %v1198_v31 = vrot.slane %v5937_v32, 4  ;;  %v1097_v50 = vsel %vm507_vm5, 0.0, %v1096_v7  ;;  %v5987_v36 = vperm.slane %v5708_v28, %v5114_v25  ;;  %v1955_v28 = vsel %vm507_vm5, %v1954_v10, %v5853_v33 }
 0x1f3   : > { %1995 = vrot.lane.b32.xlu0 %v1981_v51, %s4676_s12  ;;  %v1091_v46 = vsel %vm507_vm5, 0.0, %v1090_v15  ;;  %v1405_v51 = vsel %vm507_vm5, 0.0, %v1404_v17  ;;  %v1205_v4 = vsel %vm507_vm5, 0.0, %v1204_v34  ;;  %v6013_v33 = vperm.slane %v1955_v28, %v5114_v25 }
 0x1f4   : > { %v1199_v26 = vsel %vm507_vm5, 0.0, %v1198_v31  ;;  %v3991_v31 = vunpack.i.h.bf16 %v5906_v20  ;;  %v4102_v13 = vpack.i.bf16 %v1205_v4, %v1097_v50  ;;  %v1966_v50 = vrot.slane %v5942_v22, 4 }
 0x1f5   : > { %v5946_v23 = vpop.permute.xlu0 %1690  ;;  %1020 = vrot.lane.b32.xlu2 %v994_v0, %s4673_s3  ;;  %v4087_v6 = vpack.i.bf16 %v1199_v26, %v1091_v46  ;;  %v5980_v0 = vperm.slane %v5304_v48, %v5114_v25  ;;  %v3990_v46 = vunpack.i.l.bf16 %v5906_v20  ;;  %v1410_v48 = vrot.slane %v5719_v44, 4 }
 0x1f6   : > { %4113 = vrot.lane.b32.xlu1 %v4112_v2, %s4676_s12  ;;  %v594_v44 = vsel %vm593_vm7, %v592_v63, %v5692_v27  ;;  %v1978_v4 = vrot.slane %v6013_v33, 4 }
 0x1f7   : > { %v5957_v16 = vpop.permute.xlu2 %702  ;;  %v1554_v34 = vrot.slane %v5980_v0, 4 }
 0x1f8   : > { %v5959_v55 = vpop.permute.xlu1 %1682 }
 0x1fb   : > { %2007 = vrot.lane.b32.xlu0 %v5962_v47, %s4674_s2 }
 0x1fd   : > { %v5970_v30 = vpop.permute.xlu0 %4013  ;;  %4088 = vrot.lane.b32.xlu2 %v4087_v6, %s4675_s16 }
 0x1fe   : > { %1413 = vrot.lane.b32.xlu1 %v1405_v51, %s4675_s16 }
 0x1ff   : > { %v4019_v21 = vpop.permute.xlu2 %4018 }
 0x200   : > { %v4021_v19 = vunpack.i.h.bf16 %v4019_v21  ;;  %v4020_v2 = vunpack.i.l.bf16 %v4019_v21  ;;  %v5982_v15 = vpop.permute.xlu1 %4008 }
 0x202   : > { %v920_v17 = vsel %vm591_vm6, %v5564_v8, %v4021_v19  ;;  %v808_v26 = vsel %vm591_vm6, %v5550_v57, %v4020_v2  ;;  %v1301_v8 = vrot.slane %v5987_v36, 4  ;;  %v596_v57 = vsel %vm595_vm8, %v594_v44, %v5876_v56 }
 0x203   : > { %4133 = vrot.lane.b32.xlu0 %v5298_v3, %s4668_s1  ;;  %v809_v62 = vsel %vm593_vm7, %v808_v26, %v3990_v46  ;;  %v921_v20 = vsel %vm593_vm7, %v920_v17, %v3991_v31  ;;  %v1411_v3 = vsel %vm507_vm5, 0.0, %v1410_v48  ;;  %v598_v7 = vsel %vm597_vm9, %v596_v57, %v5732_v5 }
 0x204   : > { %v1302_v56 = vsel %vm507_vm5, 0.0, %v1301_v8  ;;  %v600_v10 = vsel %vm599_vm10, %v598_v7, %v5864_v43  ;;  %v1555_v2 = vsel %vm507_vm5, 0.0, %v1554_v34  ;;  %v1307_v31 = vrot.slane %v5689_v58, 4 }
 0x205   : > { %v695_v6 = vpop.permute.xlu0 %694  ;;  %4103 = vrot.lane.b32.xlu2 %v4102_v13, %s4673_s3  ;;  %v4107_v63 = vpack.i.bf16 %v1555_v2, %v1302_v56  ;;  %v602_v43 = vsel %vm601_vm11, %v600_v10, %v5813_v53  ;;  %v1560_v48 = vrot.slane %v5697_v49, 4  ;;  %v1967_v26 = vsel %vm507_vm5, %v1966_v50, %v5909_v61 }
 0x206   : > { %1437 = vrot.lane.b32.xlu1 %v1411_v3, %s4673_s3  ;;  %v1308_v53 = vsel %vm507_vm5, 0.0, %v1307_v31  ;;  %v3995_v8 = vunpack.i.l.bf16 %v5845_v45  ;;  %v1973_v3 = vperm.slane %v1967_v26, %v5114_v25  ;;  %v4000_v56 = vunpack.i.l.bf16 %v5921_v39 }
 0x207   : > { %v4034_v27 = vpop.permute.xlu2 %4033  ;;  %v1561_v44 = vsel %vm507_vm5, 0.0, %v1560_v48 }
 0x208   : > { %v687_v51 = vpop.permute.xlu1 %686  ;;  %v4122_v57 = vpack.i.bf16 %v1561_v44, %v1308_v53 }
 0x209   : > { %v707_v21 = vsel %vm595_vm8, %v5932_v59, %v687_v51  ;;  %v4001_v51 = vunpack.i.h.bf16 %v5921_v39 }
 0x20a   : > { %v708_v19 = vsel %vm597_vm9, %v707_v21, %v5821_v24  ;;  %v1979_v24 = vsel %vm507_vm5, 0.0, %v1978_v4 }
 0x20b   : > { %v709_v5 = vsel %vm599_vm10, %v708_v19, %v695_v6  ;;  %v3996_v6 = vunpack.i.h.bf16 %v5845_v45  ;;  %v4036_v45 = vunpack.i.h.bf16 %v4034_v27  ;;  %v4035_v19 = vunpack.i.l.bf16 %v4034_v27 }
 0x20c   : > { %v710_v59 = vsel %vm601_vm11, %v709_v5, %v5895_v9  ;;  %v604_v9 = vsel %vm603_vm12, %v602_v43, %v5787_v18  ;;  %v1408_v27 = vrot.slane %v5735_v12, 4  ;;  %v1982_v12 = vrot.slane %v1973_v3, 4 }
 0x20d   : > { %v4029_v46 = vpop.permute.xlu0 %4028  ;;  %4108 = vrot.lane.b32.xlu2 %v4107_v63, %s4675_s16  ;;  %v711_v22 = vsel %vm603_vm12, %v710_v59, %v5957_v16 }
 0x20e   : > { %1987 = vrot.lane.b32.xlu1 %v1979_v24, %s4675_s16  ;;  %v1448_v58 = vrot.slane %v711_v22, 4  ;;  %v4031_v61 = vunpack.i.h.bf16 %v4029_v46  ;;  %v4030_v34 = vunpack.i.l.bf16 %v4029_v46  ;;  %v1984_v46 = vrot.slane %v5962_v47, 4 }
 0x20f   : > { %v6041_v17 = vpop.permute.xlu2 %1008  ;;  %v1409_v24 = vsel %vm507_vm5, 0.0, %v1408_v27  ;;  %v1983_v47 = vsel %vm507_vm5, 0.0, %v1982_v12 }
 0x210   : > { %v4024_v28 = vpop.permute.xlu1 %4023  ;;  %v6049_v49 = vsel %vm1459_vm13, %v604_v9, %v1448_v58  ;;  %v1985_v22 = vsel %vm507_vm5, 0.0, %v1984_v46 }
 0x211   : > { %v4026_v13 = vunpack.i.h.bf16 %v4024_v28  ;;  %v4025_v16 = vunpack.i.l.bf16 %v4024_v28 }
 0x213   : > { %v922_v7 = vsel %vm595_vm8, %v921_v20, %v4026_v13  ;;  %v810_v18 = vsel %vm595_vm8, %v809_v62, %v4025_v16 }
 0x214   : > { %v923_v10 = vsel %vm597_vm9, %v922_v7, %v3996_v6  ;;  %v811_v21 = vsel %vm597_vm9, %v810_v18, %v3995_v8 }
 0x215   : > { %v6061_v4 = vpop.permute.xlu0 %1000  ;;  %4123 = vrot.lane.b32.xlu2 %v4122_v57, %s4673_s3  ;;  %v812_v2 = vsel %vm599_vm10, %v811_v21, %v4030_v34  ;;  %v924_v20 = vsel %vm599_vm10, %v923_v10, %v4031_v61 }
 0x216   : > { %1999 = vrot.lane.b32.xlu1 %v1973_v3, %s4672_s30  ;;  %v813_v62 = vsel %vm601_vm11, %v812_v2, %v4000_v56  ;;  %v925_v39 = vsel %vm601_vm11, %v924_v20, %v4001_v51  ;;  %v4006_v20 = vunpack.i.h.bf16 %v5892_v14 }
 0x217   : > { %v6069_v50 = vpop.permute.xlu2 %4043  ;;  %v814_v5 = vsel %vm603_vm12, %v813_v62, %v4035_v19  ;;  %v926_v63 = vsel %vm603_vm12, %v925_v39, %v4036_v45 }
 0x218   : > { %v6073_v31 = vpop.permute.xlu1 %1016  ;;  %v1451_v43 = vrot.slane %v926_v63, 4 }
 0x21a   : > { %v6078_v59 = vsel %vm1459_vm13, %v814_v5, %v1451_v43 }
 0x21d   : > { %v6081_v48 = vpop.permute.xlu0 %4038  ;;  %1429 = vrot.lane.b32.xlu2 %v1409_v24, %s4677_s23 }
 0x21e   : > { %2011 = vrot.lane.b32.xlu1 %v1985_v22, %s4673_s3 }
 0x21f   : > { %v6086_v58 = vpop.permute.xlu2 %4058 }
 0x220   : > { %v6088_v53 = vpop.permute.xlu1 %4048 }
 0x225   : > { %v6091_v26 = vpop.permute.xlu0 %4053  ;;  %2003 = vrot.lane.b32.xlu2 %v1983_v47, %s4677_s23 }
 0x227   : > { %v6094_v9 = vpop.permute.xlu2 %1417 }
 0x228   : > { %v6096_v28 = vpop.permute.xlu1 %4063 }
 0x22d   : > { %v6098_v13 = vpop.permute.xlu0 %1433  ;;  %4128 = vrot.lane.b32.xlu2 %v5088_v60, %s4668_s1 }
 0x22f   : > { %v1687_v16 = vpop.permute.xlu2 %1686 }
 0x230   : > { %v6102_v44 = vpop.permute.xlu1 %1425 }
 0x235   : > { %v1679_v6 = vpop.permute.xlu0 %1678 }
 0x237   : > { %v6104_v8 = vpop.permute.xlu2 %4078 }
 0x238   : > { %v1671_v57 = vpop.permute.xlu1 %1670 }
 0x239   : > { %v1697_v3 = vsel %vm591_vm6, %v5744_v11, %v1671_v57 }
 0x23a   : > { %v1698_v61 = vsel %vm593_vm7, %v1697_v3, %v5873_v40 }
 0x23b   : > { %v1699_v34 = vsel %vm595_vm8, %v1698_v61, %v1679_v6 }
 0x23c   : > { %v1700_v18 = vsel %vm597_vm9, %v1699_v34, %v5959_v55  ;;  %v4005_v55 = vunpack.i.l.bf16 %v5892_v14 }
 0x23d   : > { %v4074_v7 = vpop.permute.xlu0 %4073  ;;  %v1701_v60 = vsel %vm599_vm10, %v1700_v18, %v1687_v16 }
 0x23e   : > { %v1702_v56 = vsel %vm601_vm11, %v1701_v60, %v5946_v23  ;;  %v4076_v62 = vunpack.i.h.bf16 %v4074_v7  ;;  %v4075_v39 = vunpack.i.l.bf16 %v4074_v7  ;;  %v4041_v60 = vunpack.i.h.bf16 %v6081_v48 }
 0x23f   : > { %v6114_v51 = vpop.permute.xlu2 %1991 }
 0x240   : > { %v1695_v10 = vpop.permute.xlu1 %1694 }
 0x241   : > { %v6119_v21 = vsel %vm603_vm12, %v1702_v56, %v1695_v10  ;;  %v4040_v56 = vunpack.i.l.bf16 %v6081_v48  ;;  %v4051_v48 = vunpack.i.h.bf16 %v6088_v53 }
 0x245   : > { %v1013_v11 = vpop.permute.xlu0 %1012 }
 0x247   : > { %v997_v45 = vpop.permute.xlu2 %996 }
 0x248   : > { %v4069_v40 = vpop.permute.xlu1 %4068 }
 0x249   : > { %v4071_v19 = vunpack.i.h.bf16 %v4069_v40  ;;  %v4070_v2 = vunpack.i.l.bf16 %v4069_v40  ;;  %v4046_v40 = vunpack.i.h.bf16 %v6069_v50 }
 0x24b   : > { %v1911_v5 = vsel %vm591_vm6, %v5811_v29, %v4071_v19  ;;  %v1800_v23 = vsel %vm591_vm6, %v5801_v52, %v4070_v2  ;;  %v1023_v29 = vsel %vm591_vm6, %v5885_v35, %v997_v45 }
 0x24c   : > { %v1912_v63 = vsel %vm593_vm7, %v1911_v5, %v4006_v20  ;;  %v1801_v27 = vsel %vm593_vm7, %v1800_v23, %v4005_v55  ;;  %v1024_v52 = vsel %vm593_vm7, %v1023_v29, %v6061_v4 }
 0x24d   : > { %v6130_v43 = vsel %vm595_vm8, %v1912_v63, %v4076_v62  ;;  %v6133_v46 = vsel %vm595_vm8, %v1801_v27, %v4075_v39  ;;  %v4099_v24 = vpop.permute.xlu0 %4098  ;;  %v4050_v62 = vunpack.i.l.bf16 %v6088_v53 }
 0x24e   : > { %v4100_v2 = vunpack.i.l.bf16 %v4099_v24 }
 0x24f   : > { %v1021_v14 = vpop.permute.xlu2 %1020 }
 0x250   : > { %v6135_v22 = vpop.permute.xlu1 %4083 }
 0x255   : > { %v6141_v16 = vpop.permute.xlu0 %4118 }
 0x257   : > { %v4089_v12 = vpop.permute.xlu2 %4088 }
 0x258   : > { %v1005_v47 = vpop.permute.xlu1 %1004  ;;  %v4091_v3 = vunpack.i.h.bf16 %v4089_v12  ;;  %v4090_v61 = vunpack.i.l.bf16 %v4089_v12 }
 0x259   : > { %v1025_v6 = vsel %vm595_vm8, %v1024_v52, %v1005_v47 }
 0x25a   : > { %v1026_v57 = vsel %vm597_vm9, %v1025_v6, %v6041_v17  ;;  %v1234_v35 = vsel %vm591_vm6, %v5937_v32, %v4091_v3  ;;  %v1126_v4 = vsel %vm591_vm6, %v5926_v37, %v4090_v61  ;;  %v4101_v32 = vunpack.i.h.bf16 %v4099_v24 }
 0x25b   : > { %v1027_v34 = vsel %vm599_vm10, %v1026_v57, %v1013_v11  ;;  %v4045_v11 = vunpack.i.l.bf16 %v6069_v50  ;;  %v1235_v19 = vsel %vm593_vm7, %v1234_v35, %v4041_v60  ;;  %v4056_v57 = vunpack.i.h.bf16 %v6091_v26 }
 0x25c   : > { %v1028_v7 = vsel %vm601_vm11, %v1027_v34, %v6073_v31  ;;  %v1127_v31 = vsel %vm593_vm7, %v1126_v4, %v4040_v56  ;;  %v4055_v3 = vunpack.i.l.bf16 %v6091_v26 }
 0x25d   : > { %v1422_v20 = vpop.permute.xlu0 %1421  ;;  %v1029_v34 = vsel %vm603_vm12, %v1028_v7, %v1021_v14  ;;  %v4065_v7 = vunpack.i.l.bf16 %v6096_v28 }
 0x25f   : > { %v4104_v18 = vpop.permute.xlu2 %4103 }
 0x260   : > { %v4094_v10 = vpop.permute.xlu1 %4093  ;;  %v4105_v50 = vunpack.i.l.bf16 %v4104_v18 }
 0x261   : > { %v4096_v17 = vunpack.i.h.bf16 %v4094_v10  ;;  %v4095_v45 = vunpack.i.l.bf16 %v4094_v10  ;;  %v4061_v10 = vunpack.i.h.bf16 %v6086_v58 }
 0x263   : > { %v1236_v37 = vsel %vm595_vm8, %v1235_v19, %v4096_v17  ;;  %v1128_v55 = vsel %vm595_vm8, %v1127_v31, %v4095_v45  ;;  %v4060_v17 = vunpack.i.l.bf16 %v6086_v58 }
 0x264   : > { %v1237_v39 = vsel %vm597_vm9, %v1236_v37, %v4046_v40  ;;  %v1129_v5 = vsel %vm597_vm9, %v1128_v55, %v4045_v11  ;;  %v4120_v40 = vunpack.i.l.bf16 %v6141_v16 }
 0x265   : > { %v1238_v23 = vsel %vm599_vm10, %v1237_v39, %v4101_v32  ;;  %v1130_v63 = vsel %vm599_vm10, %v1129_v5, %v4100_v2 }
 0x266   : > { %v1239_v27 = vsel %vm601_vm11, %v1238_v23, %v4051_v48  ;;  %v1131_v24 = vsel %vm601_vm11, %v1130_v63, %v4050_v62  ;;  %v4106_v48 = vunpack.i.h.bf16 %v4104_v18  ;;  %v4373_v18 = vld [vmem:[#allocation2 + $0x50] sm:$0xff] }
 0x267   : > { %v4109_v29 = vpop.permute.xlu2 %4108  ;;  %v1132_v12 = vsel %vm603_vm12, %v1131_v24, %v4105_v50  ;;  %v4372_v24 = vld [vmem:[#allocation2 + $0x58] sm:$0x3] }
 0x268   : > { %v4111_v52 = vunpack.i.h.bf16 %v4109_v29  ;;  %v4110_v47 = vunpack.i.l.bf16 %v4109_v29  ;;  %v4114_v6 = vpop.permute.xlu1 %4113  ;;  %v1454_v53 = vrot.slane %v1132_v12, 4  ;;  %v1240_v23 = vsel %vm603_vm12, %v1239_v27, %v4106_v48 }
 0x269   : > { %v4116_v61 = vunpack.i.h.bf16 %v4114_v6  ;;  %v4115_v60 = vunpack.i.l.bf16 %v4114_v6  ;;  %v2128_v29 = vrot.slane %v4372_v24, 2 }
 0x26a   : > { %v1590_v35 = vsel %vm591_vm6, %v5980_v0, %v4111_v52  ;;  %v1337_v4 = vsel %vm591_vm6, %v5987_v36, %v4110_v47  ;;  %v1462_v56 = vsel %vm1459_vm13, %v1029_v34, %v1454_v53  ;;  %v1996_v36 = vpop.permute.xlu0 %1995  ;;  %v2127_v47 = vrot.slane %v4373_v18, 2  ;;  %v7368_v53 = vld [vmem:[#allocation31_spill] sm:$0xff] }
 0x26b   : > { %v1338_v45 = vsel %vm593_vm7, %v1337_v4, %v4055_v3  ;;  %v1591_v26 = vsel %vm593_vm7, %v1590_v35, %v4056_v57  ;;  %v2140_v57 = vrot.slane %v7368_v53, 4  ;;  %v7369_v3 = vld [vmem:[#allocation32_spill] sm:$0xff] }
 0x26c   : > { %v1592_v14 = vsel %vm595_vm8, %v1591_v26, %v4116_v61  ;;  %v1339_v0 = vsel %vm595_vm8, %v1338_v45, %v4115_v60  ;;  %v2152_v61 = vrot.slane %v7369_v3, 4  ;;  %v6213_v34 = vsel %vm1133_vm3, %v2127_v47, %v2128_v29 }
 0x26d   : > { %v6187_v11 = vsel %vm597_vm9, %v1592_v14, %v4061_v10  ;;  %v1340_v31 = vsel %vm597_vm9, %v1339_v0, %v4060_v17  ;;  %v2154_v60 = vrot.slane %v6213_v34, 4 }
 0x26e   : > { %v1341_v58 = vsel %vm599_vm10, %v1340_v31, %v4120_v40  ;;  %v2153_v4 = vsel %vm507_vm5, %v2152_v61, %v6213_v34  ;;  %v1464_v40 = vld [vmem:[#allocation9] sm:$0x3] }
 0x26f   : > { %v6191_v19 = vpop.permute.xlu2 %4123  ;;  %v1342_v32 = vsel %vm601_vm11, %v1341_v58, %v4065_v7  ;;  %v2159_v14 = vperm.slane %v2153_v4, %v5052_v42 }
 0x270   : > { %v4125_v2 = vunpack.i.l.bf16 %v6191_v19  ;;  %v1414_v37 = vpop.permute.xlu1 %1413 }
 0x271   : > { %v1440_v55 = vsel %vm591_vm6, %v5953_v41, %v1414_v37 }
 0x272   : > { %v1441_v62 = vsel %vm593_vm7, %v1440_v55, %v6094_v9  ;;  %v1343_v39 = vsel %vm603_vm12, %v1342_v32, %v4125_v2  ;;  %v2008_v12 = vpop.permute.xlu0 %2007 }
 0x273   : > { %v1457_v5 = vrot.slane %v1343_v39, 4  ;;  %v1442_v50 = vsel %vm595_vm8, %v1441_v62, %v1422_v20 }
 0x274   : > { %v1443_v41 = vsel %vm597_vm9, %v1442_v50, %v6102_v44  ;;  %v7370_v44 = vld [vmem:[#allocation33_spill] sm:$0xff] }
 0x275   : > { %v1463_v63 = vsel %vm1459_vm13, %v1240_v23, %v1457_v5  ;;  %v2141_v35 = vsel %vm507_vm5, %v2140_v57, %v7370_v44  ;;  %v2142_v7 = vrot.slane %v7370_v44, 4 }
 0x277   : > { %v1430_v52 = vpop.permute.xlu2 %1429 }
 0x278   : > { %v1444_v9 = vsel %vm599_vm10, %v1443_v41, %v1430_v52  ;;  %v1438_v6 = vpop.permute.xlu1 %1437 }
 0x279   : > { %v1445_v20 = vsel %vm601_vm11, %v1444_v9, %v6098_v13  ;;  %v2147_v13 = vperm.slane %v2141_v35, %v5052_v42 }
 0x27a   : > { %v1446_v27 = vsel %vm603_vm12, %v1445_v20, %v1438_v6  ;;  %v4134_v45 = vpop.permute.xlu0 %4133 }
 0x27b   : > { %3720 = vmatpush.msk.msra.mxu0 %vm1459_vm13, %v1446_v27  ;;  %v2166_v58 = vrot.slane %v2147_v13, 4  ;;  %v4135_v32 = vunpack.i.l.bf16 %v4134_v45 }
 0x27d   : > { %1484 = vmatpush.msra.mxu0 %v1463_v63  ;;  %v2167_v55 = vsel %vm507_vm5, %v2159_v14, %v2166_v58  ;;  %v2033_v62 = vrot.slane %v4135_v32, 4 }
 0x27e   : > { %v2175_v6 = vperm.slane %v2167_v55, %v5114_v25 }
 0x27f   : > { %v2004_v10 = vpop.permute.xlu2 %2003  ;;  %1485 = vmatpush.msra.mxu0 %v1462_v56  ;;  %v2155_v56 = vsel %vm507_vm5, %v7369_v3, %v2154_v60 }
 0x280   : > { %v1988_v17 = vpop.permute.xlu1 %1987  ;;  %v2163_v2 = vperm.slane %v2155_v56, %v5052_v42 }
 0x281   : > { %v2014_v26 = vsel %vm591_vm6, %v6013_v33, %v1988_v17  ;;  %1486 = vmatpush.msra.mxu0 %v6078_v59  ;;  %v4136_v33 = vunpack.i.h.bf16 %v4134_v45  ;;  %v2164_v59 = vrot.slane %v2159_v14, 4 }
 0x282   : > { %v2015_v0 = vsel %vm593_vm7, %v2014_v26, %v6114_v51  ;;  %v2143_v51 = vsel %vm507_vm5, %v7368_v53, %v2142_v7  ;;  %v2176_v63 = vrot.slane %v2163_v2, 4  ;;  %v2190_v26 = vrot.slane %v2175_v6, 4 }
 0x283   : > { %1487 = vmatpush.msra.mxu0 %v6049_v49  ;;  %v2016_v31 = vsel %vm595_vm8, %v2015_v0, %v1996_v36  ;;  %v2045_v48 = vrot.slane %v4136_v33, 4  ;;  %v2165_v50 = vsel %vm507_vm5, %v2164_v59, %v2147_v13  ;;  %v2151_v23 = vperm.slane %v2143_v51, %v5052_v42 }
 0x284   : > { %3721 = vmatmul.msk.f32.vlgmr.msra.gmra.mxu0 %vm1465_vm14, %v1464_v40  ;;  %v6252_v61 = vperm.slane %v2165_v50, %v5114_v25  ;;  %v2191_v51 = vsel %vm507_vm5, 0.0, %v2190_v26 }
 0x286   : > { %v2188_v0 = vrot.slane %v6252_v61, 4 }
 0x287   : > { %v4129_v37 = vpop.permute.xlu2 %4128 }
 0x288   : > { %v4131_v39 = vunpack.i.h.bf16 %v4129_v37  ;;  %v4130_v49 = vunpack.i.l.bf16 %v4129_v37  ;;  %v2000_v5 = vpop.permute.xlu1 %1999  ;;  %v2178_v37 = vrot.slane %v2151_v23, 4 }
 0x289   : > { %v2017_v36 = vsel %vm597_vm9, %v2016_v31, %v2000_v5 }
 0x28a   : > { %v2046_v24 = vsel %vm507_vm5, %v2045_v48, %v4131_v39  ;;  %v2047_v29 = vrot.slane %v4131_v39, 4  ;;  %v2034_v52 = vsel %vm507_vm5, %v2033_v62, %v4130_v49  ;;  %v2035_v41 = vrot.slane %v4130_v49, 4 }
 0x28b   : > { %v2052_v18 = vperm.slane %v2046_v24, %v5052_v42  ;;  %v2040_v47 = vperm.slane %v2034_v52, %v5052_v42  ;;  %v2018_v9 = vsel %vm599_vm10, %v2017_v36, %v2004_v10  ;;  %v2177_v10 = vsel %vm507_vm5, %v2176_v63, %v2151_v23 }
 0x28c   : > { %v2048_v57 = vsel %vm507_vm5, %v4136_v33, %v2047_v29  ;;  %v2036_v20 = vsel %vm507_vm5, %v4135_v32, %v2035_v41  ;;  %v6249_v27 = vsel %vm601_vm11, %v2018_v9, %v2008_v12  ;;  %v2183_v31 = vperm.slane %v2177_v10, %v5114_v25 }
 0x28d   : > { %v2056_v35 = vperm.slane %v2048_v57, %v5052_v42  ;;  %v2057_v4 = vrot.slane %v2052_v18, 4  ;;  %v2044_v60 = vperm.slane %v2036_v20, %v5052_v42  ;;  %v2059_v13 = vrot.slane %v2040_v47, 4 }
 0x28e   : > { %v2189_v62 = vsel %vm507_vm5, 0.0, %v2188_v0  ;;  %v2192_v36 = vrot.slane %v2183_v31, 4  ;;  %v2179_v63 = vsel %vm507_vm5, %v2163_v2, %v2178_v37  ;;  %v4010_v57 = vunpack.i.l.bf16 %v5982_v15 }
 0x28f   : > { %v2069_v17 = vrot.slane %v2056_v35, 4  ;;  %v2060_v45 = vsel %vm507_vm5, %v2052_v18, %v2059_v13  ;;  %v2058_v40 = vsel %vm507_vm5, %v2057_v4, %v2040_v47  ;;  %v2071_v7 = vrot.slane %v2044_v60, 4 }
 0x290   : > { %v2068_v12 = vperm.slane %v2060_v45, %v5114_v25  ;;  %v6261_v14 = vperm.slane %v2058_v40, %v5114_v25  ;;  %v2193_v24 = vsel %vm507_vm5, 0.0, %v2192_v36  ;;  %v2187_v41 = vperm.slane %v2179_v63, %v5114_v25 }
 0x291   : > { %v2070_v56 = vsel %vm507_vm5, %v2069_v17, %v2044_v60  ;;  %v2072_v50 = vsel %vm507_vm5, %v2056_v35, %v2071_v7  ;;  %v4172_v2 = vpack.i.bf16 %v6213_v34, %v7370_v44  ;;  %v4016_v20 = vunpack.i.h.bf16 %v5970_v30 }
 0x292   : > { %v4142_v58 = vpack.i.bf16 %v2175_v6, %v2068_v12  ;;  %v2083_v33 = vrot.slane %v2068_v12, 4  ;;  %v2081_v32 = vrot.slane %v6261_v14, 4  ;;  %v2076_v59 = vperm.slane %v2070_v56, %v5114_v25 }
 0x293   : > { %v2080_v29 = vperm.slane %v2072_v50, %v5114_v25  ;;  %v4011_v6 = vunpack.i.h.bf16 %v5982_v15  ;;  %v4081_v35 = vunpack.i.h.bf16 %v6104_v8  ;;  %v4080_v4 = vunpack.i.l.bf16 %v6104_v8 }
 0x294   : > { %4143 = vrot.lane.b32.xlu2 %v4142_v58, %s4671_s21  ;;  %v2084_v55 = vsel %vm507_vm5, 0.0, %v2083_v33  ;;  %v2082_v48 = vsel %vm507_vm5, 0.0, %v2081_v32  ;;  %v2085_v39 = vrot.slane %v2076_v59, 4  ;;  %v4152_v47 = vpack.i.bf16 %v2183_v31, %v2076_v59 }
 0x295   : > { %v4147_v49 = vpack.i.bf16 %v2191_v51, %v2084_v55  ;;  %v4137_v5 = vpack.i.bf16 %v2189_v62, %v2082_v48  ;;  %v4162_v18 = vpack.i.bf16 %v2187_v41, %v2080_v29  ;;  %v2087_v9 = vrot.slane %v2080_v29, 4 }
 0x296   : > { %v2086_v23 = vsel %vm507_vm5, 0.0, %v2085_v39  ;;  %v2194_v60 = vrot.slane %v2187_v41, 4  ;;  %v4015_v13 = vunpack.i.l.bf16 %v5970_v30  ;;  %v4086_v10 = vunpack.i.h.bf16 %v6135_v22  ;;  %v6325_v39 = vpop.permute.xlu1 %2011 }
 0x297   : > { %4148 = vrot.lane.b32.xlu0 %v4147_v49, %s4676_s12  ;;  %4138 = vrot.lane.b32.xlu1 %v4137_v5, %s4675_s16  ;;  %v4157_v52 = vpack.i.bf16 %v2193_v24, %v2086_v23  ;;  %v1803_v15 = vsel %vm597_vm9, %v6133_v46, %v4010_v57  ;;  %v1914_v17 = vsel %vm597_vm9, %v6130_v43, %v4011_v6  ;;  %v4085_v45 = vunpack.i.l.bf16 %v6135_v22 }
 0x298   : > { %v2088_v26 = vsel %vm507_vm5, 0.0, %v2087_v9  ;;  %v1804_v40 = vsel %vm599_vm10, %v1803_v15, %v4080_v4  ;;  %v1915_v12 = vsel %vm599_vm10, %v1914_v17, %v4081_v35  ;;  %v2195_v0 = vsel %vm507_vm5, 0.0, %v2194_v60 }
 0x299   : > { %v1805_v8 = vsel %vm601_vm11, %v1804_v40, %v4015_v13  ;;  %v1916_v30 = vsel %vm601_vm11, %v1915_v12, %v4016_v20  ;;  %v4177_v46 = vpack.i.bf16 %v7369_v3, %v7368_v53  ;;  %v4167_v43 = vpack.i.bf16 %v2195_v0, %v2088_v26 }
 0x29a   : > { %v1806_v22 = vsel %vm603_vm12, %v1805_v8, %v4085_v45  ;;  %v1917_v7 = vsel %vm603_vm12, %v1916_v30, %v4086_v10  ;;  %v4121_v58 = vunpack.i.h.bf16 %v6141_v16  ;;  %v4066_v33 = vunpack.i.h.bf16 %v6096_v28 }
 0x29b   : > { %v2441_v56 = vrot.slane %v1917_v7, 4  ;;  %v4126_v32 = vunpack.i.h.bf16 %v6191_v19  ;;  %v2438_v37 = vrot.slane %v6119_v21, 4 }
 0x29c   : > { %4158 = vrot.lane.b32.xlu2 %v4157_v52, %s4677_s23  ;;  %v1594_v59 = vsel %vm599_vm10, %v6187_v11, %v4121_v58 }
 0x29d   : > { %v6312_v31 = vsel %vm1459_vm13, %v1806_v22, %v2441_v56  ;;  %v1595_v51 = vsel %vm601_vm11, %v1594_v59, %v4066_v33 }
 0x29e   : > { %7371 = vst [vmem:[#allocation31_spill] sm:$0xff] %v6312_v31  ;;  %v1596_v55 = vsel %vm603_vm12, %v1595_v51, %v4126_v32 }
 0x29f   : > { %4163 = vrot.lane.b32.xlu0 %v4162_v18, %s4674_s2  ;;  %4153 = vrot.lane.b32.xlu1 %v4152_v47, %s4672_s30  ;;  %v6323_v48 = vsel %vm1459_vm13, %v1596_v55, %v2438_v37 }
 0x2a0   : > { %7372 = vst [vmem:[#allocation32_spill] sm:$0xff] %v6323_v48 }
 0x2a4   : > { %4173 = vrot.lane.b32.xlu2 %v4172_v2, %s4667_s10 }
 0x2a7   : > { %4178 = vrot.lane.b32.xlu0 %v4177_v46, %s4667_s10  ;;  %4168 = vrot.lane.b32.xlu1 %v4167_v43, %s4673_s3 }
 0x2ee   : > { %v4144_v62 = vpop.permute.xlu2 %4143 }
 0x2ef   : > { %v4146_v36 = vunpack.i.h.bf16 %v4144_v62  ;;  %v4145_v11 = vunpack.i.l.bf16 %v4144_v62 }
 0x2f6   : > { %v6327_v16 = vpop.permute.xlu2 %4158 }
 0x2f7   : > { %v4160_v57 = vunpack.i.l.bf16 %v6327_v16 }
 0x2fe   : > { %v4174_v2 = vpop.permute.xlu2 %4173 }
 0x2ff   : > { %v4176_v35 = vunpack.i.h.bf16 %v4174_v2  ;;  %v4175_v4 = vunpack.i.l.bf16 %v4174_v2 }
 0x301   : > { %v2257_v13 = vrot.slane %v4176_v35, 4  ;;  %v2245_v17 = vrot.slane %v4175_v4, 4 }
 0x309   : > { %v4149_v28 = vpop.permute.xlu0 %4148  ;;  %v4139_v49 = vpop.permute.xlu1 %4138 }
 0x30a   : > { %v4141_v19 = vunpack.i.h.bf16 %v4139_v49  ;;  %v4140_v5 = vunpack.i.l.bf16 %v4139_v49  ;;  %v4151_v50 = vunpack.i.h.bf16 %v4149_v28  ;;  %v4150_v23 = vunpack.i.l.bf16 %v4149_v28 }
 0x30c   : > { %v2224_v21 = vsel %vm591_vm6, %v6252_v61, %v4141_v19  ;;  %v2117_v63 = vsel %vm591_vm6, %v6261_v14, %v4140_v5 }
 0x30d   : > { %v2225_v24 = vsel %vm593_vm7, %v2224_v21, %v4146_v36  ;;  %v2118_v29 = vsel %vm593_vm7, %v2117_v63, %v4145_v11 }
 0x30e   : > { %v2119_v52 = vsel %vm595_vm8, %v2118_v29, %v4150_v23  ;;  %v2226_v41 = vsel %vm595_vm8, %v2225_v24, %v4151_v50  ;;  %v4161_v24 = vunpack.i.h.bf16 %v6327_v16  ;;  %v2020_v16 = vsel %vm603_vm12, %v6249_v27, %v6325_v39 }
 0x311   : > { %v6337_v18 = vpop.permute.xlu0 %4163  ;;  %v4154_v47 = vpop.permute.xlu1 %4153 }
 0x312   : > { %v4156_v9 = vunpack.i.h.bf16 %v4154_v47  ;;  %v4155_v6 = vunpack.i.l.bf16 %v4154_v47  ;;  %v4166_v29 = vunpack.i.h.bf16 %v6337_v18 }
 0x314   : > { %v2120_v61 = vsel %vm597_vm9, %v2119_v52, %v4155_v6  ;;  %v2227_v14 = vsel %vm597_vm9, %v2226_v41, %v4156_v9  ;;  %v4165_v52 = vunpack.i.l.bf16 %v6337_v18 }
 0x315   : > { %v2121_v20 = vsel %vm599_vm10, %v2120_v61, %v4160_v57  ;;  %v2228_v41 = vsel %vm599_vm10, %v2227_v14, %v4161_v24 }
 0x316   : > { %v2122_v47 = vsel %vm601_vm11, %v2121_v20, %v4165_v52 }
 0x319   : > { %v4179_v60 = vpop.permute.xlu0 %4178 }
 0x31a   : > { %v4181_v10 = vunpack.i.h.bf16 %v4179_v60  ;;  %v4180_v15 = vunpack.i.l.bf16 %v4179_v60 }
 0x31c   : > { %v2255_v45 = vrot.slane %v4181_v10, 4  ;;  %v2258_v26 = vsel %vm507_vm5, %v4181_v10, %v2257_v13  ;;  %v2243_v40 = vrot.slane %v4180_v15, 4  ;;  %v2246_v8 = vsel %vm507_vm5, %v4180_v15, %v2245_v17 }
 0x31d   : > { %v2266_v12 = vperm.slane %v2258_v26, %v5052_v42  ;;  %v2254_v7 = vperm.slane %v2246_v8, %v5052_v42 }
 0x31e   : > { %v2256_v30 = vsel %vm507_vm5, %v2255_v45, %v4176_v35  ;;  %v2244_v0 = vsel %vm507_vm5, %v2243_v40, %v4175_v4 }
 0x31f   : > { %v2262_v46 = vperm.slane %v2256_v30, %v5052_v42  ;;  %v2279_v43 = vrot.slane %v2266_v12, 4  ;;  %v2250_v22 = vperm.slane %v2244_v0, %v5052_v42  ;;  %v2281_v49 = vrot.slane %v2254_v7, 4 }
 0x321   : > { %v2269_v56 = vrot.slane %v2250_v22, 4  ;;  %v2267_v58 = vrot.slane %v2262_v46, 4  ;;  %v2280_v33 = vsel %vm507_vm5, %v2279_v43, %v2254_v7  ;;  %v2282_v11 = vsel %vm507_vm5, %v2266_v12, %v2281_v49 }
 0x322   : > { %v2286_v55 = vperm.slane %v2280_v33, %v5114_v25  ;;  %v2290_v23 = vperm.slane %v2282_v11, %v5114_v25 }
 0x323   : > { %v2270_v32 = vsel %vm507_vm5, %v2262_v46, %v2269_v56  ;;  %v2268_v59 = vsel %vm507_vm5, %v2267_v58, %v2250_v22 }
 0x324   : > { %v2278_v51 = vperm.slane %v2270_v32, %v5114_v25  ;;  %v2274_v37 = vperm.slane %v2268_v59, %v5114_v25  ;;  %v2295_v36 = vrot.slane %v2286_v55, 4  ;;  %v2297_v21 = vrot.slane %v2290_v23, 4  ;;  %v6426_v32 = vld [vmem:[#allocation2 + $0x90] sm:$0xff]  ;;  %v2485_v59 = vld [vmem:[#allocation2 + $0x98] sm:$0x3] }
 0x326   : > { %2304 = vrot.lane.b32.xlu2 %v2278_v51, %s4671_s21  ;;  %v2293_v62 = vrot.slane %v2278_v51, 4  ;;  %v2291_v28 = vrot.slane %v2274_v37, 4  ;;  %v2296_v50 = vsel %vm507_vm5, 0.0, %v2295_v36  ;;  %v2298_v63 = vsel %vm507_vm5, 0.0, %v2297_v21 }
 0x327   : > { %v2799_v21 = vrot.slane %v2485_v59, 1 }
 0x328   : > { %v2294_v19 = vsel %vm507_vm5, 0.0, %v2293_v62  ;;  %v2292_v5 = vsel %vm507_vm5, 0.0, %v2291_v28  ;;  %v2489_v62 = vld [vmem:[#allocation2 + $0xb8] sm:$0x3] }
 0x329   : > { %2308 = vrot.lane.b32.xlu0 %v2294_v19, %s4676_s12  ;;  %2300 = vrot.lane.b32.xlu1 %v2292_v5, %s4675_s16  ;;  %v3111_v19 = vrot.slane %v6426_v32, 2  ;;  %v3112_v5 = vrot.slane %v2485_v59, 2 }
 0x32b   : > { %v3113_v24 = vsel %vm1133_vm3, %v3111_v19, %v3112_v5 }
 0x32e   : > { %2316 = vrot.lane.b32.xlu2 %v2296_v50, %s4677_s23  ;;  %v3118_v50 = vrot.slane %v2489_v62, 2 }
 0x331   : > { %2320 = vrot.lane.b32.xlu0 %v2290_v23, %s4674_s2  ;;  %2312 = vrot.lane.b32.xlu1 %v2286_v55, %s4672_s30  ;;  %v6430_v55 = vld [vmem:[#allocation2 + $0xb0] sm:$0xff]  ;;  %v2798_v23 = vrot.slane %v6426_v32, 1 }
 0x332   : > { %v3117_v36 = vrot.slane %v6430_v55, 2 }
 0x334   : > { %v3119_v52 = vsel %vm1133_vm3, %v3117_v36, %v3118_v50 }
 0x336   : > { %2334 = vrot.lane.b32.xlu2 %v7370_v44, %s4668_s1  ;;  %v6381_v44 = vpop.permute.xlu1 %4168 }
 0x339   : > { %2336 = vrot.lane.b32.xlu0 %v6213_v34, %s4668_s1  ;;  %2324 = vrot.lane.b32.xlu1 %v2298_v63, %s4673_s3  ;;  %v6385_v34 = vsel %vm601_vm11, %v2228_v41, %v4166_v29  ;;  %v2805_v63 = vrot.slane %v2489_v62, 1  ;;  %v2804_v29 = vrot.slane %v6430_v55, 1  ;;  %v6444_v41 = vsel %vm819_vm4, %v2798_v23, %v2799_v21 }
 0x33a   : > { %v2825_v5 = vrot.slane %v6444_v41, 4 }
 0x33e   : > { %2340 = vrot.lane.b32.xlu2 %v7369_v3, %s4668_s1  ;;  %v4170_v3 = vunpack.i.l.bf16 %v6381_v44 }
 0x340   : > { %v2123_v9 = vsel %vm603_vm12, %v2122_v47, %v4170_v3  ;;  %v4182_v47 = vpack.i.bf16 %v3113_v24, %v3119_v52  ;;  %v6448_v3 = vsel %vm819_vm4, %v2804_v29, %v2805_v63 }
 0x341   : > { %2338 = vrot.lane.b32.xlu1 %v7368_v53, %s4668_s1  ;;  %v2444_v53 = vrot.slane %v2123_v9, 4  ;;  %v4187_v9 = vpack.i.bf16 %v6444_v41, %v6448_v3 }
 0x343   : > { %v6394_v18 = vsel %vm1459_vm13, %v2020_v16, %v2444_v53  ;;  %v6453_v53 = vld [vmem:[#allocation2 + $0xa0] sm:$0xff] }
 0x344   : > { %7373 = vst [vmem:[#allocation33_spill] sm:$0xff] %v6394_v18  ;;  %v3114_v16 = vrot.slane %v6453_v53, 2 }
 0x380   : > { %v2305_v6 = vpop.permute.xlu2 %2304 }
 0x388   : > { %v2317_v57 = vpop.permute.xlu2 %2316 }
 0x390   : > { %v6399_v4 = vpop.permute.xlu2 %2334 }
 0x398   : > { %v6404_v15 = vpop.permute.xlu2 %2340 }
 0x399   : > { %v2358_v40 = vrot.slane %v6404_v15, 4 }
 0x39b   : > { %v2309_v2 = vpop.permute.xlu0 %2308  ;;  %v2301_v61 = vpop.permute.xlu1 %2300 }
 0x39c   : > { %v2327_v14 = vsel %vm591_vm6, %v2274_v37, %v2301_v61 }
 0x39d   : > { %v2328_v20 = vsel %vm593_vm7, %v2327_v14, %v2305_v6  ;;  %v4375_v6 = vld [vmem:[#allocation2 + $0xa8] sm:$0x3]  ;;  %v6464_v14 = vld [vmem:[#allocation2 + $0x80] sm:$0xff] }
 0x39e   : > { %v2329_v35 = vsel %vm595_vm8, %v2328_v20, %v2309_v2  ;;  %v3108_v20 = vrot.slane %v6464_v14, 2 }
 0x3a3   : > { %v2321_v60 = vpop.permute.xlu0 %2320  ;;  %v2313_v13 = vpop.permute.xlu1 %2312 }
 0x3a4   : > { %v2330_v10 = vsel %vm597_vm9, %v2329_v35, %v2313_v13  ;;  %v4377_v35 = vld [vmem:[#allocation2 + $0x88] sm:$0x3] }
 0x3a5   : > { %v2331_v27 = vsel %vm599_vm10, %v2330_v10, %v2317_v57  ;;  %v3115_v57 = vrot.slane %v4375_v6, 2 }
 0x3a6   : > { %v2332_v39 = vsel %vm601_vm11, %v2331_v27, %v2321_v60  ;;  %v3109_v60 = vrot.slane %v4377_v35, 2  ;;  %v4197_v27 = vpack.i.bf16 %v6430_v55, %v5763_v54 }
 0x3a7   : > { %v6458_v2 = vsel %vm1133_vm3, %v3114_v16, %v3115_v57 }
 0x3a8   : > { %v4192_v61 = vpack.i.bf16 %v6448_v3, %v6458_v2  ;;  %v3110_v13 = vsel %vm1133_vm3, %v3108_v20, %v3109_v60 }
 0x3a9   : > { %v4202_v10 = vpack.i.bf16 %v6430_v55, %v3110_v13 }
 0x3ab   : > { %v2325_v17 = vpop.permute.xlu1 %2324  ;;  %v6409_v26 = vpop.permute.xlu0 %2336 }
 0x3ac   : > { %v6407_v45 = vsel %vm603_vm12, %v2332_v39, %v2325_v17  ;;  %v2359_v12 = vsel %vm507_vm5, %v2358_v40, %v6409_v26  ;;  %v4212_v39 = vpack.i.bf16 %v6426_v32, %v5774_v38  ;;  %v4207_v17 = vpack.i.bf16 %v5763_v54, %v6444_v41 }
 0x3ad   : > { %v2365_v8 = vperm.slane %v2359_v12, %v5052_v42  ;;  %v4217_v40 = vpack.i.bf16 %v6453_v53, %v6426_v32  ;;  %v4227_v12 = vpack.i.bf16 %v6464_v14, %v5774_v38  ;;  %v4171_v54 = vunpack.i.h.bf16 %v6381_v44 }
 0x3af   : > { %v2370_v43 = vrot.slane %v2365_v8, 4 }
 0x3b3   : > { %v6415_v30 = vpop.permute.xlu1 %2338 }
 0x3b4   : > { %v2346_v0 = vrot.slane %v6415_v30, 4 }
 0x3b6   : > { %v2347_v46 = vsel %vm507_vm5, %v2346_v0, %v6399_v4  ;;  %v2447_v0 = vrot.slane %v6407_v45, 4  ;;  %v3136_v45 = vrot.slane %v3119_v52, 4 }
 0x3b7   : > { %v2353_v22 = vperm.slane %v2347_v46, %v5052_v42  ;;  %v2230_v46 = vsel %vm603_vm12, %v6385_v34, %v4171_v54  ;;  %v3138_v34 = vrot.slane %v3113_v24, 4 }
 0x3b9   : > { %v2372_v7 = vrot.slane %v2353_v22, 4  ;;  %v2371_v56 = vsel %vm507_vm5, %v2370_v43, %v2353_v22  ;;  %v6496_v43 = vsel %vm1459_vm13, %v2230_v46, %v2447_v0  ;;  %v3139_v19 = vsel %vm507_vm5, %v3119_v52, %v3138_v34 }
 0x3ba   : > { %v6423_v58 = vperm.slane %v2371_v56, %v5114_v25  ;;  %7374 = vst [vmem:[#allocation36_spill] sm:$0xff] %v6496_v43  ;;  %v6527_v63 = vperm.slane %v3139_v19, %v5052_v42 }
 0x3bb   : > { %v2373_v33 = vsel %vm507_vm5, %v2365_v8, %v2372_v7  ;;  %v4222_v8 = vpack.i.bf16 %v6464_v14, %v6453_v53 }
 0x3bc   : > { %v2381_v51 = vperm.slane %v2373_v33, %v5114_v25  ;;  %v2394_v37 = vrot.slane %v6423_v58, 4 }
 0x3be   : > { %2407 = vrot.lane.b32.xlu1 %v2381_v51, %s4671_s21  ;;  %v2395_v28 = vsel %vm507_vm5, 0.0, %v2394_v37  ;;  %v2396_v49 = vrot.slane %v2381_v51, 4  ;;  %v2823_v37 = vrot.slane %v6448_v3, 4 }
 0x3bf   : > { %2403 = vrot.lane.b32.xlu0 %v2395_v28, %s4675_s16  ;;  %v3124_v28 = vrot.slane %v6458_v2, 4 }
 0x3c0   : > { %v2397_v11 = vsel %vm507_vm5, 0.0, %v2396_v49  ;;  %v3137_v49 = vsel %vm507_vm5, %v3136_v45, %v3113_v24 }
 0x3c1   : > { %2411 = vrot.lane.b32.xlu2 %v2397_v11, %s4676_s12  ;;  %v3143_v11 = vperm.slane %v3137_v49, %v5052_v42  ;;  %v3125_v50 = vsel %vm507_vm5, %v3124_v28, %v3110_v13 }
 0x3c2   : > { %v3131_v6 = vperm.slane %v3125_v50, %v5052_v42 }
 0x3c6   : > { %3324 = vrot.lane.b32.xlu1 %v3119_v52, %s4668_s1  ;;  %v2826_v52 = vsel %vm507_vm5, %v6448_v3, %v2825_v5 }
 0x3c7   : > { %4183 = vrot.lane.b32.xlu0 %v4182_v47, %s4667_s10  ;;  %v6543_v20 = vperm.slane %v2826_v52, %v5052_v42 }
 0x3c9   : > { %4188 = vrot.lane.b32.xlu2 %v4187_v9, %s4668_s1 }
 0x3ce   : > { %3320 = vrot.lane.b32.xlu1 %v3113_v24, %s4668_s1 }
 0x3cf   : > { %4193 = vrot.lane.b32.xlu0 %v4192_v61, %s4667_s10  ;;  %v3148_v61 = vrot.slane %v3143_v11, 4 }
 0x3d1   : > { %3322 = vrot.lane.b32.xlu2 %v6458_v2, %s4668_s1 }
 0x3d6   : > { %4203 = vrot.lane.b32.xlu1 %v4202_v10, %s4667_s10 }
 0x3d7   : > { %4198 = vrot.lane.b32.xlu0 %v4197_v27, %s4668_s1 }
 0x3d9   : > { %3318 = vrot.lane.b32.xlu2 %v3110_v13, %s4668_s1 }
 0x3de   : > { %4213 = vrot.lane.b32.xlu1 %v4212_v39, %s4668_s1 }
 0x3df   : > { %4208 = vrot.lane.b32.xlu0 %v4207_v17, %s4667_s10  ;;  %v2818_v17 = vperm.slane %v5785_v1, %v5052_v42 }
 0x3e1   : > { %4218 = vrot.lane.b32.xlu2 %v4217_v40, %s4667_s10  ;;  %v2837_v50 = vrot.slane %v2818_v17, 4 }
 0x3e6   : > { %4228 = vrot.lane.b32.xlu1 %v4227_v12, %s4667_s10 }
 0x3e7   : > { %4223 = vrot.lane.b32.xlu0 %v4222_v8, %s4668_s1  ;;  %v3150_v8 = vrot.slane %v3131_v6, 4 }
 0x3e9   : > { %v6581_v52 = vsel %vm507_vm5, %v3143_v11, %v3150_v8 }
 0x41b   : > { %v6498_v22 = vpop.permute.xlu2 %2411 }
 0x41c   : > { %7375 = vst [vmem:[#allocation37_spill] sm:$0xff] %v6498_v22 }
 0x423   : > { %v6500_v38 = vpop.permute.xlu2 %4188 }
 0x424   : > { %v4190_v10 = vunpack.i.l.bf16 %v6500_v38  ;;  %v4191_v40 = vunpack.i.h.bf16 %v6500_v38  ;;  %v2502_v38 = vrot.slane %v6430_v55, 4 }
 0x426   : > { %v3029_v45 = vrot.slane %v4190_v10, 4  ;;  %v3031_v49 = vrot.slane %v4191_v40, 4 }
 0x42b   : > { %v6507_v44 = vpop.permute.xlu2 %3322 }
 0x42c   : > { %v3330_v23 = vrot.slane %v6507_v44, 4 }
 0x430   : > { %v2408_v7 = vpop.permute.xlu1 %2407 }
 0x431   : > { %v2404_v56 = vpop.permute.xlu0 %2403 }
 0x432   : > { %v2430_v33 = vsel %vm591_vm6, %v6423_v58, %v2404_v56  ;;  %v2824_v58 = vsel %vm507_vm5, %v2823_v37, %v6444_v41  ;;  %v3126_v41 = vrot.slane %v3110_v13, 4  ;;  %v3160_v13 = vrot.slane %v6527_v63, 4 }
 0x433   : > { %v6505_v59 = vsel %vm593_vm7, %v2430_v33, %v2408_v7  ;;  %v6520_v36 = vpop.permute.xlu2 %3318  ;;  %v2830_v24 = vperm.slane %v2824_v58, %v5052_v42  ;;  %v3149_v7 = vsel %vm507_vm5, %v3148_v61, %v3131_v6  ;;  %v7378_v58 = vld [vmem:[#allocation35_spill] sm:$0xff]  ;;  %v2503_v61 = vsel %vm507_vm5, %v2502_v38, %v6426_v32 }
 0x434   : > { %7376 = vst [vmem:[#allocation38_spill] sm:$0xff] %v6505_v59  ;;  %v3331_v47 = vsel %vm507_vm5, %v3330_v23, %v6520_v36  ;;  %v3127_v39 = vsel %vm507_vm5, %v6458_v2, %v3126_v41  ;;  %v2847_v2 = vrot.slane %v6543_v20, 4  ;;  %v6574_v19 = vperm.slane %v3149_v7, %v5114_v25 }
 0x435   : > { %v3337_v35 = vperm.slane %v3331_v47, %v5052_v42  ;;  %v2835_v27 = vrot.slane %v2830_v24, 4  ;;  %v6565_v1 = vperm.slane %v3127_v39, %v5052_v42  ;;  %v6578_v5 = vperm.slane %v7378_v58, %v5052_v42 }
 0x436   : > { %7377 = vst [vmem:[#allocation39_spill] sm:$0xff] %v6574_v19  ;;  %v2490_v41 = vrot.slane %v6453_v53, 4  ;;  %v6606_v8 = vsel %vm507_vm5, %v2830_v24, %v2837_v50 }
 0x437   : > { %v2836_v28 = vsel %vm507_vm5, %v2835_v27, %v2818_v17  ;;  %v6590_v6 = vsel %vm507_vm5, %v3160_v13, %v6565_v1  ;;  %v3032_v17 = vsel %vm507_vm5, %v4190_v10, %v3031_v49  ;;  %v6603_v13 = vsel %vm507_vm5, %v2847_v2, %v6578_v5 }
 0x438   : > { %v6509_v51 = vpop.permute.xlu1 %3324  ;;  %v6616_v2 = vperm.slane %v2503_v61, %v5052_v42  ;;  %v6619_v24 = vperm.slane %v3032_v17, %v5052_v42  ;;  %v3332_v49 = vrot.slane %v6520_v36, 4 }
 0x439   : > { %v6512_v62 = vpop.permute.xlu0 %4183  ;;  %v3342_v21 = vrot.slane %v6509_v51, 4 }
 0x43a   : > { %v4185_v3 = vunpack.i.l.bf16 %v6512_v62  ;;  %v4186_v54 = vunpack.i.h.bf16 %v6512_v62 }
 0x43c   : > { %v3239_v56 = vrot.slane %v4185_v3, 4  ;;  %v3241_v23 = vrot.slane %v4186_v54, 4 }
 0x43e   : > { %v3240_v47 = vsel %vm507_vm5, %v3239_v56, %v4186_v54  ;;  %v3242_v54 = vsel %vm507_vm5, %v4185_v3, %v3241_v23  ;;  %v6634_v23 = vsel %vm507_vm5, %v2490_v41, %v6464_v14 }
 0x43f   : > { %v3246_v7 = vperm.slane %v3240_v47, %v5052_v42  ;;  %v6627_v58 = vperm.slane %v3242_v54, %v5052_v42 }
 0x440   : > { %v6530_v29 = vpop.permute.xlu1 %3320 }
 0x441   : > { %v3343_v9 = vsel %vm507_vm5, %v3342_v21, %v6530_v29  ;;  %v6538_v16 = vpop.permute.xlu0 %4193  ;;  %v3263_v54 = vrot.slane %v6627_v58, 4 }
 0x442   : > { %v3349_v57 = vperm.slane %v3343_v9, %v5052_v42  ;;  %v4195_v0 = vunpack.i.l.bf16 %v6538_v16  ;;  %v6586_v9 = vperm.slane %v2836_v28, %v5114_v25 }
 0x444   : > { %v3354_v60 = vrot.slane %v3349_v57, 4  ;;  %v3227_v21 = vrot.slane %v4195_v0, 4 }
 0x446   : > { %v3355_v12 = vsel %vm507_vm5, %v3354_v60, %v3337_v35  ;;  %v3030_v60 = vsel %vm507_vm5, %v3029_v45, %v4191_v40  ;;  %v3356_v40 = vrot.slane %v3337_v35, 4 }
 0x447   : > { %v6558_v46 = vperm.slane %v3355_v12, %v5114_v25  ;;  %v3172_v12 = vrot.slane %v6574_v19, 4  ;;  %v3036_v38 = vperm.slane %v3030_v60, %v5052_v42 }
 0x448   : > { %v6561_v33 = vpop.permute.xlu1 %4203  ;;  %v3357_v35 = vsel %vm507_vm5, %v3349_v57, %v3356_v40 }
 0x449   : > { %v4205_v34 = vunpack.i.l.bf16 %v6561_v33  ;;  %v6569_v37 = vpop.permute.xlu0 %4198  ;;  %v3378_v62 = vrot.slane %v6558_v46, 4  ;;  %v6630_v50 = vsel %vm507_vm5, 0.0, %v3172_v12  ;;  %v3365_v36 = vperm.slane %v3357_v35, %v5114_v25 }
 0x44a   : > { %v4200_v11 = vunpack.i.l.bf16 %v6569_v37  ;;  %v3041_v17 = vrot.slane %v3036_v38, 4  ;;  %v3053_v12 = vrot.slane %v6619_v24, 4  ;;  %v7318_v48 = vunpack.i.h.bf16 %v6569_v37 }
 0x44b   : > { %v3228_v27 = vsel %vm507_vm5, %v3227_v21, %v4205_v34  ;;  %v3379_v39 = vsel %vm507_vm5, 0.0, %v3378_v62  ;;  %v3229_v56 = vrot.slane %v4205_v34, 4  ;;  %v2859_v62 = vrot.slane %v6586_v9, 4 }
 0x44c   : > { %3387 = vrot.lane.b32.xlu1 %v3379_v39, %s4675_s16  ;;  %v3234_v10 = vperm.slane %v3228_v27, %v5052_v42  ;;  %v3017_v3 = vrot.slane %v4200_v11, 4  ;;  %v3251_v21 = vrot.slane %v3246_v7, 4 }
 0x44d   : > { %v3230_v57 = vsel %vm507_vm5, %v4195_v0, %v3229_v56  ;;  %v6641_v39 = vsel %vm507_vm5, 0.0, %v2859_v62  ;;  %v6648_v0 = vsel %vm507_vm5, %v6507_v44, %v3332_v49  ;;  %v6651_v56 = vpop.permute.xlu2 %4218  ;;  %v3380_v44 = vrot.slane %v3365_v36, 4 }
 0x44e   : > { %v3253_v60 = vrot.slane %v3234_v10, 4  ;;  %v3252_v41 = vsel %vm507_vm5, %v3251_v21, %v3234_v10  ;;  %v6654_v35 = vperm.slane %v3230_v57, %v5052_v42  ;;  %v7316_v10 = vunpack.i.h.bf16 %v6561_v33 }
 0x44f   : > { %v6664_v40 = vperm.slane %v3252_v41, %v5114_v25 }
 0x450   : > { %v6612_v45 = vpop.permute.xlu1 %4213 }
 0x451   : > { %v4215_v28 = vunpack.i.l.bf16 %v6612_v45  ;;  %v6623_v34 = vpop.permute.xlu0 %4208  ;;  %v7379_v18 = vunpack.i.h.bf16 %v6612_v45 }
 0x453   : > { %v3018_v47 = vsel %vm507_vm5, %v3017_v3, %v4215_v28  ;;  %v3019_v61 = vrot.slane %v4215_v28, 4  ;;  %v3344_v3 = vrot.slane %v6530_v29, 4 }
 0x454   : > { %v3024_v27 = vperm.slane %v3018_v47, %v5052_v42  ;;  %3391 = vrot.lane.b32.xlu1 %v3365_v36, %s4671_s21  ;;  %v3254_v47 = vsel %vm507_vm5, %v3246_v7, %v3253_v60  ;;  %v3264_v60 = vsel %vm507_vm5, %v3263_v54, %v6654_v35  ;;  %v2609_v36 = vrot.slane %v7316_v10, 4 }
 0x455   : > { %v3020_v28 = vsel %vm507_vm5, %v4200_v11, %v3019_v61  ;;  %v7319_v61 = vunpack.i.h.bf16 %v6538_v16  ;;  %v3262_v41 = vperm.slane %v3254_v47, %v5114_v25  ;;  %v2712_v54 = vrot.slane %v7318_v48, 4 }
 0x456   : > { %v3043_v62 = vrot.slane %v3024_v27, 4  ;;  %v3042_v21 = vsel %vm507_vm5, %v3041_v17, %v3024_v27  ;;  %v3345_v27 = vsel %vm507_vm5, %v6509_v51, %v3344_v3  ;;  %v6698_v57 = vperm.slane %v3264_v60, %v5114_v25 }
 0x457   : > { %v6672_v11 = vperm.slane %v3042_v21, %v5114_v25  ;;  %v3381_v21 = vsel %vm507_vm5, 0.0, %v3380_v44  ;;  %v6701_v47 = vperm.slane %v3345_v27, %v5052_v42  ;;  %v2926_v17 = vrot.slane %v7319_v61, 4 }
 0x458   : > { %v3044_v49 = vsel %vm507_vm5, %v3036_v38, %v3043_v62  ;;  %v6676_v38 = vperm.slane %v3020_v28, %v5052_v42  ;;  %v7320_v62 = vunpack.i.l.bf16 %v6651_v56  ;;  %v6694_v51 = vpop.permute.xlu1 %4228  ;;  %v2713_v27 = vsel %vm507_vm5, %v2712_v54, %v7379_v18 }
 0x459   : > { %v6668_v31 = vpop.permute.xlu0 %4223  ;;  %v3052_v29 = vperm.slane %v3044_v49, %v5114_v25  ;;  %v3275_v49 = vrot.slane %v6664_v40, 4  ;;  %v3065_v10 = vrot.slane %v6672_v11, 4  ;;  %v3279_v18 = vrot.slane %v6698_v57, 4 }
 0x45a   : > { %v7317_v7 = vunpack.i.l.bf16 %v6668_v31  ;;  %v3054_v48 = vsel %vm507_vm5, %v3053_v12, %v6676_v38  ;;  %v2610_v60 = vsel %vm507_vm5, %v2609_v36, %v7320_v62  ;;  %v7380_v12 = vunpack.i.h.bf16 %v6668_v31 }
 0x45b   : > { %v4237_v3 = vpack.i.bf16 %v3052_v29, %v3262_v41  ;;  %v3276_v43 = vsel %vm507_vm5, 0.0, %v3275_v49  ;;  %v3066_v36 = vsel %vm507_vm5, 0.0, %v3065_v10  ;;  %v3060_v62 = vperm.slane %v3054_v48, %v5114_v25 }
 0x45c   : > { %v2700_v28 = vrot.slane %v7317_v7, 4  ;;  %3395 = vrot.lane.b32.xlu1 %v3381_v21, %s4676_s12  ;;  %v3067_v54 = vrot.slane %v3052_v29, 4  ;;  %v7381_v7 = vunpack.i.h.bf16 %v6651_v56  ;;  %v6730_v21 = vperm.slane %v2713_v27, %v5052_v42 }
 0x45d   : > { %4238 = vrot.lane.b32.xlu0 %v4237_v3, %s4671_s21  ;;  %v7382_v44 = vunpack.i.h.bf16 %v6623_v34  ;;  %v4232_v22 = vpack.i.bf16 %v3066_v36, %v3276_v43  ;;  %v3069_v10 = vrot.slane %v3060_v62, 4  ;;  %v3366_v29 = vrot.slane %v6701_v47, 4 }
 0x45e   : > { %v2701_v61 = vsel %vm507_vm5, %v2700_v28, %v7380_v12  ;;  %v2597_v3 = vrot.slane %v7381_v7, 4  ;;  %v7383_v28 = vunpack.i.l.bf16 %v6623_v34  ;;  %v3068_v48 = vsel %vm507_vm5, 0.0, %v3067_v54 }
 0x45f   : > { %v2914_v59 = vrot.slane %v7382_v44, 4  ;;  %v3277_v12 = vrot.slane %v3262_v41, 4  ;;  %v6740_v19 = vperm.slane %v2610_v60, %v5052_v42  ;;  %v7384_v7 = vunpack.i.h.bf16 %v6694_v51  ;;  %4233 = vrot.lane.b32.xlu2 %v4232_v22, %s4675_s16 }
 0x460   : > { %v2927_v49 = vsel %vm507_vm5, %v2926_v17, %v7383_v28  ;;  %v6746_v44 = vperm.slane %v2701_v61, %v5052_v42  ;;  %v7385_v43 = vunpack.i.l.bf16 %v6694_v51  ;;  %v3070_v41 = vsel %vm507_vm5, 0.0, %v3069_v10 }
 0x461   : > { %v2598_v27 = vsel %vm507_vm5, %v2597_v3, %v7384_v7  ;;  %v3280_v36 = vsel %vm507_vm5, 0.0, %v3279_v18  ;;  %v3278_v60 = vsel %vm507_vm5, 0.0, %v3277_v12  ;;  %v2724_v54 = vrot.slane %v6730_v21, 4 }
 0x462   : > { %v2915_v17 = vsel %vm507_vm5, %v2914_v59, %v7385_v43  ;;  %v6757_v28 = vperm.slane %v2927_v49, %v5052_v42  ;;  %v4272_v3 = vpack.i.bf16 %v3070_v41, %v3280_v36  ;;  %v4247_v61 = vpack.i.bf16 %v3068_v48, %v3278_v60 }
 0x463   : > { %v6761_v22 = vperm.slane %v6648_v0, %v5052_v42  ;;  %v3159_v59 = vperm.slane %v6581_v52, %v5114_v25  ;;  %v6767_v10 = vperm.slane %v6634_v23, %v5052_v42  ;;  %v2604_v18 = vperm.slane %v2598_v27, %v5052_v42 }
 0x464   : > { %v2921_v12 = vperm.slane %v2915_v17, %v5052_v42  ;;  %v2725_v49 = vsel %vm507_vm5, %v2724_v54, %v6746_v44  ;;  %4273 = vrot.lane.b32.xlu1 %v4272_v3, %s4677_s23  ;;  %v4242_v0 = vpack.i.bf16 %v6641_v39, %v6630_v50  ;;  %v6779_v52 = vperm.slane %v6603_v13, %v5114_v25 }
 0x465   : > { %4248 = vrot.lane.b32.xlu0 %v4247_v61, %s4676_s12  ;;  %v6783_v23 = vperm.slane %v6590_v6, %v5114_v25  ;;  %v2846_v48 = vperm.slane %v6606_v8, %v5114_v25  ;;  %v2621_v7 = vrot.slane %v6740_v19, 4  ;;  %v2938_v27 = vrot.slane %v6757_v28, 4 }
 0x466   : > { %v7386_v43 = vrot.slane %v6616_v2, 4  ;;  %v6795_v13 = vsel %vm507_vm5, %v3366_v29, %v6761_v22  ;;  %v6798_v39 = vperm.slane %v2725_v49, %v5114_v25  ;;  %v3055_v6 = vrot.slane %v6676_v38, 4 }
 0x467   : > { %v2622_v8 = vsel %vm507_vm5, %v2621_v7, %v2604_v18  ;;  %v2939_v17 = vsel %vm507_vm5, %v2938_v27, %v2921_v12  ;;  %4243 = vrot.lane.b32.xlu2 %v4242_v0, %s4675_s16  ;;  %v2861_v36 = vrot.slane %v2846_v48, 4  ;;  %v3174_v60 = vrot.slane %v3159_v59, 4 }
 0x468   : > { %v2515_v50 = vsel %vm507_vm5, %v7386_v43, %v6767_v10  ;;  %7387 = vst [vmem:[#allocation35_spill] sm:$0xff] %v6798_v39  ;;  %v3265_v54 = vrot.slane %v6654_v35, 4  ;;  %v4282_v29 = vpack.i.bf16 %v6779_v52, %v6783_v23  ;;  %v4257_v3 = vpack.i.bf16 %v3060_v62, %v6698_v57 }
 0x469   : > { %v6805_v41 = vperm.slane %v2515_v50, %v5114_v25  ;;  %v2748_v38 = vrot.slane %v6798_v39, 4  ;;  %v6813_v61 = vperm.slane %v2622_v8, %v5114_v25  ;;  %v6816_v49 = vperm.slane %v2939_v17, %v5114_v25 }
 0x46a   : > { %v3056_v35 = vsel %vm507_vm5, %v6619_v24, %v3055_v6  ;;  %v4252_v0 = vpack.i.bf16 %v2846_v48, %v3159_v59  ;;  %v2862_v57 = vsel %vm507_vm5, 0.0, %v2861_v36  ;;  %v3175_v62 = vsel %vm507_vm5, 0.0, %v3174_v60 }
 0x46b   : > { %v2538_v7 = vrot.slane %v6805_v41, 4  ;;  %v7388_v27 = vunpack.i.l.bf16 %v6623_v34  ;;  %v2623_v50 = vrot.slane %v2604_v18, 4  ;;  %v2940_v8 = vrot.slane %v2921_v12, 4 }
 0x46c   : > { %4283 = vrot.lane.b32.xlu1 %v4282_v29, %s4672_s30  ;;  %v3266_v17 = vsel %vm507_vm5, %v6627_v58, %v3265_v54  ;;  %v2749_v29 = vsel %vm507_vm5, 0.0, %v2748_v38  ;;  %v2962_v24 = vrot.slane %v6816_v49, 4  ;;  %v6833_v59 = vperm.slane %v3056_v35, %v5114_v25 }
 0x46d   : > { %4258 = vrot.lane.b32.xlu0 %v4257_v3, %s4672_s30  ;;  %v2928_v43 = vrot.slane %v7388_v27, 4  ;;  %v2645_v3 = vrot.slane %v6813_v61, 4  ;;  %v7389_v48 = vunpack.i.l.bf16 %v6651_v56  ;;  %v7390_v36 = vunpack.i.h.bf16 %v6694_v51 }
 0x46e   : > { %v7391_v18 = vunpack.i.l.bf16 %v6694_v51  ;;  %v3368_v58 = vrot.slane %v6761_v22, 4  ;;  %v2539_v54 = vsel %vm507_vm5, 0.0, %v2538_v7  ;;  %v4267_v38 = vpack.i.bf16 %v2862_v57, %v3175_v62 }
 0x46f   : > { %v2611_v6 = vrot.slane %v7389_v48, 4  ;;  %v2599_v60 = vrot.slane %v7390_v36, 4  ;;  %4253 = vrot.lane.b32.xlu2 %v4252_v0, %s4671_s21  ;;  %v6845_v27 = vperm.slane %v3266_v17, %v5114_v25  ;;  %v7392_v35 = vunpack.i.h.bf16 %v6561_v33 }
 0x470   : > { %v2916_v12 = vrot.slane %v7391_v18, 4  ;;  %v7393_v39 = vunpack.i.h.bf16 %v6538_v16  ;;  %v4292_v51 = vpack.i.bf16 %v2539_v54, %v2749_v29  ;;  %v2624_v0 = vsel %vm507_vm5, %v6740_v19, %v2623_v50 }
 0x471   : > { %v2612_v48 = vsel %vm507_vm5, %v7392_v35, %v2611_v6  ;;  %v2646_v22 = vsel %vm507_vm5, 0.0, %v2645_v3  ;;  %v2963_v7 = vsel %vm507_vm5, 0.0, %v2962_v24  ;;  %v3071_v57 = vrot.slane %v6833_v59, 4 }
 0x472   : > { %v2929_v36 = vsel %vm507_vm5, %v7393_v39, %v2928_v43  ;;  %v2941_v62 = vsel %vm507_vm5, %v6757_v28, %v2940_v8  ;;  %v7394_v33 = vunpack.i.h.bf16 %v6651_v56  ;;  %v7395_v16 = vunpack.i.h.bf16 %v6623_v34 }
 0x473   : > { %v6870_v19 = vsel %vm507_vm5, %v6701_v47, %v3368_v58  ;;  %v6873_v43 = vperm.slane %v2612_v48, %v5052_v42  ;;  %v6876_v28 = vperm.slane %v2929_v36, %v5052_v42  ;;  %v3281_v56 = vrot.slane %v6845_v27, 4 }
 0x474   : > { %v2600_v17 = vsel %vm507_vm5, %v7394_v33, %v2599_v60  ;;  %v2917_v39 = vsel %vm507_vm5, %v7395_v16, %v2916_v12  ;;  %4293 = vrot.lane.b32.xlu1 %v4292_v51, %s4675_s16  ;;  %v4262_v50 = vpack.i.bf16 %v2646_v22, %v2963_v7  ;;  %v2632_v34 = vperm.slane %v2624_v0, %v5114_v25 }
 0x475   : > { %4268 = vrot.lane.b32.xlu0 %v4267_v38, %s4676_s12  ;;  %v2949_v8 = vperm.slane %v2941_v62, %v5114_v25  ;;  %v6882_v29 = vperm.slane %v2600_v17, %v5052_v42  ;;  %v6885_v3 = vperm.slane %v2917_v39, %v5052_v42  ;;  %v3072_v47 = vsel %vm507_vm5, 0.0, %v3071_v57 }
 0x476   : > { %v2726_v24 = vrot.slane %v6746_v44, 4  ;;  %v2633_v6 = vrot.slane %v6873_v43, 4  ;;  %v2950_v60 = vrot.slane %v6876_v28, 4  ;;  %v3282_v18 = vsel %vm507_vm5, 0.0, %v3281_v56 }
 0x477   : > { %4263 = vrot.lane.b32.xlu2 %v4262_v50, %s4675_s16  ;;  %v4307_v12 = vpack.i.bf16 %v3072_v47, %v3282_v18  ;;  %v4277_v58 = vpack.i.bf16 %v2632_v34, %v2949_v8  ;;  %v2516_v54 = vrot.slane %v6767_v10, 4  ;;  %v3373_v38 = vperm.slane %v6795_v13, %v5114_v25 }
 0x478   : > { %v2634_v35 = vsel %vm507_vm5, %v2633_v6, %v6882_v29  ;;  %v2951_v44 = vsel %vm507_vm5, %v2950_v60, %v6885_v3  ;;  %v2727_v48 = vsel %vm507_vm5, %v6730_v21, %v2726_v24  ;;  %v2360_v7 = vrot.slane %v6409_v26, 4 }
 0x479   : > { %v6905_v36 = vperm.slane %v2634_v35, %v5114_v25  ;;  %v6908_v10 = vperm.slane %v2951_v44, %v5114_v25  ;;  %v2517_v13 = vsel %vm507_vm5, %v6616_v2, %v2516_v54  ;;  %v3382_v51 = vrot.slane %v3373_v38, 4 }
 0x47a   : > { %v2735_v0 = vperm.slane %v2727_v48, %v5114_v25  ;;  %v2525_v22 = vperm.slane %v2517_v13, %v5114_v25  ;;  %v2863_v57 = vrot.slane %v6779_v52, 4  ;;  %v3176_v17 = vrot.slane %v6783_v23, 4 }
 0x47b   : > { %v4317_v21 = vpack.i.bf16 %v6905_v36, %v6908_v10  ;;  %v3383_v62 = vsel %vm507_vm5, 0.0, %v3382_v51  ;;  %v2348_v16 = vrot.slane %v6399_v4, 4  ;;  %v2361_v26 = vsel %vm507_vm5, %v6404_v15, %v2360_v7 }
 0x47c   : > { %4308 = vrot.lane.b32.xlu1 %v4307_v12, %s4673_s3  ;;  %v2750_v33 = vrot.slane %v2735_v0, 4  ;;  %v2540_v2 = vrot.slane %v2525_v22, 4  ;;  %v4287_v39 = vpack.i.bf16 %v6833_v59, %v6845_v27  ;;  %v2864_v52 = vsel %vm507_vm5, 0.0, %v2863_v57 }
 0x47d   : > { %4278 = vrot.lane.b32.xlu0 %v4277_v58, %s4671_s21  ;;  %v3177_v50 = vsel %vm507_vm5, 0.0, %v3176_v17  ;;  %v2647_v23 = vrot.slane %v2632_v34, 4  ;;  %v2964_v47 = vrot.slane %v2949_v8, 4  ;;  %v2349_v24 = vsel %vm507_vm5, %v6415_v30, %v2348_v16 }
 0x47e   : > { %v2751_v56 = vsel %vm507_vm5, 0.0, %v2750_v33  ;;  %v2369_v4 = vperm.slane %v2361_v26, %v5052_v42  ;;  %v2541_v15 = vsel %vm507_vm5, 0.0, %v2540_v2  ;;  %v4302_v60 = vpack.i.bf16 %v2864_v52, %v3177_v50 }
 0x47f   : > { %3399 = vrot.lane.b32.xlu2 %v3373_v38, %s4672_s30  ;;  %v4327_v6 = vpack.i.bf16 %v2541_v15, %v2751_v56  ;;  %v2357_v59 = vperm.slane %v2349_v24, %v5052_v42  ;;  %v2648_v27 = vsel %vm507_vm5, 0.0, %v2647_v23  ;;  %v2965_v18 = vsel %vm507_vm5, 0.0, %v2964_v47 }
 0x480   : > { %v2382_v34 = vrot.slane %v2369_v4, 4  ;;  %v7396_v30 = vunpack.i.h.bf16 %v6668_v31  ;;  %v4297_v12 = vpack.i.bf16 %v2648_v27, %v2965_v18  ;;  %v2849_v58 = vrot.slane %v6578_v5, 4 }
 0x481   : > { %v3162_v54 = vrot.slane %v6565_v1, 4  ;;  %v2492_v35 = vrot.slane %v6464_v14, 4  ;;  %v7397_v44 = vunpack.i.l.bf16 %v6668_v31  ;;  %v4312_v51 = vpack.i.bf16 %v2525_v22, %v2735_v0 }
 0x482   : > { %v2702_v8 = vrot.slane %v7396_v30, 4  ;;  %v2383_v38 = vsel %vm507_vm5, %v2382_v34, %v2357_v59  ;;  %v2850_v7 = vsel %vm507_vm5, %v6543_v20, %v2849_v58  ;;  %v7398_v1 = vunpack.i.h.bf16 %v6612_v45 }
 0x483   : > { %v2389_v13 = vperm.slane %v2383_v38, %v5114_v25  ;;  %v3163_v5 = vsel %vm507_vm5, %v6527_v63, %v3162_v54  ;;  %v3377_v14 = vperm.slane %v6870_v19, %v5114_v25  ;;  %v2493_v31 = vsel %vm507_vm5, %v6453_v53, %v2492_v35 }
 0x484   : > { %4318 = vrot.lane.b32.xlu1 %v4317_v21, %s4672_s30  ;;  %v2703_v48 = vsel %vm507_vm5, %v7397_v44, %v2702_v8  ;;  %v2714_v21 = vrot.slane %v7398_v1, 4  ;;  %v2504_v57 = vrot.slane %v6426_v32, 4  ;;  %v2858_v20 = vperm.slane %v2850_v7, %v5114_v25 }
 0x485   : > { %3403 = vrot.lane.b32.xlu0 %v3383_v62, %s4677_s23  ;;  %v2711_v62 = vperm.slane %v2703_v48, %v5052_v42  ;;  %v3171_v63 = vperm.slane %v3163_v5, %v5114_v25  ;;  %v2501_v45 = vperm.slane %v2493_v31, %v5052_v42  ;;  %v7399_v0 = vunpack.i.h.bf16 %v6569_v37 }
 0x486   : > { %v2398_v22 = vrot.slane %v2389_v13, 4  ;;  %v3384_v53 = vrot.slane %v3377_v14, 4  ;;  %v2505_v32 = vsel %vm507_vm5, %v6430_v55, %v2504_v57  ;;  %v2865_v17 = vrot.slane %v2858_v20, 4 }
 0x487   : > { %4288 = vrot.lane.b32.xlu2 %v4287_v39, %s4674_s2  ;;  %v2715_v19 = vsel %vm507_vm5, %v7399_v0, %v2714_v21  ;;  %v2738_v33 = vrot.slane %v2711_v62, 4  ;;  %v3178_v2 = vrot.slane %v3171_v63, 4  ;;  %v2384_v16 = vrot.slane %v2357_v59, 4 }
 0x488   : > { %v2723_v26 = vperm.slane %v2715_v19, %v5052_v42  ;;  %v2513_v39 = vperm.slane %v2505_v32, %v5052_v42  ;;  %v2528_v52 = vrot.slane %v2501_v45, 4  ;;  %v2399_v37 = vsel %vm507_vm5, 0.0, %v2398_v22 }
 0x489   : > { %v3385_v56 = vsel %vm507_vm5, 0.0, %v3384_v53  ;;  %v4322_v50 = vpack.i.bf16 %v2858_v20, %v3171_v63  ;;  %v2866_v23 = vsel %vm507_vm5, 0.0, %v2865_v17  ;;  %v2385_v47 = vsel %vm507_vm5, %v2369_v4, %v2384_v16 }
 0x48a   : > { %v2739_v55 = vsel %vm507_vm5, %v2723_v26, %v2738_v33  ;;  %v3179_v24 = vsel %vm507_vm5, 0.0, %v3178_v2  ;;  %v2649_v15 = vrot.slane %v6905_v36, 4  ;;  %v2952_v59 = vrot.slane %v6885_v3, 4 }
 0x48b   : > { %v2966_v27 = vrot.slane %v6908_v10, 4  ;;  %v2747_v18 = vperm.slane %v2739_v55, %v5114_v25  ;;  %v2393_v4 = vperm.slane %v2385_v47, %v5114_v25  ;;  %v4337_v30 = vpack.i.bf16 %v2866_v23, %v3179_v24 }
 0x48c   : > { %4328 = vrot.lane.b32.xlu1 %v4327_v6, %s4676_s12  ;;  %v2529_v6 = vsel %vm507_vm5, %v2513_v39, %v2528_v52  ;;  %v2650_v8 = vsel %vm507_vm5, 0.0, %v2649_v15  ;;  %v2953_v3 = vsel %vm507_vm5, %v6876_v28, %v2952_v59  ;;  %v2736_v10 = vrot.slane %v2723_v26, 4 }
 0x48d   : > { %4303 = vrot.lane.b32.xlu0 %v4302_v60, %s4677_s23  ;;  %v2635_v60 = vrot.slane %v6882_v29, 4  ;;  %v2537_v34 = vperm.slane %v2529_v6, %v5114_v25  ;;  %v2967_v36 = vsel %vm507_vm5, 0.0, %v2966_v27  ;;  %v2526_v54 = vrot.slane %v2513_v39, 4 }
 0x48e   : > { %v4332_v38 = vpack.i.bf16 %v2650_v8, %v2967_v36  ;;  %v2961_v44 = vperm.slane %v2953_v3, %v5114_v25  ;;  %v2400_v53 = vrot.slane %v2393_v4, 4 }
 0x48f   : > { %4298 = vrot.lane.b32.xlu2 %v4297_v12, %s4676_s12  ;;  %v2754_v12 = vrot.slane %v2747_v18, 4  ;;  %v2636_v29 = vsel %vm507_vm5, %v6873_v43, %v2635_v60  ;;  %v2544_v58 = vrot.slane %v2537_v34, 4  ;;  %v2527_v28 = vsel %vm507_vm5, %v2526_v54, %v2501_v45 }
 0x490   : > { %v2644_v35 = vperm.slane %v2636_v29, %v5114_v25  ;;  %v2968_v21 = vrot.slane %v2961_v44, 4  ;;  %v2401_v33 = vsel %vm507_vm5, 0.0, %v2400_v53  ;;  %v4362_v2 = vpack.i.bf16 %v2537_v34, %v2747_v18 }
 0x491   : > { %v2755_v48 = vsel %vm507_vm5, 0.0, %v2754_v12  ;;  %v2545_v43 = vsel %vm507_vm5, 0.0, %v2544_v58 }
 0x492   : > { %v4347_v7 = vpack.i.bf16 %v2644_v35, %v2961_v44  ;;  %v2651_v1 = vrot.slane %v2644_v35, 4 }
 0x494   : > { %2415 = vrot.lane.b32.xlu1 %v2389_v13, %s4672_s30  ;;  %v2737_v13 = vsel %vm507_vm5, %v2736_v10, %v2711_v62  ;;  %v2652_v57 = vsel %vm507_vm5, 0.0, %v2651_v1  ;;  %v2969_v62 = vsel %vm507_vm5, 0.0, %v2968_v21 }
 0x495   : > { %4313 = vrot.lane.b32.xlu0 %v4312_v51, %s4671_s21  ;;  %v4367_v51 = vpack.i.bf16 %v2545_v43, %v2755_v48  ;;  %v2743_v5 = vperm.slane %v2737_v13, %v5114_v25  ;;  %v4357_v45 = vpack.i.bf16 %v2652_v57, %v2969_v62  ;;  %s7411_s21 = sld [smem:[#allocation45_spill]] }
 0x497   : > { %3407 = vrot.lane.b32.xlu2 %v3377_v14, %s4674_s2  ;;  %v2533_v14 = vperm.slane %v2527_v28, %v5114_v25  ;;  %v2752_v20 = vrot.slane %v2743_v5, 4 }
 0x499   : > { %v4342_v31 = vpack.i.bf16 %v2533_v14, %v2743_v5  ;;  %v2542_v63 = vrot.slane %v2533_v14, 4  ;;  %v2753_v0 = vsel %vm507_vm5, 0.0, %v2752_v20 }
 0x49b   : > { %v2543_v19 = vsel %vm507_vm5, 0.0, %v2542_v63 }
 0x49c   : > { %2419 = vrot.lane.b32.xlu1 %v2399_v37, %s4677_s23  ;;  %v4352_v22 = vpack.i.bf16 %v2543_v19, %v2753_v0 }
 0x49d   : > { %3411 = vrot.lane.b32.xlu0 %v3385_v56, %s4673_s3 }
 0x49f   : > { %4323 = vrot.lane.b32.xlu2 %v4322_v50, %s4674_s2 }
 0x4a4   : > { %2423 = vrot.lane.b32.xlu1 %v2393_v4, %s4674_s2 }
 0x4a5   : > { %4338 = vrot.lane.b32.xlu0 %v4337_v30, %s4673_s3 }
 0x4a7   : > { %4333 = vrot.lane.b32.xlu2 %v4332_v38, %s4677_s23 }
 0x4ac   : > { %4368 = vrot.lane.b32.xlu1 %v4367_v51, %s4673_s3 }
 0x4ad   : > { %4348 = vrot.lane.b32.xlu0 %v4347_v7, %s4674_s2 }
 0x4af   : > { %4343 = vrot.lane.b32.xlu2 %v4342_v31, %s4672_s30  ;;  %s3548_s30 = scalar_lea.hbm %s7411_s21, %s3728_s8 }
 0x4b0   : > { %s3551_s9 = sshll.u32 %s3548_s30, 4  ;;  %s3552_s9 = int_to_ptr.hbm [resolvable:$true] %s3551_s9 }
 0x4b5   : > { %4358 = vrot.lane.b32.xlu0 %v4357_v45, %s4673_s3 }
 0x4b7   : > { %4353 = vrot.lane.b32.xlu2 %v4352_v22, %s4677_s23 }
 0x4b9   : > { %v4234_v32 = vpop.permute.xlu2 %4233 }
 0x4ba   : > { %v4236_v37 = vunpack.i.h.bf16 %v4234_v32  ;;  %v4235_v56 = vunpack.i.l.bf16 %v4234_v32 }
 0x4bc   : > { %v3101_v60 = vsel %vm591_vm6, %v6672_v11, %v4236_v37  ;;  %v3311_v59 = vsel %vm591_vm6, %v6664_v40, %v4235_v56 }
 0x4bd   : > { %2427 = vrot.lane.b32.xlu0 %v2401_v33, %s4673_s3  ;;  %s7412_s3 = smov %s7411_s21 }
 0x4be   : > { %v3388_v17 = vpop.permute.xlu1 %3387 }
 0x4bf   : > { %4363 = vrot.lane.b32.xlu2 %v4362_v2, %s4674_s2  ;;  %v3414_v31 = vsel %vm591_vm6, %v6558_v46, %v3388_v17  ;;  %s383_s2 = scalar_lea.vmem [#allocation11], %s3719_s28 }
 0x4c0   : > { %s3549_s12 = sshll.u32 %s383_s2, 4  ;;  %s3550_s12 = int_to_ptr.vmem [resolvable:$true] %s3549_s12 }
 0x4c1   : > { %v4244_v16 = vpop.permute.xlu2 %4243 }
 0x4c2   : > { %v4246_v39 = vunpack.i.h.bf16 %v4244_v16  ;;  %v4245_v0 = vunpack.i.l.bf16 %v4244_v16 }
 0x4c4   : > { %v2895_v50 = vsel %vm591_vm6, %v6586_v9, %v4246_v39  ;;  %v7400_v39 = vld [vmem:[#allocation39_spill] sm:$0xff] }
 0x4c5   : > { %v3208_v37 = vsel %vm591_vm6, %v7400_v39, %v4245_v0 }
 0x4c6   : > { %v3392_v26 = vpop.permute.xlu1 %3391 }
 0x4c7   : > { %v3415_v57 = vsel %vm593_vm7, %v3414_v31, %v3392_v26 }
 0x4c9   : > { %v4254_v52 = vpop.permute.xlu2 %4253 }
 0x4ca   : > { %v4256_v55 = vunpack.i.h.bf16 %v4254_v52  ;;  %v4255_v22 = vunpack.i.l.bf16 %v4254_v52 }
 0x4cc   : > { %v7026_v47 = vsel %vm593_vm7, %v2895_v50, %v4256_v55  ;;  %v3209_v52 = vsel %vm593_vm7, %v3208_v37, %v4255_v22 }
 0x4ce   : > { %v3396_v23 = vpop.permute.xlu1 %3395 }
 0x4cf   : > { %v4239_v24 = vpop.permute.xlu0 %4238  ;;  %v3416_v62 = vsel %vm595_vm8, %v3415_v57, %v3396_v23 }
 0x4d0   : > { %v4241_v15 = vunpack.i.h.bf16 %v4239_v24  ;;  %v4240_v6 = vunpack.i.l.bf16 %v4239_v24 }
 0x4d1   : > { %v7034_v34 = vpop.permute.xlu2 %4263 }
 0x4d2   : > { %v3102_v27 = vsel %vm593_vm7, %v3101_v60, %v4241_v15  ;;  %v3312_v18 = vsel %vm593_vm7, %v3311_v59, %v4240_v6 }
 0x4d6   : > { %v4274_v9 = vpop.permute.xlu1 %4273 }
 0x4d7   : > { %v4249_v4 = vpop.permute.xlu0 %4248  ;;  %v4276_v11 = vunpack.i.h.bf16 %v4274_v9  ;;  %v4275_v16 = vunpack.i.l.bf16 %v4274_v9 }
 0x4d8   : > { %v4251_v30 = vunpack.i.h.bf16 %v4249_v4  ;;  %v4250_v20 = vunpack.i.l.bf16 %v4249_v4 }
 0x4d9   : > { %v3400_v36 = vpop.permute.xlu2 %3399 }
 0x4da   : > { %v3103_v8 = vsel %vm595_vm8, %v3102_v27, %v4251_v30  ;;  %v3417_v63 = vsel %vm597_vm9, %v3416_v62, %v3400_v36  ;;  %v3313_v53 = vsel %vm595_vm8, %v3312_v18, %v4250_v20  ;;  %v4266_v30 = vunpack.i.h.bf16 %v7034_v34 }
 0x4de   : > { %v7037_v12 = vpop.permute.xlu1 %4283 }
 0x4df   : > { %v4259_v29 = vpop.permute.xlu0 %4258  ;;  %v4285_v6 = vunpack.i.l.bf16 %v7037_v12 }
 0x4e0   : > { %v4261_v3 = vunpack.i.h.bf16 %v4259_v29  ;;  %v4260_v45 = vunpack.i.l.bf16 %v4259_v29 }
 0x4e1   : > { %v7040_v40 = vpop.permute.xlu2 %4288 }
 0x4e2   : > { %v3104_v10 = vsel %vm597_vm9, %v3103_v8, %v4261_v3  ;;  %v3314_v46 = vsel %vm597_vm9, %v3313_v53, %v4260_v45  ;;  %v4290_v55 = vunpack.i.l.bf16 %v7040_v40  ;;  %v4265_v8 = vunpack.i.l.bf16 %v7034_v34 }
 0x4e3   : > { %v7043_v58 = vsel %vm599_vm10, %v3104_v10, %v4276_v11  ;;  %v3315_v50 = vsel %vm599_vm10, %v3314_v46, %v4275_v16  ;;  %v4291_v31 = vunpack.i.h.bf16 %v7040_v40  ;;  %v4286_v45 = vunpack.i.h.bf16 %v7037_v12 }
 0x4e4   : > { %v3316_v60 = vsel %vm601_vm11, %v3315_v50, %v4290_v55 }
 0x4e6   : > { %v7045_v54 = vpop.permute.xlu1 %4293 }
 0x4e7   : > { %v7047_v38 = vpop.permute.xlu0 %4268  ;;  %v4296_v34 = vunpack.i.h.bf16 %v7045_v54  ;;  %v4295_v0 = vunpack.i.l.bf16 %v7045_v54 }
 0x4e8   : > { %v4270_v32 = vunpack.i.l.bf16 %v7047_v38  ;;  %v4271_v3 = vunpack.i.h.bf16 %v7047_v38  ;;  %v2681_v38 = vsel %vm591_vm6, %v6813_v61, %v4266_v30  ;;  %v3106_v61 = vsel %vm601_vm11, %v7043_v58, %v4291_v31 }
 0x4e9   : > { %v7049_v35 = vpop.permute.xlu2 %4298  ;;  %v2574_v54 = vsel %vm591_vm6, %v6805_v41, %v4296_v34 }
 0x4ea   : > { %v3210_v23 = vsel %vm595_vm8, %v3209_v52, %v4270_v32  ;;  %v2897_v40 = vsel %vm595_vm8, %v7026_v47, %v4271_v3  ;;  %v4301_v53 = vunpack.i.h.bf16 %v7049_v35  ;;  %v4300_v47 = vunpack.i.l.bf16 %v7049_v35 }
 0x4eb   : > { %v3211_v59 = vsel %vm597_vm9, %v3210_v23, %v4285_v6  ;;  %v2898_v16 = vsel %vm597_vm9, %v2897_v40, %v4286_v45 }
 0x4ee   : > { %v7051_v44 = vpop.permute.xlu1 %4308 }
 0x4ef   : > { %v7053_v48 = vpop.permute.xlu0 %4278  ;;  %v4310_v24 = vunpack.i.l.bf16 %v7051_v44  ;;  %v4311_v32 = vunpack.i.h.bf16 %v7051_v44 }
 0x4f0   : > { %v4281_v11 = vunpack.i.h.bf16 %v7053_v48  ;;  %v4280_v57 = vunpack.i.l.bf16 %v7053_v48 }
 0x4f1   : > { %v3408_v13 = vpop.permute.xlu2 %3407  ;;  %v3317_v18 = vsel %vm603_vm12, %v3316_v60, %v4310_v24  ;;  %v3107_v6 = vsel %vm603_vm12, %v3106_v61, %v4311_v32 }
 0x4f2   : > { %v2682_v48 = vsel %vm593_vm7, %v2681_v38, %v4281_v11  ;;  %v3428_v3 = vrot.slane %v3107_v6, 4 }
 0x4f3   : > { %v2683_v58 = vsel %vm595_vm8, %v2682_v48, %v4301_v53 }
 0x4f6   : > { %v7055_v43 = vpop.permute.xlu1 %4318 }
 0x4f7   : > { %v3404_v28 = vpop.permute.xlu0 %3403  ;;  %v4320_v12 = vunpack.i.l.bf16 %v7055_v43 }
 0x4f8   : > { %v3418_v19 = vsel %vm599_vm10, %v3417_v63, %v3404_v28  ;;  %v3431_v28 = vrot.slane %v3317_v18, 4  ;;  %v2998_v63 = vsel %vm591_vm6, %v6816_v49, %v4265_v8 }
 0x4f9   : > { %v7057_v51 = vpop.permute.xlu2 %4323  ;;  %v3419_v26 = vsel %vm601_vm11, %v3418_v19, %v3408_v13  ;;  %v4321_v19 = vunpack.i.h.bf16 %v7055_v43  ;;  %v2999_v49 = vsel %vm593_vm7, %v2998_v63, %v4280_v57 }
 0x4fa   : > { %v4325_v9 = vunpack.i.l.bf16 %v7057_v51  ;;  %v3000_v41 = vsel %vm595_vm8, %v2999_v49, %v4300_v47  ;;  %v7402_v49 = vld [vmem:[#allocation37_spill] sm:$0xff] }
 0x4fb   : > { %v2684_v43 = vsel %vm597_vm9, %v2683_v58, %v4321_v19  ;;  %v3438_v58 = vld [vmem:[#allocation9 + $0x4] sm:$0x3] }
 0x4fe   : > { %v7059_v7 = vpop.permute.xlu1 %4328 }
 0x4ff   : > { %v7061_v5 = vpop.permute.xlu0 %4303  ;;  %v4330_v52 = vunpack.i.l.bf16 %v7059_v7 }
 0x500   : > { %v4305_v15 = vunpack.i.l.bf16 %v7061_v5  ;;  %v4306_v37 = vunpack.i.h.bf16 %v7061_v5  ;;  %v4331_v5 = vunpack.i.h.bf16 %v7059_v7 }
 0x501   : > { %v7063_v1 = vpop.permute.xlu2 %4333 }
 0x502   : > { %v3212_v27 = vsel %vm599_vm10, %v3211_v59, %v4305_v15  ;;  %v4336_v35 = vunpack.i.h.bf16 %v7063_v1  ;;  %v4335_v55 = vunpack.i.l.bf16 %v7063_v1  ;;  %v2899_v60 = vsel %vm599_vm10, %v2898_v16, %v4306_v37 }
 0x503   : > { %v3213_v13 = vsel %vm601_vm11, %v3212_v27, %v4325_v9 }
 0x504   : > { %v2685_v1 = vsel %vm599_vm10, %v2684_v43, %v4336_v35  ;;  %v7407_v35 = vld [vmem:[#allocation31_spill] sm:$0xff] }
 0x506   : > { %v7065_v21 = vpop.permute.xlu1 %2415 }
 0x507   : > { %v7067_v14 = vpop.permute.xlu0 %4313 }
 0x508   : > { %v4315_v22 = vunpack.i.l.bf16 %v7067_v14  ;;  %v4316_v46 = vunpack.i.h.bf16 %v7067_v14  ;;  %v3001_v14 = vsel %vm597_vm9, %v3000_v41, %v4320_v12  ;;  %v7403_v12 = vld [vmem:[#allocation38_spill] sm:$0xff]  ;;  %v7406_v41 = vld [vmem:[#allocation33_spill] sm:$0xff] }
 0x509   : > { %v7077_v33 = vpop.permute.xlu2 %4343  ;;  %v3002_v30 = vsel %vm599_vm10, %v3001_v14, %v4335_v55  ;;  %v7408_v14 = vld [vmem:[#allocation32_spill] sm:$0xff] }
 0x50a   : > { %v2575_v23 = vsel %vm593_vm7, %v2574_v54, %v4316_v46  ;;  %v4345_v24 = vunpack.i.l.bf16 %v7077_v33  ;;  %v4346_v11 = vunpack.i.h.bf16 %v7077_v33  ;;  %v2432_v54 = vsel %vm595_vm8, %v7403_v12, %v7402_v49 }
 0x50b   : > { %v2576_v8 = vsel %vm595_vm8, %v2575_v23, %v4331_v5  ;;  %v2433_v32 = vsel %vm597_vm9, %v2432_v54, %v7065_v21  ;;  %v7409_v5 = vld [vmem:[#allocation34_spill] sm:$0xff] }
 0x50c   : > { %v2577_v19 = vsel %vm597_vm9, %v2576_v8, %v4346_v11 }
 0x50e   : > { %v7080_v17 = vpop.permute.xlu1 %2419 }
 0x50f   : > { %v3412_v2 = vpop.permute.xlu0 %3411 }
 0x510   : > { %v3420_v56 = vsel %vm603_vm12, %v3419_v26, %v3412_v2  ;;  %v7401_v26 = vld [vmem:[#allocation35_spill] sm:$0xff] }
 0x511   : > { %3724 = vmatpush.msk.msra.mxu2 %vm1459_vm13, %v3420_v56  ;;  %v7103_v36 = vpop.permute.xlu2 %4353  ;;  %v2784_v39 = vsel %vm591_vm6, %v7401_v26, %v4295_v0  ;;  %v4326_v56 = vunpack.i.h.bf16 %v7057_v51  ;;  %v2434_v26 = vsel %vm599_vm10, %v2433_v32, %v7080_v17  ;;  %v7405_v17 = vld [vmem:[#allocation36_spill] sm:$0xff] }
 0x512   : > { %v2785_v44 = vsel %vm593_vm7, %v2784_v39, %v4315_v22  ;;  %v4355_v51 = vunpack.i.l.bf16 %v7103_v36 }
 0x513   : > { %v2786_v59 = vsel %vm595_vm8, %v2785_v44, %v4330_v52  ;;  %v2454_v44 = vld [vmem:[#allocation9 + $0x2] sm:$0x3]  ;;  %v3467_v52 = vstv %s3466_s17  ;;  %s4512_s17 = sshra.s32 %s3552_s9, 4  ;;  %s4513_s17 = int_to_ptr.hbm [resolvable:$true] %s4512_s17 }
 0x514   : > { %vm3468_vm0 = vcmp.eq.s32.totalorder %v3467_v52, 1  ;;  %p4519_p11 = scmp.lt.s32.totalorder %s4513_s17, %s7412_s3 }
 0x516   : > { %v7108_v10 = vpop.permute.xlu1 %2423 }
 0x517   : > { %v7099_v4 = vpop.permute.xlu0 %4338  ;;  %v2435_v37 = vsel %vm601_vm11, %v2434_v26, %v7108_v10  ;;  %v1494_v10 = vstv %s1493_s11  ;;  %s3536_s11 = scalar_lea.sflag [#allocation5], %s4962_s26 }
 0x518   : > { %v4340_v29 = vunpack.i.l.bf16 %v7099_v4  ;;  %v4341_v27 = vunpack.i.h.bf16 %v7099_v4  ;;  %v2900_v4 = vsel %vm601_vm11, %v2899_v60, %v4326_v56  ;;  %v1489_v56 = vpop.f32.mrf.mxu0  ;;  %vm1495_vm15 = vcmp.eq.s32.totalorder %v1494_v10, 1 }
 0x519   : > { %v4364_v50 = vpop.permute.xlu2 %4363  ;;  %v1496_v55 = vsel %vm1495_vm15, %v1489_v56, 0.0 }
 0x51a   : > { %v3214_v62 = vsel %vm603_vm12, %v3213_v13, %v4340_v29  ;;  %v4365_v18 = vunpack.i.l.bf16 %v4364_v50  ;;  %v2787_v13 = vsel %vm597_vm9, %v2786_v59, %v4345_v24  ;;  %v4366_v38 = vunpack.i.h.bf16 %v4364_v50 }
 0x51b   : > { %v3436_v20 = vsel %vm1459_vm13, %v3214_v62, %v3431_v28  ;;  %v4356_v28 = vunpack.i.h.bf16 %v7103_v36  ;;  %v2788_v57 = vsel %vm599_vm10, %v2787_v13, %v4355_v51  ;;  %v1497_v23 = vadd.f32 %v1496_v55, %v7409_v5 }
 0x51c   : > { %3457 = vmatpush.msra.mxu2 %v3436_v20  ;;  %v2901_v20 = vsel %vm603_vm12, %v2900_v4, %v4341_v27  ;;  %v2789_v33 = vsel %vm601_vm11, %v2788_v57, %v4365_v18 }
 0x51d   : > { %v3425_v61 = vrot.slane %v2901_v20, 4  ;;  %v2578_v47 = vsel %vm599_vm10, %v2577_v19, %v4356_v28 }
 0x51e   : > { %v4369_v15 = vpop.permute.xlu1 %4368 }
 0x51f   : > { %v4349_v2 = vpop.permute.xlu0 %4348  ;;  %v4370_v29 = vunpack.i.l.bf16 %v4369_v15  ;;  %v4371_v0 = vunpack.i.h.bf16 %v4369_v15 }
 0x520   : > { %v4351_v9 = vunpack.i.h.bf16 %v4349_v2  ;;  %v4350_v7 = vunpack.i.l.bf16 %v4349_v2  ;;  %v2579_v2 = vsel %vm601_vm11, %v2578_v47, %v4366_v38 }
 0x521   : > { %v2790_v36 = vsel %vm603_vm12, %v2789_v33, %v4370_v29  ;;  %v2580_v39 = vsel %vm603_vm12, %v2579_v2, %v4371_v0 }
 0x522   : > { %v2686_v63 = vsel %vm601_vm11, %v2685_v1, %v4351_v9  ;;  %v3003_v45 = vsel %vm601_vm11, %v3002_v30, %v4350_v7  ;;  %v3434_v46 = vsel %vm1459_vm13, %v2790_v36, %v3425_v61 }
 0x527   : > { %v4359_v31 = vpop.permute.xlu0 %4358 }
 0x528   : > { %v4361_v62 = vunpack.i.h.bf16 %v4359_v31  ;;  %v4360_v34 = vunpack.i.l.bf16 %v4359_v31 }
 0x52a   : > { %v3004_v40 = vsel %vm603_vm12, %v3003_v45, %v4360_v34  ;;  %v2687_v48 = vsel %vm603_vm12, %v2686_v63, %v4361_v62 }
 0x52b   : > { %v3435_v22 = vsel %vm1459_vm13, %v3004_v40, %v3428_v3  ;;  %v3422_v53 = vrot.slane %v2687_v48, 4 }
 0x52c   : > { %3458 = vmatpush.msra.mxu2 %v3435_v22 }
 0x52d   : > { %v3433_v43 = vsel %vm1459_vm13, %v2580_v39, %v3422_v53 }
 0x52e   : > { %3459 = vmatpush.msra.mxu2 %v3434_v46 }
 0x52f   : > { %v2428_v16 = vpop.permute.xlu0 %2427 }
 0x530   : > { %3460 = vmatpush.msra.mxu2 %v3433_v43  ;;  %v2436_v21 = vsel %vm603_vm12, %v2435_v37, %v2428_v16 }
 0x531   : > { %3722 = vmatpush.msk.msra.mxu1 %vm1459_vm13, %v2436_v21  ;;  %3725 = vmatmul.msk.f32.vlgmr.msra.gmra.mxu2 %vm1465_vm14, %v3438_v58 }
 0x533   : > { %2473 = vmatpush.msra.mxu1 %v7405_v17 }
 0x535   : > { %2474 = vmatpush.msra.mxu1 %v7406_v41 }
 0x537   : > { %2475 = vmatpush.msra.mxu1 %v7407_v35 }
 0x539   : > { %2476 = vmatpush.msra.mxu1 %v7408_v14 }
 0x53a   : > { %3723 = vmatmul.msk.f32.vlgmr.msra.gmra.mxu1 %vm1465_vm14, %v2454_v44 }
 0x5b4   : > { %v3462_v50 = vpop.f32.mrf.mxu2 }
 0x5b5   : > { %v3469_v15 = vsel %vm3468_vm0, %v3462_v50, 0.0 }
 0x5b7   : > { %v2478_v24 = vpop.f32.mrf.mxu1 }
 0x5b8   : > { %v2481_v6 = vadd.f32 %v2478_v24, %v1497_v23 }
 0x5ba   : > { %v3470_v60 = vadd.f32 %v3469_v15, %v2481_v6 }
 0x5bc   : > { %3472 = vrot.lane.b32.xlu1 %v3470_v60, %s4678_s29  ;;  %3490 = vrot.lane.b32.xlu0 %v3470_v60, %s4679_s7  ;;  %s4514_s29 = scalar_lea.hbm %s4513_s17, 16 }
 0x5bd   : > { %3478 = vrot.lane.b32.xlu2 %v3470_v60, %s4680_s5  ;;  %p4515_p3 = scmp.ne.s32.totalorder %s4513_s17, %s4514_s29 }
 0x5bf   : > { %p4516_p6 = pnand %p4515_p3, %p4870_p5 }
 0x5c1   : > { %p4517_p2 = pneg %p4516_p6 }
 0x5c4   : > { %3487 = vrot.lane.b32.xlu1 %v3470_v60, %s4681_s18  ;;  %3484 = vrot.lane.b32.xlu0 %v3470_v60, %s4682_s27  ;;  %s4518_s18 = scalar_lea.hbm %s7412_s3, 256 }
 0x5c5   : > { %3475 = vrot.lane.b32.xlu2 %v3470_v60, %s4683_s14  ;;  %p4520_p13 = scmp.lt.s32.totalorder %s4518_s18, %s4514_s29 }
 0x5c7   : > { %p4521_p4 = por %p4520_p13, %p4519_p11 }
 0x5c9   : > { %p4522_p0 = pnand %p4521_p4, %p4517_p2 }
 0x5cd   : > { %3481 = vrot.lane.b32.xlu2 %v3470_v60, %s4684_s24 }
 0x617   : > { %v3479_v59 = vpop.permute.xlu2 %3478 }
 0x618   : > { %v3499_v27 = vrot.slane %v3479_v59, 4 }
 0x61f   : > { %v3476_v51 = vpop.permute.xlu2 %3475 }
 0x620   : > { %v3493_v1 = vrot.slane %v3476_v51, 4 }
 0x622   : > { %v3494_v8 = vsel %vm507_vm5, %v3493_v1, %v3470_v60 }
 0x623   : > { %v3498_v3 = vperm.slane %v3494_v8, %v5052_v42 }
 0x627   : > { %v3482_v62 = vpop.permute.xlu2 %3481 }
 0x62e   : > { %v3473_v18 = vpop.permute.xlu1 %3472  ;;  %v3491_v9 = vpop.permute.xlu0 %3490 }
 0x62f   : > { %v3500_v7 = vsel %vm507_vm5, %v3499_v27, %v3473_v18  ;;  %v3511_v11 = vrot.slane %v3491_v9, 4 }
 0x630   : > { %v3504_v30 = vperm.slane %v3500_v7, %v5052_v42 }
 0x632   : > { %v3517_v29 = vrot.slane %v3504_v30, 4 }
 0x634   : > { %v3518_v13 = vsel %vm507_vm5, %v3517_v29, %v3498_v3 }
 0x635   : > { %v3522_v20 = vperm.slane %v3518_v13, %v5114_v25 }
 0x636   : > { %v3488_v28 = vpop.permute.xlu1 %3487  ;;  %v3485_v31 = vpop.permute.xlu0 %3484 }
 0x637   : > { %v3505_v4 = vrot.slane %v3488_v28, 4  ;;  %v3512_v57 = vsel %vm507_vm5, %v3511_v11, %v3485_v31  ;;  %v3531_v0 = vrot.slane %v3522_v20, 4 }
 0x638   : > { %v3516_v34 = vperm.slane %v3512_v57, %v5052_v42 }
 0x639   : > { %v3506_v38 = vsel %vm507_vm5, %v3505_v4, %v3482_v62 }
 0x63a   : > { %v3510_v63 = vperm.slane %v3506_v38, %v5052_v42  ;;  %v3523_v45 = vrot.slane %v3516_v34, 4 }
 0x63c   : > { %v3524_v33 = vsel %vm507_vm5, %v3523_v45, %v3510_v63 }
 0x63d   : > { %v3528_v40 = vperm.slane %v3524_v33, %v5114_v25 }
 0x63f   : > { %v3529_v36 = vrot.slane %v3528_v40, 4  ;;  %v3532_v48 = vsel %vm507_vm5, %v3528_v40, %v3531_v0 }
 0x640   : > { %3534 = vst.msk [vmem:[%s383_s2 + $0x8] sm:$0xff] %vm591_vm6, %v3532_v48 }
 0x641   : > { %v3530_v42 = vsel %vm507_vm5, %v3529_v36, %v3522_v20 }
 0x642   : > { %3533 = vst.msk [vmem:[%s383_s2] sm:$0xff] %vm591_vm6, %v3530_v42 }
 0x643   : > { %4525 = shalt.err (!%p4522_p0)
}
 0x644   : > { %s4685_s26 = smov 128   ;;  %s4686_s14 = smov 1024  }
 0x645   : > { %3741 = dma.vmem_to_hbm [thread:$0]  (%p4870_p5), %s3550_s12, 256, %s3552_s9, %s3536_s11, %s4685_s26, %s4686_s14, %s4675_s16  }
 0x646 PF: > { %s7414_s24 = sld [smem:[#allocation18_spill]]  ;;  %p3764_p9 = scmp.ge.s32.totalorder %s4656_s6, 2 }
 0x648   : > { %p3758_p1 = pnand %p3764_p9, %p4820_p7 }
 0x64a   : > { %p3759_p10 = pneg %p3758_p1 }
 0x64c   : > { %s3566_s4 = sand.u32 1, %s7414_s24  }
 0x64d   : > { %s3567_s28 = scalar_lea.sflag [#allocation5], %s3566_s4 }
 0x64e   : > { %4599 = dma.done.wait (%p3759_p10), %s3567_s28, 256  }
 0x64f   : > { %4601 = vsyncadd (%p3759_p10), %s3567_s28, 4294967040  ;;  %s25_s6 = sadd.s32 1, %s4656_s6   ;;  %s7417_s16 = sld [smem:[#allocation19_spill]] }
 0x650   : > { %p7239_p8 = scmp.ge.s32.totalorder %s25_s6, 18   ;;  %s7418_s23 = sld [smem:[#allocation28_spill]] }
 0x651   : > { %s7419_s10 = sld [smem:[#allocation20_spill]]  ;;  %s7425_s18 = smov %s4608_s19 }
 0x652   : > { %s7420_s26 = sld [smem:[#allocation30_spill]]  ;;  %s7426_s19 = smov %s4612_s20 }
 0x653   : > { %s7421_s27 = sld [smem:[#allocation23_spill]]  ;;  %s7427_s20 = smov %s4938_s15 }
 0x654   : > { %s7422_s28 = sld [smem:[#allocation24_spill]]  ;;  %s7428_s21 = smov %s4620_s22 }
 0x655   : > { %s7423_s29 = sld [smem:[#allocation25_spill]]  ;;  %s7429_s22 = smov %s7417_s16 }
 0x656   : > { %s7424_s30 = sld [smem:[#allocation26_spill]]  ;;  %s7430_s24 = smov %s4632_s25 }
 0x657   : > { %s7431_s25 = smov %s7419_s10  ;;  %24 = sbr.rel (!%p7239_p8) target bundleno = 20 (0x14), region = 117 }
 0x65c   :  { %3573 = vsyncpa [#allocation4], 1 }
 0x65d   :  { %3575 = vsyncpa [#allocation4 + $0x1], 1 }
 0x65e   :  { %3576 = vsyncpa [#allocation7], 1 }
 0x65f   :  { %3578 = vsyncpa [#allocation7 + $0x1], 1 }
 0x660   :  { %3579 = vsyncpa [#allocation10], 1 }
 0x661   :  { %3580 = vsyncpa [#allocation5], 1 }
 0x662   :  { %3582 = vsyncpa [#allocation5 + $0x1], 1 }

</bundles_post_ra>
